<compile_context>
chip_gen: v7x
topology: tpu7x:2x2x1
jax: 0.10.0
libtpu: 0.0.40
codegen_flags: <defaults>
</compile_context>

<pallas_src>
import functools

import jax
import jax.numpy as jnp
from jax.experimental import pallas as pl
from jax.experimental.pallas import tpu as pltpu


_VMEM_LIMIT = 48 * 1024 * 1024  # explicit scoped-VMEM budget (< v7x 64 MiB physical)


def _largest_divisor(n, target, multiple=8):
    """Largest t <= target with n % t == 0 and t % multiple == 0 (fallback n)."""
    for t in range(min(n, target), 0, -1):
        if n % t == 0 and t % multiple == 0:
            return t
    return n


def _pick_row_tile(h):
    for t in (8, 4, 2):
        if h % t == 0:
            return t
    return h


# --------------------------------------------------------------------------
# Conv 3x3, padding=1, fused ReLU (+ optional fused 2x2 maxpool epilogue).
# One (batch, row-tile) per grid step; im2col -> single MXU matmul K=9*Cin.
# --------------------------------------------------------------------------
def _conv3x3_relu_kernel(x_ref, w_ref, b_ref, *out_refs, pool):
    # x_ref: (1, TH+2, W+2, Cin) bf16  (pre-haloed row window)
    # w_ref: (9*Cin, Cout) bf16        b_ref: (1, Cout) f32
    # out_refs[0]: (1, TH, W, Cout) bf16
    # out_refs[1] (pool=True): (1, TH//2, W//2, Cout) bf16
    o_ref = out_refs[0]
    _, TH, W, Cout = o_ref.shape

    x = x_ref[0]                                     # (TH+2, W+2, Cin)
    taps = []
    for dy in range(3):
        slab = x[dy:dy + TH]                         # (TH, W+2, Cin)
        for dx in range(3):
            taps.append(slab[:, dx:dx + W, :])       # (TH, W, Cin)
    # im2col patches: one bf16 MXU matmul with K = 9*Cin, f32 accumulate.
    patches = jnp.concatenate(taps, axis=-1).reshape(TH * W, -1)
    acc = jnp.dot(patches, w_ref[...], preferred_element_type=jnp.float32)
    acc = jnp.maximum(acc + b_ref[...], 0.0)         # bias + ReLU in f32
    out = acc.reshape(TH, W, Cout)
    o_ref[0] = out.astype(o_ref.dtype)

    if pool:
        p_ref = out_refs[1]
        th2, w2 = TH // 2, W // 2
        rows = jnp.max(out.reshape(th2, 2, W, Cout), axis=1)     # pool rows
        pooled = jnp.max(rows.reshape(th2, w2, 2, Cout), axis=2)  # pool cols
        p_ref[0] = pooled.astype(p_ref.dtype)


def conv3x3_relu(x, w_flat, bias, *, pool=False):
    """x: (G,H,W,Cin) bf16, w_flat: (9*Cin,Cout) bf16, bias: (1,Cout) f32."""
    G, H, W, Cin = x.shape
    Cout = w_flat.shape[1]
    TH = _pick_row_tile(H)
    nt = H // TH
    if pool:
        assert TH % 2 == 0 and W % 2 == 0, "2x2 maxpool needs even spatial dims"

    # Pre-haloed overlapping row windows: (G*nt, TH+2, W+2, Cin).
    # TODO(synk): replace this wrapper-side halo copy with in-kernel halo DMA
    # (manual make_async_copy from a pl.ANY-space ref) to save one HBM pass.
    xp = jnp.pad(x, ((0, 0), (1, 1), (1, 1), (0, 0)))
    xw = jnp.stack([xp[:, i * TH:i * TH + TH + 2] for i in range(nt)], axis=1)
    xw = xw.reshape(G * nt, TH + 2, W + 2, Cin)

    out_shape = [jax.ShapeDtypeStruct((G, H, W, Cout), jnp.bfloat16)]
    out_specs = [pl.BlockSpec((1, TH, W, Cout), lambda g, i: (g, i, 0, 0))]
    if pool:
        out_shape.append(
            jax.ShapeDtypeStruct((G, H // 2, W // 2, Cout), jnp.bfloat16))
        out_specs.append(
            pl.BlockSpec((1, TH // 2, W // 2, Cout), lambda g, i: (g, i, 0, 0)))

    return pl.pallas_call(
        functools.partial(_conv3x3_relu_kernel, pool=pool),
        out_shape=tuple(out_shape) if pool else out_shape[0],
        grid=(G, nt),
        in_specs=[
            pl.BlockSpec((1, TH + 2, W + 2, Cin),
                         lambda g, i: (g * nt + i, 0, 0, 0)),
            pl.BlockSpec((9 * Cin, Cout), lambda g, i: (0, 0)),
            pl.BlockSpec((1, Cout), lambda g, i: (0, 0)),
        ],
        out_specs=tuple(out_specs) if pool else out_specs[0],
        compiler_params=pltpu.CompilerParams(
            dimension_semantics=("parallel", "parallel"),
            vmem_limit_bytes=_VMEM_LIMIT),
    )(xw, w_flat, bias)


# --------------------------------------------------------------------------
# Gram matrix: gram[b] = F^T F / (C*H*W), F = feat[b] reshaped (H*W, C).
# Tiled accumulation over the HW axis into the resident (C,C) output block.
# --------------------------------------------------------------------------
def _gram_kernel(f_ref, o_ref, *, scale):
    k = pl.program_id(1)

    @pl.when(k == 0)
    def _():
        o_ref[...] = jnp.zeros_like(o_ref)

    f = f_ref[0]                                     # (TK, C) bf16
    o_ref[0] += jax.lax.dot_general(
        f, f, (((0,), (0,)), ((), ())), preferred_element_type=jnp.float32)

    @pl.when(k == pl.num_programs(1) - 1)
    def _():
        o_ref[...] = o_ref[...] * scale


def gram_matrix(feats):
    """feats: (G, H, W, C) -> (G, C, C) f32."""
    G, H, W, C = feats.shape
    HW = H * W
    f = feats.reshape(G, HW, C)
    TK = _largest_divisor(HW, 1024)
    nk = HW // TK
    return pl.pallas_call(
        functools.partial(_gram_kernel, scale=1.0 / float(C * HW)),
        out_shape=jax.ShapeDtypeStruct((G, C, C), jnp.float32),
        grid=(G, nk),
        in_specs=[pl.BlockSpec((1, TK, C), lambda g, k: (g, k, 0))],
        out_specs=pl.BlockSpec((1, C, C), lambda g, k: (g, 0, 0)),
        compiler_params=pltpu.CompilerParams(
            dimension_semantics=("parallel", "arbitrary"),
            vmem_limit_bytes=_VMEM_LIMIT),
    )(f)


# --------------------------------------------------------------------------
# Tiled MSE between the two batch halves of one array (input half vs target
# half), accumulated in an SMEM scalar; divides by the true element count.
# --------------------------------------------------------------------------
def _mse_split_kernel(a_ref, b_ref, o_ref, acc_ref, *, inv_count):
    first = (pl.program_id(0) == 0) & (pl.program_id(1) == 0)
    last = ((pl.program_id(0) == pl.num_programs(0) - 1)
            & (pl.program_id(1) == pl.num_programs(1) - 1))

    @pl.when(first)
    def _():
        acc_ref[0] = 0.0

    d = a_ref[...].astype(jnp.float32) - b_ref[...].astype(jnp.float32)
    acc_ref[0] += jnp.sum(d * d)

    @pl.when(last)
    def _():
        o_ref[0, 0] = acc_ref[0] * inv_count


def mse_between_halves(x):
    """x: (2B, R, C). Returns mean((x[:B] - x[B:])**2) as an f32 scalar."""
    G, R, C = x.shape
    B = G // 2
    TR = _largest_divisor(R, 1024)
    nr = R // TR
    inv_count = 1.0 / float(B * R * C)   # true element count of one half
    out = pl.pallas_call(
        functools.partial(_mse_split_kernel, inv_count=inv_count),
        out_shape=jax.ShapeDtypeStruct((1, 1), jnp.float32),
        grid=(B, nr),
        in_specs=[
            pl.BlockSpec((1, TR, C), lambda b, r: (b, r, 0)),
            pl.BlockSpec((1, TR, C), lambda b, r: (b + B, r, 0)),
        ],
        out_specs=pl.BlockSpec((1, 1), lambda b, r: (0, 0),
                               memory_space=pltpu.MemorySpace.SMEM),
        scratch_shapes=[pltpu.SMEM((1,), jnp.float32)],
        compiler_params=pltpu.CompilerParams(
            dimension_semantics=("arbitrary", "arbitrary"),
            vmem_limit_bytes=_VMEM_LIMIT),
    )(x, x)
    return out[0, 0]


# --------------------------------------------------------------------------
# VGGLoss module (forward semantics of the PyTorch reference).
# --------------------------------------------------------------------------
class VGGLossPallas:
    def __init__(self, key):
        # TODO(synk): pretrained IMAGENET1K_V1 VGG19 weights cannot be loaded
        # here; weights are deterministic synthetic tensors of the same shapes.
        k = jax.random.split(key, 8)

        def init_conv(kw, kb, cin, cout):
            std = (2.0 / (9 * cin)) ** 0.5
            w = jax.random.normal(kw, (3, 3, cin, cout), jnp.float32) * std
            b = jax.random.normal(kb, (cout,), jnp.float32) * 0.01
            # (3,3,Cin,Cout) -> (9*Cin,Cout): row = (dy*3+dx)*Cin + c, matching
            # the tap-concat order inside the conv kernel.
            return (w.reshape(9 * cin, cout).astype(jnp.bfloat16),
                    b.reshape(1, cout))

        self.w1a, self.b1a = init_conv(k[0], k[1], 3, 64)     # conv1_1
        self.w1b, self.b1b = init_conv(k[2], k[3], 64, 64)    # conv1_2
        self.w2a, self.b2a = init_conv(k[4], k[5], 64, 128)   # conv2_1
        self.w2b, self.b2b = init_conv(k[6], k[7], 128, 128)  # conv2_2

    def __call__(self, input_nchw, target_nchw):
        inp, tgt = input_nchw, target_nchw
        if inp.ndim == 5:  # (B, C, D, H, W) -> (B*D, C, H, W)
            b, c, d, h, w = inp.shape
            inp = jnp.transpose(inp, (0, 2, 1, 3, 4)).reshape(-1, c, h, w)
            tgt = jnp.transpose(tgt, (0, 2, 1, 3, 4)).reshape(-1, c, h, w)
        if inp.shape[1] == 1:
            inp = jnp.tile(inp, (1, 3, 1, 1))
        if tgt.shape[1] == 1:
            tgt = jnp.tile(tgt, (1, 3, 1, 1))
        B = inp.shape[0]

        # Run input and target through the shared-weight slices as ONE batched
        # pass: half the launches, double the grid length.
        x = jnp.concatenate([inp, tgt], axis=0)                   # (2B,3,H,W)
        x = jnp.transpose(x, (0, 2, 3, 1)).astype(jnp.bfloat16)   # NHWC bf16

        f = conv3x3_relu(x, self.w1a, self.b1a)                   # conv1_1+relu
        feat1, feat1_pool = conv3x3_relu(f, self.w1b, self.b1b,
                                         pool=True)               # conv1_2+relu (+fused pool1)
        f = conv3x3_relu(feat1_pool, self.w2a, self.b2a)          # conv2_1+relu
        feat2 = conv3x3_relu(f, self.w2b, self.b2b)               # conv2_2+relu

        G, H1, W1, C1 = feat1.shape
        content_loss = mse_between_halves(feat1.reshape(G, H1 * W1, C1))
        g1 = gram_matrix(feat1)
        g2 = gram_matrix(feat2)
        style_loss = mse_between_halves(g1) + mse_between_halves(g2)
        return content_loss, style_loss


if __name__ == "__main__":
    key = jax.random.PRNGKey(0)
    kx, kt, kp = jax.random.split(key, 3)
    # single-channel NCHW images (module repeats the channel to 3)
    x = jax.random.normal(kx, (2, 1, 16, 16), jnp.float32)
    t = jax.random.normal(kt, (2, 1, 16, 16), jnp.float32)

    model = VGGLossPallas(kp)
    loss_fn = jax.jit(lambda a, b: model(a, b))
    content, style = loss_fn(x, t)
    jax.block_until_ready((content, style))
    print("KERNEL_OK")
</pallas_src>

<mosaic_0001>
module attributes {stable_mosaic.version = 11 : i64} {
  func.func @_conv3x3_relu_kernel(%arg0: i32, %arg1: i32, %arg2: memref<1x10x18x3xbf16, #tpu.memory_space<vmem>>, %arg3: memref<27x64xbf16, #tpu.memory_space<vmem>>, %arg4: memref<1x64xf32, #tpu.memory_space<vmem>>, %arg5: memref<1x8x16x64xbf16, #tpu.memory_space<vmem>>) attributes {dimension_semantics = [#tpu.dimension_semantics<parallel>, #tpu.dimension_semantics<parallel>], iteration_bounds = array<i64: 4, 2>, scalar_prefetch = 0 : i64, scratch_operands = 0 : i64, tpu.core_type = #tpu.core_type<tc>, window_params = [{transform_indices = @transform_0, window_bounds = array<i64: 1, 10, 18, 3>}, {pipeline_mode = #tpu.pipeline_mode<synchronous>, transform_indices = @transform_1, window_bounds = array<i64: 27, 64>}, {pipeline_mode = #tpu.pipeline_mode<synchronous>, transform_indices = @transform_2, window_bounds = array<i64: 1, 64>}, {transform_indices = @transform_3, window_bounds = array<i64: 1, 8, 16, 64>}]} {
    %c0 = arith.constant 0 : index
    %c0_0 = arith.constant 0 : index
    %c0_1 = arith.constant 0 : index
    %c0_2 = arith.constant 0 : index
    %0 = vector.load %arg2[%c0, %c0_0, %c0_1, %c0_2] : memref<1x10x18x3xbf16, #tpu.memory_space<vmem>>, vector<1x10x18x3xbf16>
    %1 = vector.shape_cast %0 : vector<1x10x18x3xbf16> to vector<10x18x3xbf16>
    %2 = vector.extract_strided_slice %1 {offsets = [0, 0, 0], sizes = [8, 18, 3], strides = [1, 1, 1]} : vector<10x18x3xbf16> to vector<8x18x3xbf16>
    %3 = vector.extract_strided_slice %2 {offsets = [0, 0, 0], sizes = [8, 16, 3], strides = [1, 1, 1]} : vector<8x18x3xbf16> to vector<8x16x3xbf16>
    %4 = vector.extract_strided_slice %2 {offsets = [0, 1, 0], sizes = [8, 16, 3], strides = [1, 1, 1]} : vector<8x18x3xbf16> to vector<8x16x3xbf16>
    %5 = vector.extract_strided_slice %2 {offsets = [0, 2, 0], sizes = [8, 16, 3], strides = [1, 1, 1]} : vector<8x18x3xbf16> to vector<8x16x3xbf16>
    %6 = vector.extract_strided_slice %1 {offsets = [1, 0, 0], sizes = [8, 18, 3], strides = [1, 1, 1]} : vector<10x18x3xbf16> to vector<8x18x3xbf16>
    %7 = vector.extract_strided_slice %6 {offsets = [0, 0, 0], sizes = [8, 16, 3], strides = [1, 1, 1]} : vector<8x18x3xbf16> to vector<8x16x3xbf16>
    %8 = vector.extract_strided_slice %6 {offsets = [0, 1, 0], sizes = [8, 16, 3], strides = [1, 1, 1]} : vector<8x18x3xbf16> to vector<8x16x3xbf16>
    %9 = vector.extract_strided_slice %6 {offsets = [0, 2, 0], sizes = [8, 16, 3], strides = [1, 1, 1]} : vector<8x18x3xbf16> to vector<8x16x3xbf16>
    %10 = vector.extract_strided_slice %1 {offsets = [2, 0, 0], sizes = [8, 18, 3], strides = [1, 1, 1]} : vector<10x18x3xbf16> to vector<8x18x3xbf16>
    %11 = vector.extract_strided_slice %10 {offsets = [0, 0, 0], sizes = [8, 16, 3], strides = [1, 1, 1]} : vector<8x18x3xbf16> to vector<8x16x3xbf16>
    %12 = vector.extract_strided_slice %10 {offsets = [0, 1, 0], sizes = [8, 16, 3], strides = [1, 1, 1]} : vector<8x18x3xbf16> to vector<8x16x3xbf16>
    %13 = vector.extract_strided_slice %10 {offsets = [0, 2, 0], sizes = [8, 16, 3], strides = [1, 1, 1]} : vector<8x18x3xbf16> to vector<8x16x3xbf16>
    %14 = tpu.concatenate %3, %4, %5, %7, %8, %9, %11, %12, %13 in 2 : vector<8x16x3xbf16>, vector<8x16x3xbf16>, vector<8x16x3xbf16>, vector<8x16x3xbf16>, vector<8x16x3xbf16>, vector<8x16x3xbf16>, vector<8x16x3xbf16>, vector<8x16x3xbf16>, vector<8x16x3xbf16> -> vector<8x16x27xbf16>
    %15 = vector.shape_cast %14 : vector<8x16x27xbf16> to vector<128x27xbf16>
    %c0_3 = arith.constant 0 : index
    %c0_4 = arith.constant 0 : index
    %16 = vector.load %arg3[%c0_3, %c0_4] : memref<27x64xbf16, #tpu.memory_space<vmem>>, vector<27x64xbf16>
    %cst = arith.constant dense<0.000000e+00> : vector<128x64xf32>
    %17 = tpu.matmul %15, %16, %cst {dimension_numbers = #tpu.dot_dimension_numbers<[1], [0], [0], [1], [0, 0, 1, 1], [], []>} : vector<128x27xbf16>, vector<27x64xbf16>, vector<128x64xf32> -> vector<128x64xf32>
    %c0_5 = arith.constant 0 : index
    %c0_6 = arith.constant 0 : index
    %18 = vector.load %arg4[%c0_5, %c0_6] : memref<1x64xf32, #tpu.memory_space<vmem>>, vector<1x64xf32>
    %19 = vector.broadcast %18 : vector<1x64xf32> to vector<128x64xf32>
    %20 = arith.addf %17, %19 : vector<128x64xf32>
    %cst_7 = arith.constant 0.000000e+00 : f32
    %21 = vector.broadcast %cst_7 : f32 to vector<128x64xf32>
    %22 = arith.maximumf %20, %21 : vector<128x64xf32>
    %23 = vector.shape_cast %22 : vector<128x64xf32> to vector<8x16x64xf32>
    %24 = arith.truncf %23 : vector<8x16x64xf32> to vector<8x16x64xbf16>
    %c0_8 = arith.constant 0 : index
    %c0_9 = arith.constant 0 : index
    %c0_10 = arith.constant 0 : index
    %c0_11 = arith.constant 0 : index
    %25 = vector.load %arg5[%c0_8, %c0_9, %c0_10, %c0_11] : memref<1x8x16x64xbf16, #tpu.memory_space<vmem>>, vector<1x8x16x64xbf16>
    %26 = vector.shape_cast %25 : vector<1x8x16x64xbf16> to vector<8x16x64xbf16>
    %27 = vector.shape_cast %24 : vector<8x16x64xbf16> to vector<1x8x16x64xbf16>
    tpu.vector_store %arg5[%c0_8, %c0_9, %c0_10, %c0_11], %27 {strides = array<i32>} : memref<1x8x16x64xbf16, #tpu.memory_space<vmem>>, vector<1x8x16x64xbf16>,
    return
  }
  func.func @transform_0(%arg0: i32, %arg1: i32) -> (i32, i32, i32, i32) {
    %c2_i32 = arith.constant 2 : i32
    %0 = arith.muli %arg0, %c2_i32 : i32
    %1 = arith.addi %0, %arg1 : i32
    %c0_i32 = arith.constant 0 : i32
    %c0_i32_0 = arith.constant 0 : i32
    %c0_i32_1 = arith.constant 0 : i32
    %c0_i32_2 = arith.constant 0 : i32
    return %1, %c0_i32, %c0_i32_0, %c0_i32_1 : i32, i32, i32, i32
  }
  func.func @transform_1(%arg0: i32, %arg1: i32) -> (i32, i32) {
    %c0_i32 = arith.constant 0 : i32
    %c0_i32_0 = arith.constant 0 : i32
    %c0_i32_1 = arith.constant 0 : i32
    return %c0_i32, %c0_i32_0 : i32, i32
  }
  func.func @transform_2(%arg0: i32, %arg1: i32) -> (i32, i32) {
    %c0_i32 = arith.constant 0 : i32
    %c0_i32_0 = arith.constant 0 : i32
    %c0_i32_1 = arith.constant 0 : i32
    return %c0_i32, %c0_i32_0 : i32, i32
  }
  func.func @transform_3(%arg0: i32, %arg1: i32) -> (i32, i32, i32, i32) {
    %c0_i32 = arith.constant 0 : i32
    %c0_i32_0 = arith.constant 0 : i32
    %c0_i32_1 = arith.constant 0 : i32
    return %arg0, %arg1, %c0_i32, %c0_i32_0 : i32, i32, i32, i32
  }
}

module attributes {stable_mosaic.version = 11 : i64} {
  func.func @_conv3x3_relu_kernel(%arg0: i32, %arg1: i32, %arg2: memref<1x10x18x64xbf16, #tpu.memory_space<vmem>>, %arg3: memref<576x64xbf16, #tpu.memory_space<vmem>>, %arg4: memref<1x64xf32, #tpu.memory_space<vmem>>, %arg5: memref<1x8x16x64xbf16, #tpu.memory_space<vmem>>, %arg6: memref<1x4x8x64xbf16, #tpu.memory_space<vmem>>) attributes {dimension_semantics = [#tpu.dimension_semantics<parallel>, #tpu.dimension_semantics<parallel>], iteration_bounds = array<i64: 4, 2>, scalar_prefetch = 0 : i64, scratch_operands = 0 : i64, tpu.core_type = #tpu.core_type<tc>, window_params = [{transform_indices = @transform_0, window_bounds = array<i64: 1, 10, 18, 64>}, {pipeline_mode = #tpu.pipeline_mode<synchronous>, transform_indices = @transform_1, window_bounds = array<i64: 576, 64>}, {pipeline_mode = #tpu.pipeline_mode<synchronous>, transform_indices = @transform_2, window_bounds = array<i64: 1, 64>}, {transform_indices = @transform_3, window_bounds = array<i64: 1, 8, 16, 64>}, {transform_indices = @transform_4, window_bounds = array<i64: 1, 4, 8, 64>}]} {
    %c0 = arith.constant 0 : index
    %c0_0 = arith.constant 0 : index
    %c0_1 = arith.constant 0 : index
    %c0_2 = arith.constant 0 : index
    %0 = vector.load %arg2[%c0, %c0_0, %c0_1, %c0_2] : memref<1x10x18x64xbf16, #tpu.memory_space<vmem>>, vector<1x10x18x64xbf16>
    %1 = vector.shape_cast %0 : vector<1x10x18x64xbf16> to vector<10x18x64xbf16>
    %2 = vector.extract_strided_slice %1 {offsets = [0, 0, 0], sizes = [8, 18, 64], strides = [1, 1, 1]} : vector<10x18x64xbf16> to vector<8x18x64xbf16>
    %3 = vector.extract_strided_slice %2 {offsets = [0, 0, 0], sizes = [8, 16, 64], strides = [1, 1, 1]} : vector<8x18x64xbf16> to vector<8x16x64xbf16>
    %4 = vector.extract_strided_slice %2 {offsets = [0, 1, 0], sizes = [8, 16, 64], strides = [1, 1, 1]} : vector<8x18x64xbf16> to vector<8x16x64xbf16>
    %5 = vector.extract_strided_slice %2 {offsets = [0, 2, 0], sizes = [8, 16, 64], strides = [1, 1, 1]} : vector<8x18x64xbf16> to vector<8x16x64xbf16>
    %6 = vector.extract_strided_slice %1 {offsets = [1, 0, 0], sizes = [8, 18, 64], strides = [1, 1, 1]} : vector<10x18x64xbf16> to vector<8x18x64xbf16>
    %7 = vector.extract_strided_slice %6 {offsets = [0, 0, 0], sizes = [8, 16, 64], strides = [1, 1, 1]} : vector<8x18x64xbf16> to vector<8x16x64xbf16>
    %8 = vector.extract_strided_slice %6 {offsets = [0, 1, 0], sizes = [8, 16, 64], strides = [1, 1, 1]} : vector<8x18x64xbf16> to vector<8x16x64xbf16>
    %9 = vector.extract_strided_slice %6 {offsets = [0, 2, 0], sizes = [8, 16, 64], strides = [1, 1, 1]} : vector<8x18x64xbf16> to vector<8x16x64xbf16>
    %10 = vector.extract_strided_slice %1 {offsets = [2, 0, 0], sizes = [8, 18, 64], strides = [1, 1, 1]} : vector<10x18x64xbf16> to vector<8x18x64xbf16>
    %11 = vector.extract_strided_slice %10 {offsets = [0, 0, 0], sizes = [8, 16, 64], strides = [1, 1, 1]} : vector<8x18x64xbf16> to vector<8x16x64xbf16>
    %12 = vector.extract_strided_slice %10 {offsets = [0, 1, 0], sizes = [8, 16, 64], strides = [1, 1, 1]} : vector<8x18x64xbf16> to vector<8x16x64xbf16>
    %13 = vector.extract_strided_slice %10 {offsets = [0, 2, 0], sizes = [8, 16, 64], strides = [1, 1, 1]} : vector<8x18x64xbf16> to vector<8x16x64xbf16>
    %14 = tpu.concatenate %3, %4, %5, %7, %8, %9, %11, %12, %13 in 2 : vector<8x16x64xbf16>, vector<8x16x64xbf16>, vector<8x16x64xbf16>, vector<8x16x64xbf16>, vector<8x16x64xbf16>, vector<8x16x64xbf16>, vector<8x16x64xbf16>, vector<8x16x64xbf16>, vector<8x16x64xbf16> -> vector<8x16x576xbf16>
    %15 = vector.shape_cast %14 : vector<8x16x576xbf16> to vector<128x576xbf16>
    %c0_3 = arith.constant 0 : index
    %c0_4 = arith.constant 0 : index
    %16 = vector.load %arg3[%c0_3, %c0_4] : memref<576x64xbf16, #tpu.memory_space<vmem>>, vector<576x64xbf16>
    %cst = arith.constant dense<0.000000e+00> : vector<128x64xf32>
    %17 = tpu.matmul %15, %16, %cst {dimension_numbers = #tpu.dot_dimension_numbers<[1], [0], [0], [1], [0, 0, 1, 1], [], []>} : vector<128x576xbf16>, vector<576x64xbf16>, vector<128x64xf32> -> vector<128x64xf32>
    %c0_5 = arith.constant 0 : index
    %c0_6 = arith.constant 0 : index
    %18 = vector.load %arg4[%c0_5, %c0_6] : memref<1x64xf32, #tpu.memory_space<vmem>>, vector<1x64xf32>
    %19 = vector.broadcast %18 : vector<1x64xf32> to vector<128x64xf32>
    %20 = arith.addf %17, %19 : vector<128x64xf32>
    %cst_7 = arith.constant 0.000000e+00 : f32
    %21 = vector.broadcast %cst_7 : f32 to vector<128x64xf32>
    %22 = arith.maximumf %20, %21 : vector<128x64xf32>
    %23 = vector.shape_cast %22 : vector<128x64xf32> to vector<8x16x64xf32>
    %24 = arith.truncf %23 : vector<8x16x64xf32> to vector<8x16x64xbf16>
    %c0_8 = arith.constant 0 : index
    %c0_9 = arith.constant 0 : index
    %c0_10 = arith.constant 0 : index
    %c0_11 = arith.constant 0 : index
    %25 = vector.load %arg5[%c0_8, %c0_9, %c0_10, %c0_11] : memref<1x8x16x64xbf16, #tpu.memory_space<vmem>>, vector<1x8x16x64xbf16>
    %26 = vector.shape_cast %25 : vector<1x8x16x64xbf16> to vector<8x16x64xbf16>
    %27 = vector.shape_cast %24 : vector<8x16x64xbf16> to vector<1x8x16x64xbf16>
    tpu.vector_store %arg5[%c0_8, %c0_9, %c0_10, %c0_11], %27 {strides = array<i32>} : memref<1x8x16x64xbf16, #tpu.memory_space<vmem>>, vector<1x8x16x64xbf16>,
    %28 = vector.shape_cast %23 : vector<8x16x64xf32> to vector<4x2x16x64xf32>
    %cst_12 = arith.constant dense<0xFF800000> : vector<4x16x64xf32>
    %29 = vector.multi_reduction <maximumf>, %28, %cst_12 [1] : vector<4x2x16x64xf32> to vector<4x16x64xf32>
    %30 = vector.shape_cast %29 : vector<4x16x64xf32> to vector<4x8x2x64xf32>
    %cst_13 = arith.constant dense<0xFF800000> : vector<4x8x64xf32>
    %31 = vector.multi_reduction <maximumf>, %30, %cst_13 [2] : vector<4x8x2x64xf32> to vector<4x8x64xf32>
    %32 = arith.truncf %31 : vector<4x8x64xf32> to vector<4x8x64xbf16>
    %c0_14 = arith.constant 0 : index
    %c0_15 = arith.constant 0 : index
    %c0_16 = arith.constant 0 : index
    %c0_17 = arith.constant 0 : index
    %33 = vector.load %arg6[%c0_14, %c0_15, %c0_16, %c0_17] : memref<1x4x8x64xbf16, #tpu.memory_space<vmem>>, vector<1x4x8x64xbf16>
    %34 = vector.shape_cast %33 : vector<1x4x8x64xbf16> to vector<4x8x64xbf16>
    %35 = vector.shape_cast %32 : vector<4x8x64xbf16> to vector<1x4x8x64xbf16>
    tpu.vector_store %arg6[%c0_14, %c0_15, %c0_16, %c0_17], %35 {strides = array<i32>} : memref<1x4x8x64xbf16, #tpu.memory_space<vmem>>, vector<1x4x8x64xbf16>,
    return
  }
  func.func @transform_0(%arg0: i32, %arg1: i32) -> (i32, i32, i32, i32) {
    %c2_i32 = arith.constant 2 : i32
    %0 = arith.muli %arg0, %c2_i32 : i32
    %1 = arith.addi %0, %arg1 : i32
    %c0_i32 = arith.constant 0 : i32
    %c0_i32_0 = arith.constant 0 : i32
    %c0_i32_1 = arith.constant 0 : i32
    %c0_i32_2 = arith.constant 0 : i32
    return %1, %c0_i32, %c0_i32_0, %c0_i32_1 : i32, i32, i32, i32
  }
  func.func @transform_1(%arg0: i32, %arg1: i32) -> (i32, i32) {
    %c0_i32 = arith.constant 0 : i32
    %c0_i32_0 = arith.constant 0 : i32
    %c0_i32_1 = arith.constant 0 : i32
    return %c0_i32, %c0_i32_0 : i32, i32
  }
  func.func @transform_2(%arg0: i32, %arg1: i32) -> (i32, i32) {
    %c0_i32 = arith.constant 0 : i32
    %c0_i32_0 = arith.constant 0 : i32
    %c0_i32_1 = arith.constant 0 : i32
    return %c0_i32, %c0_i32_0 : i32, i32
  }
  func.func @transform_3(%arg0: i32, %arg1: i32) -> (i32, i32, i32, i32) {
    %c0_i32 = arith.constant 0 : i32
    %c0_i32_0 = arith.constant 0 : i32
    %c0_i32_1 = arith.constant 0 : i32
    return %arg0, %arg1, %c0_i32, %c0_i32_0 : i32, i32, i32, i32
  }
  func.func @transform_4(%arg0: i32, %arg1: i32) -> (i32, i32, i32, i32) {
    %c0_i32 = arith.constant 0 : i32
    %c0_i32_0 = arith.constant 0 : i32
    %c0_i32_1 = arith.constant 0 : i32
    return %arg0, %arg1, %c0_i32, %c0_i32_0 : i32, i32, i32, i32
  }
}

module attributes {stable_mosaic.version = 11 : i64} {
  func.func @_gram_kernel(%arg0: i32, %arg1: i32, %arg2: memref<1x256x64xbf16, #tpu.memory_space<vmem>>, %arg3: memref<1x64x64xf32, #tpu.memory_space<vmem>>) attributes {dimension_semantics = [#tpu.dimension_semantics<parallel>, #tpu.dimension_semantics<arbitrary>], iteration_bounds = array<i64: 4, 1>, scalar_prefetch = 0 : i64, scratch_operands = 0 : i64, tpu.core_type = #tpu.core_type<tc>, window_params = [{transform_indices = @transform_0, window_bounds = array<i64: 1, 256, 64>}, {transform_indices = @transform_1, window_bounds = array<i64: 1, 64, 64>}]} {
    %c0_i32 = arith.constant 0 : i32
    %0 = arith.cmpi eq, %arg1, %c0_i32 : i32
    %1 = arith.extui %0 : i1 to i32
    %c0_i32_0 = arith.constant 0 : i32
    %2 = arith.cmpi ne, %1, %c0_i32_0 : i32
    scf.if %2 {
      %cst_11 = arith.constant 0.000000e+00 : f32
      %15 = vector.broadcast %cst_11 : f32 to vector<1x64x64xf32>
      %c0_12 = arith.constant 0 : index
      %c0_13 = arith.constant 0 : index
      %c0_14 = arith.constant 0 : index
      %16 = vector.load %arg3[%c0_12, %c0_13, %c0_14] : memref<1x64x64xf32, #tpu.memory_space<vmem>>, vector<1x64x64xf32>
      tpu.vector_store %arg3[%c0_12, %c0_13, %c0_14], %15 {strides = array<i32>} : memref<1x64x64xf32, #tpu.memory_space<vmem>>, vector<1x64x64xf32>,
    } else {
    }
    %c0 = arith.constant 0 : index
    %c0_1 = arith.constant 0 : index
    %c0_2 = arith.constant 0 : index
    %3 = vector.load %arg2[%c0, %c0_1, %c0_2] : memref<1x256x64xbf16, #tpu.memory_space<vmem>>, vector<1x256x64xbf16>
    %4 = vector.shape_cast %3 : vector<1x256x64xbf16> to vector<256x64xbf16>
    %c0_3 = arith.constant 0 : index
    %c0_4 = arith.constant 0 : index
    %c0_5 = arith.constant 0 : index
    %5 = vector.load %arg3[%c0_3, %c0_4, %c0_5] : memref<1x64x64xf32, #tpu.memory_space<vmem>>, vector<1x64x64xf32>
    %6 = vector.shape_cast %5 : vector<1x64x64xf32> to vector<64x64xf32>
    %cst = arith.constant dense<0.000000e+00> : vector<64x64xf32>
    %7 = tpu.matmul %4, %4, %cst {dimension_numbers = #tpu.dot_dimension_numbers<[0], [0], [1], [1], [0, 1, 1, 1], [], []>} : vector<256x64xbf16>, vector<256x64xbf16>, vector<64x64xf32> -> vector<64x64xf32>
    %8 = arith.addf %6, %7 : vector<64x64xf32>
    %c0_6 = arith.constant 0 : index
    %c0_7 = arith.constant 0 : index
    %c0_8 = arith.constant 0 : index
    %9 = vector.load %arg3[%c0_6, %c0_7, %c0_8] : memref<1x64x64xf32, #tpu.memory_space<vmem>>, vector<1x64x64xf32>
    %10 = vector.shape_cast %9 : vector<1x64x64xf32> to vector<64x64xf32>
    %11 = vector.shape_cast %8 : vector<64x64xf32> to vector<1x64x64xf32>
    tpu.vector_store %arg3[%c0_6, %c0_7, %c0_8], %11 {strides = array<i32>} : memref<1x64x64xf32, #tpu.memory_space<vmem>>, vector<1x64x64xf32>,
    %c0_i32_9 = arith.constant 0 : i32
    %12 = arith.cmpi eq, %arg1, %c0_i32_9 : i32
    %13 = arith.extui %12 : i1 to i32
    %c0_i32_10 = arith.constant 0 : i32
    %14 = arith.cmpi ne, %13, %c0_i32_10 : i32
    scf.if %14 {
      %c0_11 = arith.constant 0 : index
      %c0_12 = arith.constant 0 : index
      %c0_13 = arith.constant 0 : index
      %15 = vector.load %arg3[%c0_11, %c0_12, %c0_13] : memref<1x64x64xf32, #tpu.memory_space<vmem>>, vector<1x64x64xf32>
      %cst_14 = arith.constant 6.10351563E-5 : f32
      %16 = vector.broadcast %cst_14 : f32 to vector<1x64x64xf32>
      %17 = arith.mulf %15, %16 : vector<1x64x64xf32>
      %c0_15 = arith.constant 0 : index
      %c0_16 = arith.constant 0 : index
      %c0_17 = arith.constant 0 : index
      %18 = vector.load %arg3[%c0_15, %c0_16, %c0_17] : memref<1x64x64xf32, #tpu.memory_space<vmem>>, vector<1x64x64xf32>
      tpu.vector_store %arg3[%c0_15, %c0_16, %c0_17], %17 {strides = array<i32>} : memref<1x64x64xf32, #tpu.memory_space<vmem>>, vector<1x64x64xf32>,
    } else {
    }
    return
  }
  func.func @transform_0(%arg0: i32, %arg1: i32) -> (i32, i32, i32) {
    %c0_i32 = arith.constant 0 : i32
    %c0_i32_0 = arith.constant 0 : i32
    return %arg0, %arg1, %c0_i32 : i32, i32, i32
  }
  func.func @transform_1(%arg0: i32, %arg1: i32) -> (i32, i32, i32) {
    %c0_i32 = arith.constant 0 : i32
    %c0_i32_0 = arith.constant 0 : i32
    %c0_i32_1 = arith.constant 0 : i32
    return %arg0, %c0_i32, %c0_i32_0 : i32, i32, i32
  }
}

module attributes {stable_mosaic.version = 11 : i64} {
  func.func @_mse_split_kernel(%arg0: i32, %arg1: i32, %arg2: memref<1x256x64xbf16, #tpu.memory_space<vmem>>, %arg3: memref<1x256x64xbf16, #tpu.memory_space<vmem>>, %arg4: memref<1x1xf32, #tpu.memory_space<smem>>, %arg5: memref<1xf32, #tpu.memory_space<smem>>) attributes {dimension_semantics = [#tpu.dimension_semantics<arbitrary>, #tpu.dimension_semantics<arbitrary>], iteration_bounds = array<i64: 2, 1>, scalar_prefetch = 0 : i64, scratch_operands = 1 : i64, tpu.core_type = #tpu.core_type<tc>, window_params = [{transform_indices = @transform_0, window_bounds = array<i64: 1, 256, 64>}, {transform_indices = @transform_1, window_bounds = array<i64: 1, 256, 64>}, {transform_indices = @transform_2, window_bounds = array<i64: 1, 1>}]} {
    %c0_i32 = arith.constant 0 : i32
    %0 = arith.cmpi eq, %arg0, %c0_i32 : i32
    %c0_i32_0 = arith.constant 0 : i32
    %1 = arith.cmpi eq, %arg1, %c0_i32_0 : i32
    %2 = arith.andi %0, %1 : i1
    %c1_i32 = arith.constant 1 : i32
    %3 = arith.cmpi eq, %arg0, %c1_i32 : i32
    %c0_i32_1 = arith.constant 0 : i32
    %4 = arith.cmpi eq, %arg1, %c0_i32_1 : i32
    %5 = arith.andi %3, %4 : i1
    %6 = arith.extui %2 : i1 to i32
    %c0_i32_2 = arith.constant 0 : i32
    %7 = arith.cmpi ne, %6, %c0_i32_2 : i32
    scf.if %7 {
      %cst_11 = arith.constant 0.000000e+00 : f32
      %c0_12 = arith.constant 0 : index
      %23 = memref.load %arg5[%c0_12] : memref<1xf32, #tpu.memory_space<smem>>
      memref.store %cst_11, %arg5[%c0_12] : memref<1xf32, #tpu.memory_space<smem>>
    } else {
    }
    %c0 = arith.constant 0 : index
    %c0_3 = arith.constant 0 : index
    %c0_4 = arith.constant 0 : index
    %8 = vector.load %arg2[%c0, %c0_3, %c0_4] : memref<1x256x64xbf16, #tpu.memory_space<vmem>>, vector<1x256x64xbf16>
    %9 = arith.extf %8 : vector<1x256x64xbf16> to vector<1x256x64xf32>
    %c0_5 = arith.constant 0 : index
    %c0_6 = arith.constant 0 : index
    %c0_7 = arith.constant 0 : index
    %10 = vector.load %arg3[%c0_5, %c0_6, %c0_7] : memref<1x256x64xbf16, #tpu.memory_space<vmem>>, vector<1x256x64xbf16>
    %11 = arith.extf %10 : vector<1x256x64xbf16> to vector<1x256x64xf32>
    %12 = arith.subf %9, %11 : vector<1x256x64xf32>
    %c0_8 = arith.constant 0 : index
    %13 = memref.load %arg5[%c0_8] : memref<1xf32, #tpu.memory_space<smem>>
    %14 = arith.mulf %12, %12 : vector<1x256x64xf32>
    %15 = vector.shape_cast %14 : vector<1x256x64xf32> to vector<1x1x256x64xf32>
    %cst = arith.constant dense<0.000000e+00> : vector<1xf32>
    %16 = vector.multi_reduction <add>, %15, %cst [1, 2, 3] : vector<1x1x256x64xf32> to vector<1xf32>
    %17 = vector.shape_cast %16 : vector<1xf32> to vector<1x1x1x1xf32>
    %18 = vector.extract %17[0, 0, 0, 0] : f32 from vector<1x1x1x1xf32>
    %19 = arith.addf %13, %18 : f32
    %c0_9 = arith.constant 0 : index
    %20 = memref.load %arg5[%c0_9] : memref<1xf32, #tpu.memory_space<smem>>
    memref.store %19, %arg5[%c0_9] : memref<1xf32, #tpu.memory_space<smem>>
    %21 = arith.extui %5 : i1 to i32
    %c0_i32_10 = arith.constant 0 : i32
    %22 = arith.cmpi ne, %21, %c0_i32_10 : i32
    scf.if %22 {
      %c0_11 = arith.constant 0 : index
      %23 = memref.load %arg5[%c0_11] : memref<1xf32, #tpu.memory_space<smem>>
      %cst_12 = arith.constant 3.05175781E-5 : f32
      %24 = arith.mulf %23, %cst_12 : f32
      %c0_13 = arith.constant 0 : index
      %c0_14 = arith.constant 0 : index
      %25 = memref.load %arg4[%c0_13, %c0_14] : memref<1x1xf32, #tpu.memory_space<smem>>
      memref.store %24, %arg4[%c0_13, %c0_14] : memref<1x1xf32, #tpu.memory_space<smem>>
    } else {
    }
    return
  }
  func.func @transform_0(%arg0: i32, %arg1: i32) -> (i32, i32, i32) {
    %c0_i32 = arith.constant 0 : i32
    %c0_i32_0 = arith.constant 0 : i32
    return %arg0, %arg1, %c0_i32 : i32, i32, i32
  }
  func.func @transform_1(%arg0: i32, %arg1: i32) -> (i32, i32, i32) {
    %c2_i32 = arith.constant 2 : i32
    %0 = arith.addi %arg0, %c2_i32 : i32
    %c0_i32 = arith.constant 0 : i32
    %c0_i32_0 = arith.constant 0 : i32
    return %0, %arg1, %c0_i32 : i32, i32, i32
  }
  func.func @transform_2(%arg0: i32, %arg1: i32) -> (i32, i32) {
    %c0_i32 = arith.constant 0 : i32
    %c0_i32_0 = arith.constant 0 : i32
    %c0_i32_1 = arith.constant 0 : i32
    return %c0_i32, %c0_i32_0 : i32, i32
  }
}

module attributes {stable_mosaic.version = 11 : i64} {
  func.func @_mse_split_kernel(%arg0: i32, %arg1: i32, %arg2: memref<1x64x64xf32, #tpu.memory_space<vmem>>, %arg3: memref<1x64x64xf32, #tpu.memory_space<vmem>>, %arg4: memref<1x1xf32, #tpu.memory_space<smem>>, %arg5: memref<1xf32, #tpu.memory_space<smem>>) attributes {dimension_semantics = [#tpu.dimension_semantics<arbitrary>, #tpu.dimension_semantics<arbitrary>], iteration_bounds = array<i64: 2, 1>, scalar_prefetch = 0 : i64, scratch_operands = 1 : i64, tpu.core_type = #tpu.core_type<tc>, window_params = [{transform_indices = @transform_0, window_bounds = array<i64: 1, 64, 64>}, {transform_indices = @transform_1, window_bounds = array<i64: 1, 64, 64>}, {transform_indices = @transform_2, window_bounds = array<i64: 1, 1>}]} {
    %c0_i32 = arith.constant 0 : i32
    %0 = arith.cmpi eq, %arg0, %c0_i32 : i32
    %c0_i32_0 = arith.constant 0 : i32
    %1 = arith.cmpi eq, %arg1, %c0_i32_0 : i32
    %2 = arith.andi %0, %1 : i1
    %c1_i32 = arith.constant 1 : i32
    %3 = arith.cmpi eq, %arg0, %c1_i32 : i32
    %c0_i32_1 = arith.constant 0 : i32
    %4 = arith.cmpi eq, %arg1, %c0_i32_1 : i32
    %5 = arith.andi %3, %4 : i1
    %6 = arith.extui %2 : i1 to i32
    %c0_i32_2 = arith.constant 0 : i32
    %7 = arith.cmpi ne, %6, %c0_i32_2 : i32
    scf.if %7 {
      %cst_11 = arith.constant 0.000000e+00 : f32
      %c0_12 = arith.constant 0 : index
      %21 = memref.load %arg5[%c0_12] : memref<1xf32, #tpu.memory_space<smem>>
      memref.store %cst_11, %arg5[%c0_12] : memref<1xf32, #tpu.memory_space<smem>>
    } else {
    }
    %c0 = arith.constant 0 : index
    %c0_3 = arith.constant 0 : index
    %c0_4 = arith.constant 0 : index
    %8 = vector.load %arg2[%c0, %c0_3, %c0_4] : memref<1x64x64xf32, #tpu.memory_space<vmem>>, vector<1x64x64xf32>
    %c0_5 = arith.constant 0 : index
    %c0_6 = arith.constant 0 : index
    %c0_7 = arith.constant 0 : index
    %9 = vector.load %arg3[%c0_5, %c0_6, %c0_7] : memref<1x64x64xf32, #tpu.memory_space<vmem>>, vector<1x64x64xf32>
    %10 = arith.subf %8, %9 : vector<1x64x64xf32>
    %c0_8 = arith.constant 0 : index
    %11 = memref.load %arg5[%c0_8] : memref<1xf32, #tpu.memory_space<smem>>
    %12 = arith.mulf %10, %10 : vector<1x64x64xf32>
    %13 = vector.shape_cast %12 : vector<1x64x64xf32> to vector<1x1x64x64xf32>
    %cst = arith.constant dense<0.000000e+00> : vector<1xf32>
    %14 = vector.multi_reduction <add>, %13, %cst [1, 2, 3] : vector<1x1x64x64xf32> to vector<1xf32>
    %15 = vector.shape_cast %14 : vector<1xf32> to vector<1x1x1x1xf32>
    %16 = vector.extract %15[0, 0, 0, 0] : f32 from vector<1x1x1x1xf32>
    %17 = arith.addf %11, %16 : f32
    %c0_9 = arith.constant 0 : index
    %18 = memref.load %arg5[%c0_9] : memref<1xf32, #tpu.memory_space<smem>>
    memref.store %17, %arg5[%c0_9] : memref<1xf32, #tpu.memory_space<smem>>
    %19 = arith.extui %5 : i1 to i32
    %c0_i32_10 = arith.constant 0 : i32
    %20 = arith.cmpi ne, %19, %c0_i32_10 : i32
    scf.if %20 {
      %c0_11 = arith.constant 0 : index
      %21 = memref.load %arg5[%c0_11] : memref<1xf32, #tpu.memory_space<smem>>
      %cst_12 = arith.constant 1.22070313E-4 : f32
      %22 = arith.mulf %21, %cst_12 : f32
      %c0_13 = arith.constant 0 : index
      %c0_14 = arith.constant 0 : index
      %23 = memref.load %arg4[%c0_13, %c0_14] : memref<1x1xf32, #tpu.memory_space<smem>>
      memref.store %22, %arg4[%c0_13, %c0_14] : memref<1x1xf32, #tpu.memory_space<smem>>
    } else {
    }
    return
  }
  func.func @transform_0(%arg0: i32, %arg1: i32) -> (i32, i32, i32) {
    %c0_i32 = arith.constant 0 : i32
    %c0_i32_0 = arith.constant 0 : i32
    return %arg0, %arg1, %c0_i32 : i32, i32, i32
  }
  func.func @transform_1(%arg0: i32, %arg1: i32) -> (i32, i32, i32) {
    %c2_i32 = arith.constant 2 : i32
    %0 = arith.addi %arg0, %c2_i32 : i32
    %c0_i32 = arith.constant 0 : i32
    %c0_i32_0 = arith.constant 0 : i32
    return %0, %arg1, %c0_i32 : i32, i32, i32
  }
  func.func @transform_2(%arg0: i32, %arg1: i32) -> (i32, i32) {
    %c0_i32 = arith.constant 0 : i32
    %c0_i32_0 = arith.constant 0 : i32
    %c0_i32_1 = arith.constant 0 : i32
    return %c0_i32, %c0_i32_0 : i32, i32
  }
}

module attributes {stable_mosaic.version = 11 : i64} {
  func.func @_conv3x3_relu_kernel(%arg0: i32, %arg1: i32, %arg2: memref<1x10x10x128xbf16, #tpu.memory_space<vmem>>, %arg3: memref<1152x128xbf16, #tpu.memory_space<vmem>>, %arg4: memref<1x128xf32, #tpu.memory_space<vmem>>, %arg5: memref<1x8x8x128xbf16, #tpu.memory_space<vmem>>) attributes {dimension_semantics = [#tpu.dimension_semantics<parallel>, #tpu.dimension_semantics<parallel>], iteration_bounds = array<i64: 4, 1>, scalar_prefetch = 0 : i64, scratch_operands = 0 : i64, tpu.core_type = #tpu.core_type<tc>, window_params = [{transform_indices = @transform_0, window_bounds = array<i64: 1, 10, 10, 128>}, {pipeline_mode = #tpu.pipeline_mode<synchronous>, transform_indices = @transform_1, window_bounds = array<i64: 1152, 128>}, {pipeline_mode = #tpu.pipeline_mode<synchronous>, transform_indices = @transform_2, window_bounds = array<i64: 1, 128>}, {transform_indices = @transform_3, window_bounds = array<i64: 1, 8, 8, 128>}]} {
    %c0 = arith.constant 0 : index
    %c0_0 = arith.constant 0 : index
    %c0_1 = arith.constant 0 : index
    %c0_2 = arith.constant 0 : index
    %0 = vector.load %arg2[%c0, %c0_0, %c0_1, %c0_2] : memref<1x10x10x128xbf16, #tpu.memory_space<vmem>>, vector<1x10x10x128xbf16>
    %1 = vector.shape_cast %0 : vector<1x10x10x128xbf16> to vector<10x10x128xbf16>
    %2 = vector.extract_strided_slice %1 {offsets = [0, 0, 0], sizes = [8, 10, 128], strides = [1, 1, 1]} : vector<10x10x128xbf16> to vector<8x10x128xbf16>
    %3 = vector.extract_strided_slice %2 {offsets = [0, 0, 0], sizes = [8, 8, 128], strides = [1, 1, 1]} : vector<8x10x128xbf16> to vector<8x8x128xbf16>
    %4 = vector.extract_strided_slice %2 {offsets = [0, 1, 0], sizes = [8, 8, 128], strides = [1, 1, 1]} : vector<8x10x128xbf16> to vector<8x8x128xbf16>
    %5 = vector.extract_strided_slice %2 {offsets = [0, 2, 0], sizes = [8, 8, 128], strides = [1, 1, 1]} : vector<8x10x128xbf16> to vector<8x8x128xbf16>
    %6 = vector.extract_strided_slice %1 {offsets = [1, 0, 0], sizes = [8, 10, 128], strides = [1, 1, 1]} : vector<10x10x128xbf16> to vector<8x10x128xbf16>
    %7 = vector.extract_strided_slice %6 {offsets = [0, 0, 0], sizes = [8, 8, 128], strides = [1, 1, 1]} : vector<8x10x128xbf16> to vector<8x8x128xbf16>
    %8 = vector.extract_strided_slice %6 {offsets = [0, 1, 0], sizes = [8, 8, 128], strides = [1, 1, 1]} : vector<8x10x128xbf16> to vector<8x8x128xbf16>
    %9 = vector.extract_strided_slice %6 {offsets = [0, 2, 0], sizes = [8, 8, 128], strides = [1, 1, 1]} : vector<8x10x128xbf16> to vector<8x8x128xbf16>
    %10 = vector.extract_strided_slice %1 {offsets = [2, 0, 0], sizes = [8, 10, 128], strides = [1, 1, 1]} : vector<10x10x128xbf16> to vector<8x10x128xbf16>
    %11 = vector.extract_strided_slice %10 {offsets = [0, 0, 0], sizes = [8, 8, 128], strides = [1, 1, 1]} : vector<8x10x128xbf16> to vector<8x8x128xbf16>
    %12 = vector.extract_strided_slice %10 {offsets = [0, 1, 0], sizes = [8, 8, 128], strides = [1, 1, 1]} : vector<8x10x128xbf16> to vector<8x8x128xbf16>
    %13 = vector.extract_strided_slice %10 {offsets = [0, 2, 0], sizes = [8, 8, 128], strides = [1, 1, 1]} : vector<8x10x128xbf16> to vector<8x8x128xbf16>
    %14 = tpu.concatenate %3, %4, %5, %7, %8, %9, %11, %12, %13 in 2 : vector<8x8x128xbf16>, vector<8x8x128xbf16>, vector<8x8x128xbf16>, vector<8x8x128xbf16>, vector<8x8x128xbf16>, vector<8x8x128xbf16>, vector<8x8x128xbf16>, vector<8x8x128xbf16>, vector<8x8x128xbf16> -> vector<8x8x1152xbf16>
    %15 = vector.shape_cast %14 : vector<8x8x1152xbf16> to vector<64x1152xbf16>
    %c0_3 = arith.constant 0 : index
    %c0_4 = arith.constant 0 : index
    %16 = vector.load %arg3[%c0_3, %c0_4] : memref<1152x128xbf16, #tpu.memory_space<vmem>>, vector<1152x128xbf16>
    %cst = arith.constant dense<0.000000e+00> : vector<64x128xf32>
    %17 = tpu.matmul %15, %16, %cst {dimension_numbers = #tpu.dot_dimension_numbers<[1], [0], [0], [1], [0, 0, 1, 1], [], []>} : vector<64x1152xbf16>, vector<1152x128xbf16>, vector<64x128xf32> -> vector<64x128xf32>
    %c0_5 = arith.constant 0 : index
    %c0_6 = arith.constant 0 : index
    %18 = vector.load %arg4[%c0_5, %c0_6] : memref<1x128xf32, #tpu.memory_space<vmem>>, vector<1x128xf32>
    %19 = vector.broadcast %18 : vector<1x128xf32> to vector<64x128xf32>
    %20 = arith.addf %17, %19 : vector<64x128xf32>
    %cst_7 = arith.constant 0.000000e+00 : f32
    %21 = vector.broadcast %cst_7 : f32 to vector<64x128xf32>
    %22 = arith.maximumf %20, %21 : vector<64x128xf32>
    %23 = vector.shape_cast %22 : vector<64x128xf32> to vector<8x8x128xf32>
    %24 = arith.truncf %23 : vector<8x8x128xf32> to vector<8x8x128xbf16>
    %c0_8 = arith.constant 0 : index
    %c0_9 = arith.constant 0 : index
    %c0_10 = arith.constant 0 : index
    %c0_11 = arith.constant 0 : index
    %25 = vector.load %arg5[%c0_8, %c0_9, %c0_10, %c0_11] : memref<1x8x8x128xbf16, #tpu.memory_space<vmem>>, vector<1x8x8x128xbf16>
    %26 = vector.shape_cast %25 : vector<1x8x8x128xbf16> to vector<8x8x128xbf16>
    %27 = vector.shape_cast %24 : vector<8x8x128xbf16> to vector<1x8x8x128xbf16>
    tpu.vector_store %arg5[%c0_8, %c0_9, %c0_10, %c0_11], %27 {strides = array<i32>} : memref<1x8x8x128xbf16, #tpu.memory_space<vmem>>, vector<1x8x8x128xbf16>,
    return
  }
  func.func @transform_0(%arg0: i32, %arg1: i32) -> (i32, i32, i32, i32) {
    %c1_i32 = arith.constant 1 : i32
    %0 = arith.muli %arg0, %c1_i32 : i32
    %1 = arith.addi %0, %arg1 : i32
    %c0_i32 = arith.constant 0 : i32
    %c0_i32_0 = arith.constant 0 : i32
    %c0_i32_1 = arith.constant 0 : i32
    %c0_i32_2 = arith.constant 0 : i32
    return %1, %c0_i32, %c0_i32_0, %c0_i32_1 : i32, i32, i32, i32
  }
  func.func @transform_1(%arg0: i32, %arg1: i32) -> (i32, i32) {
    %c0_i32 = arith.constant 0 : i32
    %c0_i32_0 = arith.constant 0 : i32
    %c0_i32_1 = arith.constant 0 : i32
    return %c0_i32, %c0_i32_0 : i32, i32
  }
  func.func @transform_2(%arg0: i32, %arg1: i32) -> (i32, i32) {
    %c0_i32 = arith.constant 0 : i32
    %c0_i32_0 = arith.constant 0 : i32
    %c0_i32_1 = arith.constant 0 : i32
    return %c0_i32, %c0_i32_0 : i32, i32
  }
  func.func @transform_3(%arg0: i32, %arg1: i32) -> (i32, i32, i32, i32) {
    %c0_i32 = arith.constant 0 : i32
    %c0_i32_0 = arith.constant 0 : i32
    %c0_i32_1 = arith.constant 0 : i32
    return %arg0, %arg1, %c0_i32, %c0_i32_0 : i32, i32, i32, i32
  }
}

module attributes {stable_mosaic.version = 11 : i64} {
  func.func @_conv3x3_relu_kernel(%arg0: i32, %arg1: i32, %arg2: memref<1x10x10x64xbf16, #tpu.memory_space<vmem>>, %arg3: memref<576x128xbf16, #tpu.memory_space<vmem>>, %arg4: memref<1x128xf32, #tpu.memory_space<vmem>>, %arg5: memref<1x8x8x128xbf16, #tpu.memory_space<vmem>>) attributes {dimension_semantics = [#tpu.dimension_semantics<parallel>, #tpu.dimension_semantics<parallel>], iteration_bounds = array<i64: 4, 1>, scalar_prefetch = 0 : i64, scratch_operands = 0 : i64, tpu.core_type = #tpu.core_type<tc>, window_params = [{transform_indices = @transform_0, window_bounds = array<i64: 1, 10, 10, 64>}, {pipeline_mode = #tpu.pipeline_mode<synchronous>, transform_indices = @transform_1, window_bounds = array<i64: 576, 128>}, {pipeline_mode = #tpu.pipeline_mode<synchronous>, transform_indices = @transform_2, window_bounds = array<i64: 1, 128>}, {transform_indices = @transform_3, window_bounds = array<i64: 1, 8, 8, 128>}]} {
    %c0 = arith.constant 0 : index
    %c0_0 = arith.constant 0 : index
    %c0_1 = arith.constant 0 : index
    %c0_2 = arith.constant 0 : index
    %0 = vector.load %arg2[%c0, %c0_0, %c0_1, %c0_2] : memref<1x10x10x64xbf16, #tpu.memory_space<vmem>>, vector<1x10x10x64xbf16>
    %1 = vector.shape_cast %0 : vector<1x10x10x64xbf16> to vector<10x10x64xbf16>
    %2 = vector.extract_strided_slice %1 {offsets = [0, 0, 0], sizes = [8, 10, 64], strides = [1, 1, 1]} : vector<10x10x64xbf16> to vector<8x10x64xbf16>
    %3 = vector.extract_strided_slice %2 {offsets = [0, 0, 0], sizes = [8, 8, 64], strides = [1, 1, 1]} : vector<8x10x64xbf16> to vector<8x8x64xbf16>
    %4 = vector.extract_strided_slice %2 {offsets = [0, 1, 0], sizes = [8, 8, 64], strides = [1, 1, 1]} : vector<8x10x64xbf16> to vector<8x8x64xbf16>
    %5 = vector.extract_strided_slice %2 {offsets = [0, 2, 0], sizes = [8, 8, 64], strides = [1, 1, 1]} : vector<8x10x64xbf16> to vector<8x8x64xbf16>
    %6 = vector.extract_strided_slice %1 {offsets = [1, 0, 0], sizes = [8, 10, 64], strides = [1, 1, 1]} : vector<10x10x64xbf16> to vector<8x10x64xbf16>
    %7 = vector.extract_strided_slice %6 {offsets = [0, 0, 0], sizes = [8, 8, 64], strides = [1, 1, 1]} : vector<8x10x64xbf16> to vector<8x8x64xbf16>
    %8 = vector.extract_strided_slice %6 {offsets = [0, 1, 0], sizes = [8, 8, 64], strides = [1, 1, 1]} : vector<8x10x64xbf16> to vector<8x8x64xbf16>
    %9 = vector.extract_strided_slice %6 {offsets = [0, 2, 0], sizes = [8, 8, 64], strides = [1, 1, 1]} : vector<8x10x64xbf16> to vector<8x8x64xbf16>
    %10 = vector.extract_strided_slice %1 {offsets = [2, 0, 0], sizes = [8, 10, 64], strides = [1, 1, 1]} : vector<10x10x64xbf16> to vector<8x10x64xbf16>
    %11 = vector.extract_strided_slice %10 {offsets = [0, 0, 0], sizes = [8, 8, 64], strides = [1, 1, 1]} : vector<8x10x64xbf16> to vector<8x8x64xbf16>
    %12 = vector.extract_strided_slice %10 {offsets = [0, 1, 0], sizes = [8, 8, 64], strides = [1, 1, 1]} : vector<8x10x64xbf16> to vector<8x8x64xbf16>
    %13 = vector.extract_strided_slice %10 {offsets = [0, 2, 0], sizes = [8, 8, 64], strides = [1, 1, 1]} : vector<8x10x64xbf16> to vector<8x8x64xbf16>
    %14 = tpu.concatenate %3, %4, %5, %7, %8, %9, %11, %12, %13 in 2 : vector<8x8x64xbf16>, vector<8x8x64xbf16>, vector<8x8x64xbf16>, vector<8x8x64xbf16>, vector<8x8x64xbf16>, vector<8x8x64xbf16>, vector<8x8x64xbf16>, vector<8x8x64xbf16>, vector<8x8x64xbf16> -> vector<8x8x576xbf16>
    %15 = vector.shape_cast %14 : vector<8x8x576xbf16> to vector<64x576xbf16>
    %c0_3 = arith.constant 0 : index
    %c0_4 = arith.constant 0 : index
    %16 = vector.load %arg3[%c0_3, %c0_4] : memref<576x128xbf16, #tpu.memory_space<vmem>>, vector<576x128xbf16>
    %cst = arith.constant dense<0.000000e+00> : vector<64x128xf32>
    %17 = tpu.matmul %15, %16, %cst {dimension_numbers = #tpu.dot_dimension_numbers<[1], [0], [0], [1], [0, 0, 1, 1], [], []>} : vector<64x576xbf16>, vector<576x128xbf16>, vector<64x128xf32> -> vector<64x128xf32>
    %c0_5 = arith.constant 0 : index
    %c0_6 = arith.constant 0 : index
    %18 = vector.load %arg4[%c0_5, %c0_6] : memref<1x128xf32, #tpu.memory_space<vmem>>, vector<1x128xf32>
    %19 = vector.broadcast %18 : vector<1x128xf32> to vector<64x128xf32>
    %20 = arith.addf %17, %19 : vector<64x128xf32>
    %cst_7 = arith.constant 0.000000e+00 : f32
    %21 = vector.broadcast %cst_7 : f32 to vector<64x128xf32>
    %22 = arith.maximumf %20, %21 : vector<64x128xf32>
    %23 = vector.shape_cast %22 : vector<64x128xf32> to vector<8x8x128xf32>
    %24 = arith.truncf %23 : vector<8x8x128xf32> to vector<8x8x128xbf16>
    %c0_8 = arith.constant 0 : index
    %c0_9 = arith.constant 0 : index
    %c0_10 = arith.constant 0 : index
    %c0_11 = arith.constant 0 : index
    %25 = vector.load %arg5[%c0_8, %c0_9, %c0_10, %c0_11] : memref<1x8x8x128xbf16, #tpu.memory_space<vmem>>, vector<1x8x8x128xbf16>
    %26 = vector.shape_cast %25 : vector<1x8x8x128xbf16> to vector<8x8x128xbf16>
    %27 = vector.shape_cast %24 : vector<8x8x128xbf16> to vector<1x8x8x128xbf16>
    tpu.vector_store %arg5[%c0_8, %c0_9, %c0_10, %c0_11], %27 {strides = array<i32>} : memref<1x8x8x128xbf16, #tpu.memory_space<vmem>>, vector<1x8x8x128xbf16>,
    return
  }
  func.func @transform_0(%arg0: i32, %arg1: i32) -> (i32, i32, i32, i32) {
    %c1_i32 = arith.constant 1 : i32
    %0 = arith.muli %arg0, %c1_i32 : i32
    %1 = arith.addi %0, %arg1 : i32
    %c0_i32 = arith.constant 0 : i32
    %c0_i32_0 = arith.constant 0 : i32
    %c0_i32_1 = arith.constant 0 : i32
    %c0_i32_2 = arith.constant 0 : i32
    return %1, %c0_i32, %c0_i32_0, %c0_i32_1 : i32, i32, i32, i32
  }
  func.func @transform_1(%arg0: i32, %arg1: i32) -> (i32, i32) {
    %c0_i32 = arith.constant 0 : i32
    %c0_i32_0 = arith.constant 0 : i32
    %c0_i32_1 = arith.constant 0 : i32
    return %c0_i32, %c0_i32_0 : i32, i32
  }
  func.func @transform_2(%arg0: i32, %arg1: i32) -> (i32, i32) {
    %c0_i32 = arith.constant 0 : i32
    %c0_i32_0 = arith.constant 0 : i32
    %c0_i32_1 = arith.constant 0 : i32
    return %c0_i32, %c0_i32_0 : i32, i32
  }
  func.func @transform_3(%arg0: i32, %arg1: i32) -> (i32, i32, i32, i32) {
    %c0_i32 = arith.constant 0 : i32
    %c0_i32_0 = arith.constant 0 : i32
    %c0_i32_1 = arith.constant 0 : i32
    return %arg0, %arg1, %c0_i32, %c0_i32_0 : i32, i32, i32, i32
  }
}

module attributes {stable_mosaic.version = 11 : i64} {
  func.func @_gram_kernel(%arg0: i32, %arg1: i32, %arg2: memref<1x64x128xbf16, #tpu.memory_space<vmem>>, %arg3: memref<1x128x128xf32, #tpu.memory_space<vmem>>) attributes {dimension_semantics = [#tpu.dimension_semantics<parallel>, #tpu.dimension_semantics<arbitrary>], iteration_bounds = array<i64: 4, 1>, scalar_prefetch = 0 : i64, scratch_operands = 0 : i64, tpu.core_type = #tpu.core_type<tc>, window_params = [{transform_indices = @transform_0, window_bounds = array<i64: 1, 64, 128>}, {transform_indices = @transform_1, window_bounds = array<i64: 1, 128, 128>}]} {
    %c0_i32 = arith.constant 0 : i32
    %0 = arith.cmpi eq, %arg1, %c0_i32 : i32
    %1 = arith.extui %0 : i1 to i32
    %c0_i32_0 = arith.constant 0 : i32
    %2 = arith.cmpi ne, %1, %c0_i32_0 : i32
    scf.if %2 {
      %cst_11 = arith.constant 0.000000e+00 : f32
      %15 = vector.broadcast %cst_11 : f32 to vector<1x128x128xf32>
      %c0_12 = arith.constant 0 : index
      %c0_13 = arith.constant 0 : index
      %c0_14 = arith.constant 0 : index
      %16 = vector.load %arg3[%c0_12, %c0_13, %c0_14] : memref<1x128x128xf32, #tpu.memory_space<vmem>>, vector<1x128x128xf32>
      tpu.vector_store %arg3[%c0_12, %c0_13, %c0_14], %15 {strides = array<i32>} : memref<1x128x128xf32, #tpu.memory_space<vmem>>, vector<1x128x128xf32>,
    } else {
    }
    %c0 = arith.constant 0 : index
    %c0_1 = arith.constant 0 : index
    %c0_2 = arith.constant 0 : index
    %3 = vector.load %arg2[%c0, %c0_1, %c0_2] : memref<1x64x128xbf16, #tpu.memory_space<vmem>>, vector<1x64x128xbf16>
    %4 = vector.shape_cast %3 : vector<1x64x128xbf16> to vector<64x128xbf16>
    %c0_3 = arith.constant 0 : index
    %c0_4 = arith.constant 0 : index
    %c0_5 = arith.constant 0 : index
    %5 = vector.load %arg3[%c0_3, %c0_4, %c0_5] : memref<1x128x128xf32, #tpu.memory_space<vmem>>, vector<1x128x128xf32>
    %6 = vector.shape_cast %5 : vector<1x128x128xf32> to vector<128x128xf32>
    %cst = arith.constant dense<0.000000e+00> : vector<128x128xf32>
    %7 = tpu.matmul %4, %4, %cst {dimension_numbers = #tpu.dot_dimension_numbers<[0], [0], [1], [1], [0, 1, 1, 1], [], []>} : vector<64x128xbf16>, vector<64x128xbf16>, vector<128x128xf32> -> vector<128x128xf32>
    %8 = arith.addf %6, %7 : vector<128x128xf32>
    %c0_6 = arith.constant 0 : index
    %c0_7 = arith.constant 0 : index
    %c0_8 = arith.constant 0 : index
    %9 = vector.load %arg3[%c0_6, %c0_7, %c0_8] : memref<1x128x128xf32, #tpu.memory_space<vmem>>, vector<1x128x128xf32>
    %10 = vector.shape_cast %9 : vector<1x128x128xf32> to vector<128x128xf32>
    %11 = vector.shape_cast %8 : vector<128x128xf32> to vector<1x128x128xf32>
    tpu.vector_store %arg3[%c0_6, %c0_7, %c0_8], %11 {strides = array<i32>} : memref<1x128x128xf32, #tpu.memory_space<vmem>>, vector<1x128x128xf32>,
    %c0_i32_9 = arith.constant 0 : i32
    %12 = arith.cmpi eq, %arg1, %c0_i32_9 : i32
    %13 = arith.extui %12 : i1 to i32
    %c0_i32_10 = arith.constant 0 : i32
    %14 = arith.cmpi ne, %13, %c0_i32_10 : i32
    scf.if %14 {
      %c0_11 = arith.constant 0 : index
      %c0_12 = arith.constant 0 : index
      %c0_13 = arith.constant 0 : index
      %15 = vector.load %arg3[%c0_11, %c0_12, %c0_13] : memref<1x128x128xf32, #tpu.memory_space<vmem>>, vector<1x128x128xf32>
      %cst_14 = arith.constant 1.22070313E-4 : f32
      %16 = vector.broadcast %cst_14 : f32 to vector<1x128x128xf32>
      %17 = arith.mulf %15, %16 : vector<1x128x128xf32>
      %c0_15 = arith.constant 0 : index
      %c0_16 = arith.constant 0 : index
      %c0_17 = arith.constant 0 : index
      %18 = vector.load %arg3[%c0_15, %c0_16, %c0_17] : memref<1x128x128xf32, #tpu.memory_space<vmem>>, vector<1x128x128xf32>
      tpu.vector_store %arg3[%c0_15, %c0_16, %c0_17], %17 {strides = array<i32>} : memref<1x128x128xf32, #tpu.memory_space<vmem>>, vector<1x128x128xf32>,
    } else {
    }
    return
  }
  func.func @transform_0(%arg0: i32, %arg1: i32) -> (i32, i32, i32) {
    %c0_i32 = arith.constant 0 : i32
    %c0_i32_0 = arith.constant 0 : i32
    return %arg0, %arg1, %c0_i32 : i32, i32, i32
  }
  func.func @transform_1(%arg0: i32, %arg1: i32) -> (i32, i32, i32) {
    %c0_i32 = arith.constant 0 : i32
    %c0_i32_0 = arith.constant 0 : i32
    %c0_i32_1 = arith.constant 0 : i32
    return %arg0, %c0_i32, %c0_i32_0 : i32, i32, i32
  }
}

module attributes {stable_mosaic.version = 11 : i64} {
  func.func @_mse_split_kernel(%arg0: i32, %arg1: i32, %arg2: memref<1x128x128xf32, #tpu.memory_space<vmem>>, %arg3: memref<1x128x128xf32, #tpu.memory_space<vmem>>, %arg4: memref<1x1xf32, #tpu.memory_space<smem>>, %arg5: memref<1xf32, #tpu.memory_space<smem>>) attributes {dimension_semantics = [#tpu.dimension_semantics<arbitrary>, #tpu.dimension_semantics<arbitrary>], iteration_bounds = array<i64: 2, 1>, scalar_prefetch = 0 : i64, scratch_operands = 1 : i64, tpu.core_type = #tpu.core_type<tc>, window_params = [{transform_indices = @transform_0, window_bounds = array<i64: 1, 128, 128>}, {transform_indices = @transform_1, window_bounds = array<i64: 1, 128, 128>}, {transform_indices = @transform_2, window_bounds = array<i64: 1, 1>}]} {
    %c0_i32 = arith.constant 0 : i32
    %0 = arith.cmpi eq, %arg0, %c0_i32 : i32
    %c0_i32_0 = arith.constant 0 : i32
    %1 = arith.cmpi eq, %arg1, %c0_i32_0 : i32
    %2 = arith.andi %0, %1 : i1
    %c1_i32 = arith.constant 1 : i32
    %3 = arith.cmpi eq, %arg0, %c1_i32 : i32
    %c0_i32_1 = arith.constant 0 : i32
    %4 = arith.cmpi eq, %arg1, %c0_i32_1 : i32
    %5 = arith.andi %3, %4 : i1
    %6 = arith.extui %2 : i1 to i32
    %c0_i32_2 = arith.constant 0 : i32
    %7 = arith.cmpi ne, %6, %c0_i32_2 : i32
    scf.if %7 {
      %cst_11 = arith.constant 0.000000e+00 : f32
      %c0_12 = arith.constant 0 : index
      %21 = memref.load %arg5[%c0_12] : memref<1xf32, #tpu.memory_space<smem>>
      memref.store %cst_11, %arg5[%c0_12] : memref<1xf32, #tpu.memory_space<smem>>
    } else {
    }
    %c0 = arith.constant 0 : index
    %c0_3 = arith.constant 0 : index
    %c0_4 = arith.constant 0 : index
    %8 = vector.load %arg2[%c0, %c0_3, %c0_4] : memref<1x128x128xf32, #tpu.memory_space<vmem>>, vector<1x128x128xf32>
    %c0_5 = arith.constant 0 : index
    %c0_6 = arith.constant 0 : index
    %c0_7 = arith.constant 0 : index
    %9 = vector.load %arg3[%c0_5, %c0_6, %c0_7] : memref<1x128x128xf32, #tpu.memory_space<vmem>>, vector<1x128x128xf32>
    %10 = arith.subf %8, %9 : vector<1x128x128xf32>
    %c0_8 = arith.constant 0 : index
    %11 = memref.load %arg5[%c0_8] : memref<1xf32, #tpu.memory_space<smem>>
    %12 = arith.mulf %10, %10 : vector<1x128x128xf32>
    %13 = vector.shape_cast %12 : vector<1x128x128xf32> to vector<1x1x128x128xf32>
    %cst = arith.constant dense<0.000000e+00> : vector<1xf32>
    %14 = vector.multi_reduction <add>, %13, %cst [1, 2, 3] : vector<1x1x128x128xf32> to vector<1xf32>
    %15 = vector.shape_cast %14 : vector<1xf32> to vector<1x1x1x1xf32>
    %16 = vector.extract %15[0, 0, 0, 0] : f32 from vector<1x1x1x1xf32>
    %17 = arith.addf %11, %16 : f32
    %c0_9 = arith.constant 0 : index
    %18 = memref.load %arg5[%c0_9] : memref<1xf32, #tpu.memory_space<smem>>
    memref.store %17, %arg5[%c0_9] : memref<1xf32, #tpu.memory_space<smem>>
    %19 = arith.extui %5 : i1 to i32
    %c0_i32_10 = arith.constant 0 : i32
    %20 = arith.cmpi ne, %19, %c0_i32_10 : i32
    scf.if %20 {
      %c0_11 = arith.constant 0 : index
      %21 = memref.load %arg5[%c0_11] : memref<1xf32, #tpu.memory_space<smem>>
      %cst_12 = arith.constant 3.05175781E-5 : f32
      %22 = arith.mulf %21, %cst_12 : f32
      %c0_13 = arith.constant 0 : index
      %c0_14 = arith.constant 0 : index
      %23 = memref.load %arg4[%c0_13, %c0_14] : memref<1x1xf32, #tpu.memory_space<smem>>
      memref.store %22, %arg4[%c0_13, %c0_14] : memref<1x1xf32, #tpu.memory_space<smem>>
    } else {
    }
    return
  }
  func.func @transform_0(%arg0: i32, %arg1: i32) -> (i32, i32, i32) {
    %c0_i32 = arith.constant 0 : i32
    %c0_i32_0 = arith.constant 0 : i32
    return %arg0, %arg1, %c0_i32 : i32, i32, i32
  }
  func.func @transform_1(%arg0: i32, %arg1: i32) -> (i32, i32, i32) {
    %c2_i32 = arith.constant 2 : i32
    %0 = arith.addi %arg0, %c2_i32 : i32
    %c0_i32 = arith.constant 0 : i32
    %c0_i32_0 = arith.constant 0 : i32
    return %0, %arg1, %c0_i32 : i32, i32, i32
  }
  func.func @transform_2(%arg0: i32, %arg1: i32) -> (i32, i32) {
    %c0_i32 = arith.constant 0 : i32
    %c0_i32_0 = arith.constant 0 : i32
    %c0_i32_1 = arith.constant 0 : i32
    return %c0_i32, %c0_i32_0 : i32, i32
  }
}

</mosaic_0001>

<bundles_post_ra>
// kernel: _lambda_.9
= control target key start
LH: loop header
LB: loop body
LE: loop exit
PB: predicated region body
PF: predicated region fallthrough
CT: control target
= control target key end

     0   :  { %s1320_s12 = smov 0   ;;  %s1322_s13 = smov 0   ;;  %s1746_s0 = inlined_call_operand.vmem [shape: bf16[8,10,18,3], index: 0, kind: input, shape index: {}]   ;;  %s1747_s1 = inlined_call_operand.vmem [shape: bf16[27,64], index: 1, kind: input, shape index: {}]   ;;  %s1748_s2 = inlined_call_operand.vmem [shape: f32[1,64], index: 2, kind: input, shape index: {}]   ;;  %s1749_s3 = inlined_call_operand.vmem [shape: bf16[4,16,16,64], index: 3, kind: output, shape index: {}]  }
   0x1   :  { %s1324_s14 = smov 0   ;;  %s1326_s15 = smov 0  }
   0x2   :  { %s1328_s16 = smov 0  }
   0x3 LB: > { %s22_s17 = sadd.s32 1, %s1281_s14  ;;  %s25_s18 = sadd.s32 1, %s1285_s15  ;;  %s1289_s16 = sphi %s1328_s16, %s13_s16   ;;  %s1285_s15 = sphi %s1326_s15, %s1753_s15   ;;  %s1281_s14 = sphi %s1324_s14, %s1752_s14   ;;  %s1277_s13 = sphi %s1322_s13, %s1751_s13   ;;  %s1273_s12 = sphi %s1320_s12, %s1750_s12  }
   0x4   : > { %p23_p0 = scmp.ge.s32.totalorder %s22_s17, 2  ;;  %p1073_p1 = scmp.ge.s32.totalorder %s1289_s16, 1 }
   0x5   : > { %p159_p2 = scmp.lt.s32.totalorder %s1289_s16, 9 }
   0x6   : > { %s1755_s17 = smov (%p23_p0, %s22_s17), 0  ;;  %s1757_s18 = smov (!%p23_p0, %s25_s18), %s1285_s15 }
   0x7   : > { %p160_p3 = pnand %p1073_p1, %p159_p2  ;;  %p27_p4 = scmp.ge.s32.totalorder %s1757_s18, 4 }
   0x8   : > { %s1074_s19 = sshll.u32 (!%p160_p3), %s1277_s13, 1  ;;  %vm418_vm0 = vcmask (!%p160_p3), 1046528   ;;  %s1291_s25 = smov (!%p160_p3), 9   ;;  %vm305_vm1 = vsmask.f32 (!%p160_p3), 7424  ;;  %vm776_vm2 = vcmask (!%p160_p3), 1044480  }
   0x9   : > { %s1759_s18 = smov (%p27_p4, %s1757_s18), 0  ;;  %163 = sbr.rel (%p160_p3) target bundleno = 484 (0x1e4), region = 32 }
   0xa   : > { %s191_s20 = sadd.s32 (!%p160_p3), %s1273_s12, %s1074_s19  ;;  %s1292_s26 = smov (!%p160_p3), 6   ;;  %vm777_vm3 = vcmask (!%p160_p3), 1045504   ;;  %vm601_vm4 = vcmask (!%p160_p3), 23552   ;;  %vm618_vm5 = vcmask (!%p160_p3), 48128   ;;  %vm652_vm6 = vcmask (!%p160_p3), 97280  }
   0xb   : > { %p192_p5 = scmp.lt.s32.totalorder (!%p160_p3), %s191_s20, 7  ;;  %s1293_s27 = smov (!%p160_p3), 3   ;;  %vm635_vm7 = vcmask (!%p160_p3), 72704   ;;  %vm669_vm8 = vcmask (!%p160_p3), 121856   ;;  %vm686_vm9 = vcmask (!%p160_p3), 146432   ;;  %vm703_vm10 = vcmask (!%p160_p3), 171008  }
   0xc   : > { %s1294_s28 = smov (!%p160_p3), 12   ;;  %s1295_s29 = smov (!%p160_p3), 15   ;;  %vm720_vm11 = vcmask (!%p160_p3), 195584   ;;  %vm759_vm12 = vcmask (!%p160_p3), 220160   ;;  %vm960_vm13 = vcmask (!%p160_p3), 519168  }
   0xd   : > { %s1296_s30 = smov (!%p160_p3), 18   ;;  %s1298_s8 = smov (!%p160_p3), 21  }
   0xe   : > { %s1299_s9 = smov (!%p160_p3), 24   ;;  %s1076_s10 = sshll.u32 (!%p160_p3), %s1273_s12, 3 }
   0xf   : > { %p200_p6 = scmp.lt.s32.totalorder (!%p160_p3), %s1277_s13, 3  ;;  %p202_p7 = scmp.lt.s32.totalorder (!%p160_p3), %s1076_s10, 15 }
  0x10   : > { %s1761_s20 = smov (!%p192_p5, %s191_s20), 7 }
  0x11   : > { %s1179_s21 = smul.u32 120, %s1761_s20  ;;  %s1763_s13 = smov (!%p200_p6, %s1277_s13), 3 }
  0x12   : > { %s1765_s10 = smov (!%p202_p7, %s1076_s10), 15  ;;  %s1078_s19 = sshll.u32 %s1763_s13, 5 }
  0x13   : > { %s1359_s24 = scalar_lea.vmem %s1746_s0, %s1179_s21  ;;  %s1077_s11 = sshll.u32 %s1765_s10, 1 }
  0x14   : > { %v1362_v0 = vld [vmem:[%s1359_s24 + $0x3c] sm:$0xff]   ;;  %v1365_v1 = vld [vmem:[%s1359_s24 + $0xc] sm:$0xff]   ;;  %v1232_v3 = vld [vmem:[%s1359_s24 + $0x38] ss:$0 sps:$4 sm:$0x11]   ;;  %s206_s20 = sadd.s32 %s1078_s19, %s1077_s11 }
  0x15   : > { %472 = vrot.lane.b32.xlu1 %v1362_v0, %s1291_s25  ;;  %464 = vrot.lane.b32.xlu0 %v1365_v1, %s1291_s25  ;;  %v1372_v2 = vld [vmem:[%s1359_s24 + $0x30] sm:$0xff]   ;;  %v1376_v4 = vld [vmem:[%s1359_s24] sm:$0xff]   ;;  %v434_v5 = vrot.slane %v1362_v0, 1  ;;  %v432_v7 = vrot.slane %v1232_v3, 1  ;;  %v422_v9 = vrot.slane %v1365_v1, 1  ;;  %v319_v16 = vshrl.u32 %v1365_v1, 16 }
  0x16   : > { %v431_v6 = vrot.slane %v1372_v2, 1  ;;  %v1234_v8 = vld [vmem:[%s1359_s24 + $0x8] ss:$0 sps:$4 sm:$0x11]   ;;  %v419_v10 = vrot.slane %v1376_v4, 1  ;;  %v321_v17 = vshll.u32 %v1365_v1, 16 }
  0x17   : > { %v1235_v11 = vld [vmem:[%s1359_s24 + $0x44] ss:$0 sps:$4 sm:$0x11]   ;;  %v420_v13 = vrot.slane %v1234_v8, 1  ;;  %v307_v18 = vshrl.u32 %v1376_v4, 16  ;;  %v309_v22 = vshll.u32 %v1376_v4, 16 }
  0x18   : > { %v1385_v12 = vsel %vm418_vm0, %v431_v6, %v432_v7  ;;  %v1236_v14 = vld [vmem:[%s1359_s24 + $0x14] ss:$0 sps:$4 sm:$0x11]   ;;  %v435_v15 = vrot.slane %v1235_v11, 1  ;;  %v323_v24 = vrot.slane %v321_v17, 1  ;;  %v314_v25 = vshll.u32 %v1234_v8, 16 }
  0x19   : > { %451 = vrot.lane.b32.xlu1 %v1385_v12, %s1292_s26  ;;  %v421_v19 = vsel %vm418_vm0, %v419_v10, %v420_v13  ;;  %v423_v20 = vrot.slane %v1236_v14, 1  ;;  %v326_v21 = vshll.u32 %v1236_v14, 16  ;;  %v367_v26 = vshrl.u32 %v1362_v0, 16  ;;  %v1409_v39 = vld [vmem:[%s1359_s24 + $0x48] sm:$0xff]   ;;  %v1416_v46 = vld [vmem:[%s1359_s24 + $0x18] sm:$0xff]   ;;  %v1434_v57 = vld [vmem:[%s1359_s24 + $0x60] sm:$0xff]  }
  0x1a   : > { %443 = vrot.lane.b32.xlu0 %v421_v19, %s1292_s26  ;;  %v1397_v23 = vsel %vm418_vm0, %v434_v5, %v435_v15  ;;  %v311_v29 = vrot.slane %v309_v22, 1  ;;  %v369_v30 = vshll.u32 %v1362_v0, 16  ;;  %v324_v31 = vor.u32 %v323_v24, %v319_v16  ;;  %v1239_v47 = vld [vmem:[%s1359_s24 + $0x50] ss:$0 sps:$4 sm:$0x11]   ;;  %s1079_s23 = sshll.u32 %s206_s20, 2 }
  0x1b   : > { %v1401_v27 = vsel %vm418_vm0, %v422_v9, %v423_v20  ;;  %v328_v28 = vrot.slane %v326_v21, 1  ;;  %v316_v32 = vrot.slane %v314_v25, 1  ;;  %v374_v33 = vshll.u32 %v1235_v11, 16  ;;  %v1240_v51 = vld [vmem:[%s1359_s24 + $0x20] ss:$0 sps:$4 sm:$0x11]  }
  0x1c   : > { %v355_v34 = vshrl.u32 %v1372_v2, 16  ;;  %v312_v35 = vor.u32 %v311_v29, %v307_v18  ;;  %v371_v36 = vrot.slane %v369_v30, 1  ;;  %v357_v37 = vshll.u32 %v1372_v2, 16  ;;  %v1442_v61 = vld [vmem:[%s1359_s24 + $0x6c] sm:$0xff]  }
  0x1d   : > { %453 = vrot.lane.b32.xlu1 %v1397_v23, %s1292_s26  ;;  %v362_v38 = vshll.u32 %v1232_v3, 16  ;;  %v329_v40 = vsel %vm305_vm1, %v324_v31, %v328_v28  ;;  %v376_v41 = vrot.slane %v374_v33, 1  ;;  %v381_v50 = vshll.u32 %v1409_v39, 16  ;;  %v1246_v3 = vld [vmem:[%s1359_s24 + $0x68] ss:$0 sps:$4 sm:$0x11]  }
  0x1e   : > { %445 = vrot.lane.b32.xlu0 %v1401_v27, %s1292_s26  ;;  %v317_v42 = vsel %vm305_vm1, %v312_v35, %v316_v32  ;;  %v372_v43 = vor.u32 %v371_v36, %v367_v26  ;;  %v359_v44 = vrot.slane %v357_v37, 1  ;;  %v333_v53 = vshll.u32 %v1416_v46, 16  ;;  %v1248_v15 = vld [vmem:[%s1359_s24 + $0x74] ss:$0 sps:$4 sm:$0x11]  }
  0x1f   : > { %v364_v45 = vrot.slane %v362_v38, 1  ;;  %v379_v54 = vshrl.u32 %v1409_v39, 16  ;;  %v383_v55 = vrot.slane %v381_v50, 1  ;;  %v386_v56 = vshll.u32 %v1239_v47, 16  ;;  %v1487_v38 = vld [vmem:[%s1359_s24 + $0x54] sm:$0xff]  }
  0x20   : > { %v1421_v48 = vsel %vm305_vm1, %v372_v43, %v376_v41  ;;  %v360_v49 = vor.u32 %v359_v44, %v355_v34  ;;  %v338_v58 = vshll.u32 %v1240_v51, 16  ;;  %v331_v59 = vshrl.u32 %v1416_v46, 16  ;;  %v1493_v41 = vld [vmem:[%s1359_s24 + $0x24] sm:$0xff]   ;;  %v1244_v44 = vld [vmem:[%s1359_s24 + $0x2c] ss:$0 sps:$4 sm:$0x11]  }
  0x21   : > { %404 = vrot.lane.b32.xlu1 %v329_v40, %s1293_s27  ;;  %v335_v60 = vrot.slane %v333_v53, 1  ;;  %v384_v62 = vor.u32 %v383_v55, %v379_v54  ;;  %v388_v63 = vrot.slane %v386_v56, 1  ;;  %v484_v5 = vshrl.u32 %v1434_v57, 16  ;;  %v1249_v54 = vld [vmem:[%s1747_s1] sm:$0xff]  }
  0x22   : > { %402 = vrot.lane.b32.xlu0 %v317_v42, %s1293_s27  ;;  %v1427_v52 = vsel %vm305_vm1, %v360_v49, %v364_v45  ;;  %v486_v6 = vshll.u32 %v1434_v57, 16  ;;  %v340_v7 = vrot.slane %v338_v58, 1  ;;  %v511_v8 = vrot.slane %v1434_v57, 1  ;;  %v1243_v42 = vld [vmem:[%s1359_s24 + $0x5c] ss:$0 sps:$4 sm:$0x11]   ;;  %1155 = vmatprep.subr.bf16.mxu0 %v1249_v54  ;;  %s1685_s24 = scalar_lea.vmem %s1749_s3, %s1079_s23 }
  0x23   : > { %v336_v9 = vor.u32 %v335_v60, %v331_v59  ;;  %v491_v11 = vshll.u32 %v1246_v3, 16  ;;  %v555_v13 = vshrl.u32 %v1442_v61, 16  ;;  %v512_v14 = vrot.slane %v1246_v3, 1  ;;  %v1250_v58 = vld [vmem:[%s1747_s1 + $0x8] sm:$0x3f]   ;;  %1175 = vmatprep.subr.bf16.mxu1 %v1249_v54  ;;  %1156 = vmatpush3.bf16.msra.mxu0 %v1249_v54 }
  0x24   : > { %v488_v10 = vrot.slane %v486_v6, 1  ;;  %v557_v16 = vshll.u32 %v1442_v61, 16  ;;  %v582_v17 = vrot.slane %v1442_v61, 1  ;;  %v1457_v18 = vsel %vm305_vm1, %v384_v62, %v388_v63  ;;  %1177 = vmatpush3.bf16.msra.mxu1 %v1249_v54 }
  0x25   : > { %412 = vrot.lane.b32.xlu1 %v1421_v48, %s1293_s27  ;;  %v493_v20 = vrot.slane %v491_v11, 1  ;;  %v1461_v21 = vsel %vm418_vm0, %v511_v8, %v512_v14  ;;  %v562_v24 = vshll.u32 %v1248_v15, 16  ;;  %v583_v25 = vrot.slane %v1248_v15, 1 }
  0x26   : > { %410 = vrot.lane.b32.xlu0 %v1427_v52, %s1293_s27  ;;  %v489_v19 = vor.u32 %v488_v10, %v484_v5  ;;  %v559_v22 = vrot.slane %v557_v16, 1  ;;  %v1464_v26 = vsel %vm305_vm1, %v336_v9, %v340_v7  ;;  %v437_v32 = vrot.slane %v1409_v39, 1 }
  0x27   : > { %v564_v30 = vrot.slane %v562_v24, 1  ;;  %v1472_v31 = vsel %vm418_vm0, %v582_v17, %v583_v25  ;;  %v438_v33 = vrot.slane %v1239_v47, 1  ;;  %v425_v35 = vrot.slane %v1416_v46, 1 }
  0x28   : > { %v1467_v28 = vsel %vm305_vm1, %v489_v19, %v493_v20  ;;  %v560_v29 = vor.u32 %v559_v22, %v555_v13  ;;  %v426_v36 = vrot.slane %v1240_v51, 1  ;;  %v393_v43 = vshll.u32 %v1487_v38, 16 }
  0x29   : > { %474 = vrot.lane.b32.xlu1 %v1409_v39, %s1291_s25  ;;  %v1484_v37 = vsel %vm418_vm0, %v437_v32, %v438_v33  ;;  %v345_v45 = vshll.u32 %v1493_v41, 16  ;;  %v398_v49 = vshll.u32 %v1243_v42, 16  ;;  %v343_v50 = vshrl.u32 %v1493_v41, 16 }
  0x2a   : > { %466 = vrot.lane.b32.xlu0 %v1416_v46, %s1291_s25  ;;  %v1478_v34 = vsel %vm305_vm1, %v560_v29, %v564_v30  ;;  %v395_v47 = vrot.slane %v393_v43, 1  ;;  %v350_v53 = vshll.u32 %v1244_v44, 16  ;;  %v1297_v59 = vmov 65535  }
  0x2b   : > { %v347_v51 = vrot.slane %v345_v45, 1  ;;  %v400_v56 = vrot.slane %v398_v49, 1  ;;  %v778_v60 = vsel %vm776_vm2, 4294967295, %v1297_v59  ;;  %v440_v8 = vrot.slane %v1487_v38, 1 }
  0x2c   : > { %v352_v63 = vrot.slane %v350_v53, 1  ;;  %v779_v3 = vsel %vm777_vm3, %v778_v60, 0  ;;  %v441_v9 = vrot.slane %v1243_v42, 1  ;;  %v428_v10 = vrot.slane %v1493_v41, 1 }
  0x2d   : > { %503 = vrot.lane.b32.xlu1 %v1421_v48, %s1294_s28  ;;  %v348_v62 = vor.u32 %v347_v51, %v343_v50  ;;  %v781_v5 = vand.u32 %v1250_v58, %v779_v3  ;;  %v429_v11 = vrot.slane %v1244_v44, 1 }
  0x2e   : > { %495 = vrot.lane.b32.xlu0 %v329_v40, %s1294_s28  ;;  %v427_v40 = vsel %vm418_vm0, %v425_v35, %v426_v36  ;;  %v442_v13 = vsel %vm418_vm0, %v440_v8, %v441_v9 }
  0x2f   : > { %1157 = vmatprep.subr.bf16.mxu0 %v781_v5  ;;  %v353_v7 = vsel %vm305_vm1, %v348_v62, %v352_v63  ;;  %1176 = vmatprep.subr.bf16.mxu1 %v781_v5  ;;  %v430_v14 = vsel %vm418_vm0, %v428_v10, %v429_v11 }
  0x30   : > { %1158 = vmatpush3.bf16.msra.mxu0 %v781_v5  ;;  %1178 = vmatpush3.bf16.msra.mxu1 %v781_v5 }
  0x31   : > { %505 = vrot.lane.b32.xlu1 %v1457_v18, %s1294_s28 }
  0x32   : > { %497 = vrot.lane.b32.xlu0 %v1464_v26, %s1294_s28 }
  0x35   : > { %522 = vrot.lane.b32.xlu1 %v1397_v23, %s1295_s29 }
  0x36   : > { %514 = vrot.lane.b32.xlu0 %v1401_v27, %s1295_s29  ;;  %v391_v27 = vshrl.u32 %v1487_v38, 16 }
  0x38   : > { %v396_v55 = vor.u32 %v395_v47, %v391_v27 }
  0x39   : > { %524 = vrot.lane.b32.xlu1 %v1484_v37, %s1295_s29 }
  0x3a   : > { %516 = vrot.lane.b32.xlu0 %v427_v40, %s1295_s29  ;;  %v401_v6 = vsel %vm305_vm1, %v396_v55, %v400_v56 }
  0x3d   : > { %543 = vrot.lane.b32.xlu1 %v1409_v39, %s1296_s30 }
  0x3e   : > { %535 = vrot.lane.b32.xlu0 %v1416_v46, %s1296_s30 }
  0x41   : > { %545 = vrot.lane.b32.xlu1 %v1487_v38, %s1296_s30 }
  0x42   : > { %537 = vrot.lane.b32.xlu0 %v1493_v41, %s1296_s30 }
  0x45   : > { %574 = vrot.lane.b32.xlu1 %v1457_v18, %s1298_s8 }
  0x46   : > { %566 = vrot.lane.b32.xlu0 %v1464_v26, %s1298_s8 }
  0x49   : > { %576 = vrot.lane.b32.xlu1 %v401_v6, %s1298_s8 }
  0x4a   : > { %568 = vrot.lane.b32.xlu0 %v353_v7, %s1298_s8 }
  0x4d   : > { %593 = vrot.lane.b32.xlu1 %v1484_v37, %s1299_s9 }
  0x4e   : > { %585 = vrot.lane.b32.xlu0 %v427_v40, %s1299_s9 }
  0x51   : > { %414 = vrot.lane.b32.xlu1 %v1457_v18, %s1293_s27 }
  0x52   : > { %406 = vrot.lane.b32.xlu0 %v1464_v26, %s1293_s27 }
  0x55   : > { %595 = vrot.lane.b32.xlu1 %v442_v13, %s1299_s9 }
  0x56   : > { %587 = vrot.lane.b32.xlu0 %v430_v14, %s1299_s9 }
  0x59   : > { %416 = vrot.lane.b32.xlu1 %v401_v6, %s1293_s27 }
  0x5a   : > { %408 = vrot.lane.b32.xlu0 %v353_v7, %s1293_s27 }
  0x5d   : > { %455 = vrot.lane.b32.xlu1 %v1484_v37, %s1292_s26 }
  0x5e   : > { %447 = vrot.lane.b32.xlu0 %v427_v40, %s1292_s26 }
  0x61   : > { %457 = vrot.lane.b32.xlu1 %v442_v13, %s1292_s26 }
  0x62   : > { %449 = vrot.lane.b32.xlu0 %v430_v14, %s1292_s26 }
  0x65   : > { %476 = vrot.lane.b32.xlu1 %v1487_v38, %s1291_s25 }
  0x66   : > { %468 = vrot.lane.b32.xlu0 %v1493_v41, %s1291_s25 }
  0x69   : > { %478 = vrot.lane.b32.xlu1 %v1434_v57, %s1291_s25 }
  0x6a   : > { %470 = vrot.lane.b32.xlu0 %v1372_v2, %s1291_s25 }
  0x6d   : > { %507 = vrot.lane.b32.xlu1 %v401_v6, %s1294_s28 }
  0x6e   : > { %499 = vrot.lane.b32.xlu0 %v353_v7, %s1294_s28 }
  0x71   : > { %509 = vrot.lane.b32.xlu1 %v1467_v28, %s1294_s28 }
  0x72   : > { %501 = vrot.lane.b32.xlu0 %v1427_v52, %s1294_s28 }
  0x75   : > { %526 = vrot.lane.b32.xlu1 %v442_v13, %s1295_s29 }
  0x76   : > { %518 = vrot.lane.b32.xlu0 %v430_v14, %s1295_s29 }
  0x79   : > { %528 = vrot.lane.b32.xlu1 %v1461_v21, %s1295_s29 }
  0x7a   : > { %520 = vrot.lane.b32.xlu0 %v1385_v12, %s1295_s29 }
  0x7d   : > { %547 = vrot.lane.b32.xlu1 %v1434_v57, %s1296_s30 }
  0x7e   : > { %539 = vrot.lane.b32.xlu0 %v1372_v2, %s1296_s30 }
  0x81   : > { %549 = vrot.lane.b32.xlu1 %v1442_v61, %s1296_s30 }
  0x82   : > { %541 = vrot.lane.b32.xlu0 %v1362_v0, %s1296_s30 }
  0x85   : > { %578 = vrot.lane.b32.xlu1 %v1467_v28, %s1298_s8 }
  0x86   : > { %570 = vrot.lane.b32.xlu0 %v1427_v52, %s1298_s8 }
  0x87   : > { %v473_v15 = vpop.permute.xlu1 %472  ;;  %v465_v16 = vpop.permute.xlu0 %464 }
  0x89   : > { %580 = vrot.lane.b32.xlu1 %v1478_v34, %s1298_s8 }
  0x8a   : > { %572 = vrot.lane.b32.xlu0 %v1421_v48, %s1298_s8 }
  0x8b   : > { %v452_v57 = vpop.permute.xlu1 %451 }
  0x8c   : > { %v444_v17 = vpop.permute.xlu0 %443 }
  0x8d   : > { %597 = vrot.lane.b32.xlu1 %v1461_v21, %s1299_s9 }
  0x8e   : > { %589 = vrot.lane.b32.xlu0 %v1385_v12, %s1299_s9 }
  0x8f   : > { %v454_v61 = vpop.permute.xlu1 %453 }
  0x90   : > { %v446_v18 = vpop.permute.xlu0 %445 }
  0x91   : > { %599 = vrot.lane.b32.xlu1 %v1472_v31, %s1299_s9 }
  0x92   : > { %591 = vrot.lane.b32.xlu0 %v1397_v23, %s1299_s9 }
  0x93   : > { %v405_v52 = vpop.permute.xlu1 %404 }
  0x94   : > { %v403_v19 = vpop.permute.xlu0 %402  ;;  %v605_v59 = vsel %vm601_vm4, %v1365_v1, %v405_v52 }
  0x95   : > { %v603_v36 = vsel %vm601_vm4, %v1376_v4, %v403_v19  ;;  %v622_v6 = vsel %vm618_vm5, %v605_v59, %v446_v18 }
  0x96   : > { %v620_v43 = vsel %vm618_vm5, %v603_v36, %v444_v17 }
  0x97   : > { %v413_v20 = vpop.permute.xlu1 %412  ;;  %v637_v27 = vsel %vm635_vm7, %v620_v43, %v465_v16 }
  0x98   : > { %v411_v48 = vpop.permute.xlu0 %410  ;;  %v613_v51 = vsel %vm601_vm4, %v1362_v0, %v413_v20 }
  0x99   : > { %v611_v23 = vsel %vm601_vm4, %v1372_v2, %v411_v48  ;;  %v630_v63 = vsel %vm618_vm5, %v613_v51, %v454_v61 }
  0x9a   : > { %v628_v40 = vsel %vm618_vm5, %v611_v23, %v452_v57 }
  0x9b   : > { %v475_v22 = vpop.permute.xlu1 %474  ;;  %v645_v44 = vsel %vm635_vm7, %v628_v40, %v473_v15 }
  0x9c   : > { %v467_v24 = vpop.permute.xlu0 %466  ;;  %v647_v3 = vsel %vm635_vm7, %v630_v63, %v475_v22 }
  0x9d   : > { %v639_v1 = vsel %vm635_vm7, %v622_v6, %v467_v24 }
  0x9f   : > { %v504_v25 = vpop.permute.xlu1 %503 }
  0xa0   : > { %v496_v26 = vpop.permute.xlu0 %495  ;;  %v662_v2 = vsel %vm652_vm6, %v645_v44, %v504_v25 }
  0xa1   : > { %v654_v49 = vsel %vm652_vm6, %v637_v27, %v496_v26 }
  0xa3   : > { %v506_v21 = vpop.permute.xlu1 %505 }
  0xa4   : > { %v498_v28 = vpop.permute.xlu0 %497  ;;  %v664_v7 = vsel %vm652_vm6, %v647_v3, %v506_v21 }
  0xa5   : > { %v656_v10 = vsel %vm652_vm6, %v639_v1, %v498_v28 }
  0xa7   : > { %v523_v29 = vpop.permute.xlu1 %522 }
  0xa8   : > { %v515_v12 = vpop.permute.xlu0 %514  ;;  %v679_v4 = vsel %vm669_vm8, %v662_v2, %v523_v29 }
  0xa9   : > { %v671_v53 = vsel %vm669_vm8, %v654_v49, %v515_v12 }
  0xab   : > { %v525_v30 = vpop.permute.xlu1 %524 }
  0xac   : > { %v517_v32 = vpop.permute.xlu0 %516  ;;  %v681_v8 = vsel %vm669_vm8, %v664_v7, %v525_v30 }
  0xad   : > { %v673_v13 = vsel %vm669_vm8, %v656_v10, %v517_v32 }
  0xaf   : > { %v544_v33 = vpop.permute.xlu1 %543 }
  0xb0   : > { %v536_v34 = vpop.permute.xlu0 %535  ;;  %v696_v50 = vsel %vm686_vm9, %v679_v4, %v544_v33 }
  0xb1   : > { %v688_v56 = vsel %vm686_vm9, %v671_v53, %v536_v34 }
  0xb3   : > { %v546_v31 = vpop.permute.xlu1 %545 }
  0xb4   : > { %v538_v35 = vpop.permute.xlu0 %537  ;;  %v698_v11 = vsel %vm686_vm9, %v681_v8, %v546_v31 }
  0xb5   : > { %v690_v16 = vsel %vm686_vm9, %v673_v13, %v538_v35 }
  0xb7   : > { %v575_v37 = vpop.permute.xlu1 %574 }
  0xb8   : > { %v567_v42 = vpop.permute.xlu0 %566  ;;  %v713_v54 = vsel %vm703_vm10, %v696_v50, %v575_v37 }
  0xb9   : > { %v705_v60 = vsel %vm703_vm10, %v688_v56, %v567_v42 }
  0xbb   : > { %v577_v45 = vpop.permute.xlu1 %576 }
  0xbc   : > { %v569_v47 = vpop.permute.xlu0 %568  ;;  %v715_v14 = vsel %vm703_vm10, %v698_v11, %v577_v45 }
  0xbd   : > { %v707_v17 = vsel %vm703_vm10, %v690_v16, %v569_v47 }
  0xbf   : > { %v594_v55 = vpop.permute.xlu1 %593 }
  0xc0   : > { %v730_v58 = vsel %vm720_vm11, %v713_v54, %v594_v55  ;;  %v586_v62 = vpop.permute.xlu0 %585 }
  0xc1   : > { %1167 = vmatprep.mubr.msk.bf16.mxu1 %vm759_vm12, %v730_v58  ;;  %v722_v0 = vsel %vm720_vm11, %v705_v60, %v586_v62 }
  0xc2   : > { %1159 = vmatprep.mubr.msk.bf16.mxu0 %vm759_vm12, %v722_v0 }
  0xc3   : > { %v415_v5 = vpop.permute.xlu1 %414 }
  0xc4   : > { %v407_v9 = vpop.permute.xlu0 %406  ;;  %v615_v43 = vsel %vm601_vm4, %v1409_v39, %v415_v5 }
  0xc5   : > { %v607_v2 = vsel %vm601_vm4, %v1416_v46, %v407_v9 }
  0xc7   : > { %v596_v15 = vpop.permute.xlu1 %595 }
  0xc8   : > { %v732_v57 = vsel %vm720_vm11, %v715_v14, %v596_v15  ;;  %v588_v61 = vpop.permute.xlu0 %587 }
  0xc9   : > { %1168 = vmatmul.mubr.msk.bf16.vlgmr.msra.gmra.mrb[0].mxu1 %vm759_vm12, %v732_v57  ;;  %v724_v18 = vsel %vm720_vm11, %v707_v17, %v588_v61  ;;  %v1676_v61 = vld [vmem:[%s1748_s2] ss:$0 sm:$0xff] }
  0xca   : > { %1160 = vmatmul.mubr.msk.bf16.vlgmr.msra.gmra.mrb[0].mxu0 %vm759_vm12, %v724_v18 }
  0xcb   : > { %v417_v52 = vpop.permute.xlu1 %416 }
  0xcc   : > { %v409_v19 = vpop.permute.xlu0 %408  ;;  %v617_v50 = vsel %vm601_vm4, %v1487_v38, %v417_v52 }
  0xcd   : > { %v609_v56 = vsel %vm601_vm4, %v1493_v41, %v409_v19 }
  0xcf   : > { %v456_v20 = vpop.permute.xlu1 %455 }
  0xd0   : > { %v448_v48 = vpop.permute.xlu0 %447  ;;  %v632_v45 = vsel %vm618_vm5, %v615_v43, %v456_v20 }
  0xd1   : > { %v624_v47 = vsel %vm618_vm5, %v607_v2, %v448_v48 }
  0xd3   : > { %v458_v22 = vpop.permute.xlu1 %457 }
  0xd4   : > { %v450_v24 = vpop.permute.xlu0 %449  ;;  %v634_v54 = vsel %vm618_vm5, %v617_v50, %v458_v22 }
  0xd5   : > { %v626_v62 = vsel %vm618_vm5, %v609_v56, %v450_v24 }
  0xd7   : > { %v477_v25 = vpop.permute.xlu1 %476 }
  0xd8   : > { %v469_v26 = vpop.permute.xlu0 %468  ;;  %v649_v27 = vsel %vm635_vm7, %v632_v45, %v477_v25 }
  0xd9   : > { %v641_v51 = vsel %vm635_vm7, %v624_v47, %v469_v26 }
  0xdb   : > { %v479_v21 = vpop.permute.xlu1 %478 }
  0xdc   : > { %v471_v28 = vpop.permute.xlu0 %470  ;;  %v651_v58 = vsel %vm635_vm7, %v634_v54, %v479_v21 }
  0xdd   : > { %v643_v5 = vsel %vm635_vm7, %v626_v62, %v471_v28 }
  0xdf   : > { %v508_v29 = vpop.permute.xlu1 %507 }
  0xe0   : > { %v500_v12 = vpop.permute.xlu0 %499  ;;  %v666_v49 = vsel %vm652_vm6, %v649_v27, %v508_v29 }
  0xe1   : > { %v658_v55 = vsel %vm652_vm6, %v641_v51, %v500_v12 }
  0xe3   : > { %v510_v30 = vpop.permute.xlu1 %509 }
  0xe4   : > { %v502_v32 = vpop.permute.xlu0 %501  ;;  %v668_v63 = vsel %vm652_vm6, %v651_v58, %v510_v30 }
  0xe5   : > { %v660_v1 = vsel %vm652_vm6, %v643_v5, %v502_v32 }
  0xe7   : > { %v527_v33 = vpop.permute.xlu1 %526 }
  0xe8   : > { %v519_v34 = vpop.permute.xlu0 %518  ;;  %v683_v39 = vsel %vm669_vm8, %v666_v49, %v527_v33 }
  0xe9   : > { %v675_v59 = vsel %vm669_vm8, %v658_v55, %v519_v34 }
  0xeb   : > { %v529_v31 = vpop.permute.xlu1 %528 }
  0xec   : > { %v521_v23 = vpop.permute.xlu0 %520  ;;  %v685_v6 = vsel %vm669_vm8, %v668_v63, %v529_v31 }
  0xed   : > { %v677_v10 = vsel %vm669_vm8, %v660_v1, %v521_v23 }
  0xef   : > { %v548_v35 = vpop.permute.xlu1 %547 }
  0xf0   : > { %v540_v36 = vpop.permute.xlu0 %539  ;;  %v700_v46 = vsel %vm686_vm9, %v683_v39, %v548_v35 }
  0xf1   : > { %v692_v0 = vsel %vm686_vm9, %v675_v59, %v540_v36 }
  0xf3   : > { %v550_v37 = vpop.permute.xlu1 %549 }
  0xf4   : > { %v542_v40 = vpop.permute.xlu0 %541  ;;  %v702_v8 = vsel %vm686_vm9, %v685_v6, %v550_v37 }
  0xf5   : > { %v694_v14 = vsel %vm686_vm9, %v677_v10, %v542_v40 }
  0xf7   : > { %v579_v42 = vpop.permute.xlu1 %578 }
  0xf8   : > { %v571_v44 = vpop.permute.xlu0 %570  ;;  %v717_v38 = vsel %vm703_vm10, %v700_v46, %v579_v42 }
  0xf9   : > { %v709_v41 = vsel %vm703_vm10, %v692_v0, %v571_v44 }
  0xfb   : > { %v581_v4 = vpop.permute.xlu1 %580 }
  0xfc   : > { %v573_v53 = vpop.permute.xlu0 %572  ;;  %v719_v11 = vsel %vm703_vm10, %v702_v8, %v581_v4 }
  0xfd   : > { %v711_v16 = vsel %vm703_vm10, %v694_v14, %v573_v53 }
  0xff   : > { %v598_v60 = vpop.permute.xlu1 %597 }
 0x100   : > { %v734_v3 = vsel %vm720_vm11, %v717_v38, %v598_v60  ;;  %v590_v7 = vpop.permute.xlu0 %589 }
 0x101   : > { %1171 = vmatprep.mubr.msk.bf16.mxu1 %vm759_vm12, %v734_v3  ;;  %v726_v9 = vsel %vm720_vm11, %v709_v41, %v590_v7 }
 0x102   : > { %1163 = vmatprep.mubr.msk.bf16.mxu0 %vm759_vm12, %v726_v9 }
 0x103   : > { %v600_v13 = vpop.permute.xlu1 %599 }
 0x104   : > { %v736_v15 = vsel %vm720_vm11, %v719_v11, %v600_v13  ;;  %v592_v57 = vpop.permute.xlu0 %591 }
 0x105   : > { %1172 = vmatmul.mubr.msk.bf16.gmra.mrb[4].mxu1 %vm759_vm12, %v736_v15  ;;  %v728_v17 = vsel %vm720_vm11, %v711_v16, %v592_v57 }
 0x106   : > { %1164 = vmatmul.mubr.msk.bf16.gmra.mrb[4].mxu0 %vm759_vm12, %v728_v17 }
 0x19c   : > { %v1169_v18 = vpop.f32.mrb[0].mxu1 }
 0x19d   : > { %v858_v52 = vadd.f32 %v1169_v18, %v1676_v61  ;;  %v849_v19 = vpop.f32.mrb[1].mxu1  ;;  %v1161_v20 = vpop.f32.mrb[0].mxu0 }
 0x19e   : > { %v850_v48 = vadd.f32 %v1676_v61, %v849_v19  ;;  %v1170_v22 = vpop.f32.mrb[2].mxu1  ;;  %v826_v24 = vadd.f32 %v1161_v20, %v1676_v61  ;;  %v817_v26 = vpop.f32.mrb[1].mxu0 }
 0x19f   : > { %v890_v25 = vmax.f32 %v858_v52, 0.0  ;;  %v861_v21 = vadd.f32 %v1170_v22, %v1676_v61  ;;  %v852_v28 = vpop.f32.mrb[3].mxu1  ;;  %v818_v29 = vadd.f32 %v1676_v61, %v817_v26  ;;  %v1162_v30 = vpop.f32.mrb[2].mxu0 }
 0x1a0   : > { %v888_v12 = vmax.f32 %v850_v48, 0.0  ;;  %v853_v32 = vadd.f32 %v1676_v61, %v852_v28  ;;  %v882_v33 = vmax.f32 %v826_v24, 0.0  ;;  %v829_v31 = vadd.f32 %v1162_v30, %v1676_v61  ;;  %v820_v35 = vpop.f32.mrb[3].mxu0 }
 0x1a1   : > { %v1139_v34 = vpack.c.bf16 %v890_v25, %v890_v25  ;;  %v891_v23 = vmax.f32 %v861_v21, 0.0  ;;  %v880_v36 = vmax.f32 %v818_v29, 0.0  ;;  %v821_v40 = vadd.f32 %v1676_v61, %v820_v35 }
 0x1a2   : > { %v1137_v37 = vpack.c.bf16 %v888_v12, %v888_v12  ;;  %v889_v42 = vmax.f32 %v853_v32, 0.0  ;;  %v1131_v43 = vpack.c.bf16 %v882_v33, %v882_v33  ;;  %v883_v44 = vmax.f32 %v829_v31, 0.0 }
 0x1a3   : > { %971 = vst.msk [vmem:[%s1685_s24 + $0x28] sm:$0xf] %vm960_vm13, %v1139_v34  ;;  %v1140_v45 = vpack.c.bf16 %v891_v23, %v891_v23  ;;  %v1129_v2 = vpack.c.bf16 %v880_v36, %v880_v36  ;;  %v881_v27 = vmax.f32 %v821_v40, 0.0 }
 0x1a4   : > { %969 = vst.msk [vmem:[%s1685_s24 + $0x20] sm:$0xf] %vm960_vm13, %v1137_v37  ;;  %v1138_v4 = vpack.c.bf16 %v889_v42, %v889_v42  ;;  %963 = vst.msk [vmem:[%s1685_s24 + $0x8] sm:$0xf] %vm960_vm13, %v1131_v43  ;;  %v1132_v47 = vpack.c.bf16 %v883_v44, %v883_v44 }
 0x1a5   : > { %972 = vst.msk [vmem:[%s1685_s24 + $0x2c] sm:$0xf] %vm960_vm13, %v1140_v45  ;;  %961 = vst.msk [vmem:[%s1685_s24] sm:$0xf] %vm960_vm13, %v1129_v2  ;;  %v1130_v49 = vpack.c.bf16 %v881_v27, %v881_v27 }
 0x1a6   : > { %970 = vst.msk [vmem:[%s1685_s24 + $0x24] sm:$0xf] %vm960_vm13, %v1138_v4  ;;  %964 = vst.msk [vmem:[%s1685_s24 + $0xc] sm:$0xf] %vm960_vm13, %v1132_v47 }
 0x1a7   : > { %962 = vst.msk [vmem:[%s1685_s24 + $0x4] sm:$0xf] %vm960_vm13, %v1130_v49 }
 0x1d8   : > { %v1173_v50 = vpop.f32.mrb[4].mxu1 }
 0x1d9   : > { %v874_v51 = vadd.f32 %v1173_v50, %v1676_v61  ;;  %v865_v39 = vpop.f32.mrb[5].mxu1  ;;  %v1165_v53 = vpop.f32.mrb[4].mxu0 }
 0x1da   : > { %v866_v54 = vadd.f32 %v1676_v61, %v865_v39  ;;  %v1174_v55 = vpop.f32.mrb[6].mxu1  ;;  %v842_v46 = vadd.f32 %v1165_v53, %v1676_v61  ;;  %v833_v58 = vpop.f32.mrb[5].mxu0 }
 0x1db   : > { %v894_v56 = vmax.f32 %v874_v51, 0.0  ;;  %v877_v59 = vadd.f32 %v1174_v55, %v1676_v61  ;;  %v868_v38 = vpop.f32.mrb[7].mxu1  ;;  %v834_v60 = vadd.f32 %v1676_v61, %v833_v58  ;;  %v1166_v63 = vpop.f32.mrb[6].mxu0 }
 0x1dc   : > { %v892_v62 = vmax.f32 %v866_v54, 0.0  ;;  %v869_v0 = vadd.f32 %v1676_v61, %v868_v38  ;;  %v886_v3 = vmax.f32 %v842_v46, 0.0  ;;  %v845_v6 = vadd.f32 %v1166_v63, %v1676_v61  ;;  %v836_v7 = vpop.f32.mrb[7].mxu0 }
 0x1dd   : > { %v1143_v5 = vpack.c.bf16 %v894_v56, %v894_v56  ;;  %v895_v41 = vmax.f32 %v877_v59, 0.0  ;;  %v884_v1 = vmax.f32 %v834_v60, 0.0  ;;  %v837_v9 = vadd.f32 %v1676_v61, %v836_v7 }
 0x1de   : > { %v1141_v8 = vpack.c.bf16 %v892_v62, %v892_v62  ;;  %v893_v10 = vmax.f32 %v869_v0, 0.0  ;;  %v1135_v11 = vpack.c.bf16 %v886_v3, %v886_v3  ;;  %v887_v13 = vmax.f32 %v845_v6, 0.0 }
 0x1df   : > { %975 = vst.msk [vmem:[%s1685_s24 + $0x38] sm:$0xf] %vm960_vm13, %v1143_v5  ;;  %v1144_v14 = vpack.c.bf16 %v895_v41, %v895_v41  ;;  %v1133_v15 = vpack.c.bf16 %v884_v1, %v884_v1  ;;  %v885_v16 = vmax.f32 %v837_v9, 0.0 }
 0x1e0   : > { %973 = vst.msk [vmem:[%s1685_s24 + $0x30] sm:$0xf] %vm960_vm13, %v1141_v8  ;;  %v1142_v57 = vpack.c.bf16 %v893_v10, %v893_v10  ;;  %967 = vst.msk [vmem:[%s1685_s24 + $0x18] sm:$0xf] %vm960_vm13, %v1135_v11  ;;  %v1136_v17 = vpack.c.bf16 %v887_v13, %v887_v13 }
 0x1e1   : > { %976 = vst.msk [vmem:[%s1685_s24 + $0x3c] sm:$0xf] %vm960_vm13, %v1144_v14  ;;  %965 = vst.msk [vmem:[%s1685_s24 + $0x10] sm:$0xf] %vm960_vm13, %v1133_v15  ;;  %v1134_v61 = vpack.c.bf16 %v885_v16, %v885_v16 }
 0x1e2   : > { %974 = vst.msk [vmem:[%s1685_s24 + $0x34] sm:$0xf] %vm960_vm13, %v1142_v57  ;;  %968 = vst.msk [vmem:[%s1685_s24 + $0x1c] sm:$0xf] %vm960_vm13, %v1136_v17 }
 0x1e3   : > { %966 = vst.msk [vmem:[%s1685_s24 + $0x14] sm:$0xf] %vm960_vm13, %v1134_v61 }
 0x1e4 PF: > { %s13_s16 = sadd.s32 1, %s1289_s16   ;;  %s1750_s12 = smov %s1281_s14 }
 0x1e5   : > { %p10_p8 = scmp.ge.s32.totalorder %s13_s16, 10   ;;  %s1751_s13 = smov %s1285_s15 }
 0x1e6   : > { %s1752_s14 = smov %s1755_s17  ;;  %s1753_s15 = smov %s1759_s18 }
 0x1e7   :  { %12 = sbr.rel (!%p10_p8) target bundleno = 3 (0x3), region = 62 }

// kernel: _lambda_.16
= control target key start
LH: loop header
LB: loop body
LE: loop exit
PB: predicated region body
PF: predicated region fallthrough
CT: control target
= control target key end

     0   :  { %7 = vsyncpa [#allocation4], 0  ;;  %s468_s9 = smov 0   ;;  %s470_s10 = smov 0   ;;  %s543_s0 = inlined_call_operand.vmem [shape: f32[4,64,64], index: 0, kind: input, shape index: {}, may-alias: {0,1}]   ;;  %s544_s1 = inlined_call_operand.vmem [shape: f32[4,64,64], index: 1, kind: input, shape index: {}, may-alias: {0,1}]   ;;  %s545_s2 = inlined_call_operand.hbm [shape: f32[1,1], index: 2, kind: output, shape index: {}]  }
   0x1   :  { %s472_s11 = smov 0  }
   0x2 LB: > { %s357_s12 = sadd.s32 4294967295, %s449_s11   ;;  %s25_s13 = sadd.s32 1, %s445_s10  ;;  %s449_s11 = sphi %s472_s11, %s13_s11   ;;  %s445_s10 = sphi %s470_s10, %s548_s10   ;;  %s441_s9 = sphi %s468_s9, %s547_s9  }
   0x3   : > { %p27_p0 = scmp.ge.s32.totalorder %s25_s13, 2  ;;  %p360_p1 = scmp.ge.s32.totalorder %s449_s11, 1 }
   0x4   : > { %p148_p2 = scmp.lt.s32.totalorder %s449_s11, 3 }
   0x5   : > { %s550_s13 = smov (%p27_p0, %s25_s13), 0 }
   0x6   : > { %p149_p3 = pnand %p360_p1, %p148_p2 }
   0x7   : > { %p180_p4 = scmp.lt.s32.totalorder (!%p149_p3), %s441_s9, 3  ;;  %s189_s14 = sadd.s32 (!%p149_p3), 2, %s441_s9  ;;  %vm245_vm0 = vcmask (!%p149_p3), 523264  }
   0x8   : > { %152 = sbr.rel (%p149_p3) target bundleno = 256 (0x100), region = 28  ;;  %p191_p5 = scmp.lt.s32.totalorder (!%p149_p3), %s189_s14, 3 }
   0x9   : > { %p201_p6 = scmp.eq.s32.totalorder (!%p149_p3), %s441_s9, 0  ;;  %s451_s24 = smov (!%p149_p3), 0.0  }
   0xa   : > { %p205_p7 = scmp.eq.s32.totalorder (!%p149_p3), %s441_s9, 1  ;;  %p510_p8 = scmp.eq.s32.totalorder (!%p149_p3), %s357_s12, 1 }
   0xb   : > { %s411_s4 = scalar_lea.hbm (!%p149_p3), %s545_s2, 16 }
   0xc   : > { %p412_p9 = scmp.ne.s32.totalorder (!%p149_p3), %s545_s2, %s411_s4  ;;  %p417_p12 = scmp.lt.u32.totalorder (!%p149_p3), %s411_s4, %s545_s2 }
   0xe   : > { %p413_p10 = pnand (!%p149_p3), %p412_p9, %p510_p8 }
   0xf   : > { %s181_s15 = scalar_select %p180_p4, %s441_s9, 3 }
  0x10   : > { %s552_s14 = smov (!%p191_p5, %s189_s14), 3  ;;  %377 = sst [smem:[#allocation2]] (%p201_p6), %s451_s24 }
  0x11   : > { %s371_s16 = sshll.u32 %s181_s15, 6  ;;  %s372_s20 = sshll.u32 %s552_s14, 6 }
  0x12   : > { %s187_s19 = scalar_lea.vmem %s543_s0, %s371_s16  ;;  %s198_s23 = scalar_lea.vmem %s544_s1, %s372_s20 }
  0x13   : > { %v212_v0 = vld [vmem:[%s187_s19] sm:$0xff]  ;;  %v213_v1 = vld [vmem:[%s187_s19 + $0x8] sm:$0xff]  ;;  %v214_v2 = vld [vmem:[%s187_s19 + $0x10] sm:$0xff]  ;;  %s236_s25 = sld [smem:[#allocation2]]  ;;  %p414_p11 = pneg %p413_p10 }
  0x14   : > { %v215_v3 = vld [vmem:[%s187_s19 + $0x18] sm:$0xff]  ;;  %v216_v4 = vld [vmem:[%s187_s19 + $0x20] sm:$0xff]  ;;  %v217_v5 = vld [vmem:[%s187_s19 + $0x28] sm:$0xff] }
  0x15   : > { %v220_v6 = vld [vmem:[%s198_s23] sm:$0xff]  ;;  %v221_v7 = vld [vmem:[%s198_s23 + $0x8] sm:$0xff]  ;;  %v222_v8 = vld [vmem:[%s198_s23 + $0x10] sm:$0xff]  ;;  %p419_p13 = pnand %p417_p12, %p414_p11 }
  0x16   : > { %v223_v9 = vld [vmem:[%s198_s23 + $0x18] sm:$0xff]  ;;  %v228_v10 = vsub.f32 %v212_v0, %v220_v6  ;;  %v224_v11 = vld [vmem:[%s198_s23 + $0x20] sm:$0xff]  ;;  %v225_v12 = vld [vmem:[%s198_s23 + $0x28] sm:$0xff]  ;;  %v229_v13 = vsub.f32 %v213_v1, %v221_v7  ;;  %v230_v14 = vsub.f32 %v214_v2, %v222_v8 }
  0x17   : > { %v231_v15 = vsub.f32 %v215_v3, %v223_v9  ;;  %v218_v16 = vld [vmem:[%s187_s19 + $0x30] sm:$0xff]  ;;  %v232_v18 = vsub.f32 %v216_v4, %v224_v11  ;;  %v233_v20 = vsub.f32 %v217_v5, %v225_v12  ;;  %v219_v24 = vld [vmem:[%s187_s19 + $0x38] sm:$0xff] }
  0x18   : > { %v226_v17 = vld [vmem:[%s198_s23 + $0x30] sm:$0xff]  ;;  %v237_v19 = vmul.f32 %v228_v10, %v228_v10  ;;  %v238_v21 = vmul.f32 %v229_v13, %v229_v13  ;;  %v239_v22 = vmul.f32 %v230_v14, %v230_v14  ;;  %v227_v25 = vld [vmem:[%s198_s23 + $0x38] sm:$0xff] }
  0x19   : > { %v240_v23 = vmul.f32 %v231_v15, %v231_v15  ;;  %v234_v27 = vsub.f32 %v218_v16, %v226_v17  ;;  %v241_v28 = vmul.f32 %v232_v18, %v232_v18  ;;  %v235_v32 = vsub.f32 %v219_v24, %v227_v25 }
  0x1a   : > { %v246_v26 = vsel %vm245_vm0, %v237_v19, 0.0  ;;  %v247_v29 = vsel %vm245_vm0, %v238_v21, 0.0  ;;  %v249_v30 = vsel %vm245_vm0, %v239_v22, 0.0  ;;  %v242_v33 = vmul.f32 %v233_v20, %v233_v20 }
  0x1b   : > { %v248_v31 = vadd.f32 %v247_v29, %v246_v26  ;;  %v251_v34 = vsel %vm245_vm0, %v240_v23, 0.0  ;;  %v243_v36 = vmul.f32 %v234_v27, %v234_v27  ;;  %v253_v37 = vsel %vm245_vm0, %v241_v28, 0.0 }
  0x1c   : > { %v244_v39 = vmul.f32 %v235_v32, %v235_v32  ;;  %v255_v40 = vsel %vm245_vm0, %v242_v33, 0.0 }
  0x1d   : > { %v250_v35 = vadd.f32 %v249_v30, %v248_v31  ;;  %v257_v42 = vsel %vm245_vm0, %v243_v36, 0.0 }
  0x1e   : > { %v259_v44 = vsel %vm245_vm0, %v244_v39, 0.0 }
  0x1f   : > { %v252_v38 = vadd.f32 %v251_v34, %v250_v35 }
  0x21   : > { %v254_v41 = vadd.f32 %v253_v37, %v252_v38 }
  0x23   : > { %v256_v43 = vadd.f32 %v255_v40, %v254_v41 }
  0x25   : > { %v258_v45 = vadd.f32 %v257_v42, %v256_v43 }
  0x27   : > { %v260_v46 = vadd.f32 %v259_v44, %v258_v45 }
  0x29   : > { %261 = vadd.xlane.f32.xlu0 %v260_v46 }
  0xb6   : > { %v262_v47 = vpop.xlane.xlu0 %261 }
  0xb7   : > { %v263_v48 = vrot.slane %v262_v47, 4 }
  0xb9   : > { %v264_v49 = vadd.f32 %v263_v48, %v262_v47 }
  0xbb   : > { %v265_v50 = vrot.slane %v264_v49, 2 }
  0xbd   : > { %v266_v51 = vadd.f32 %v265_v50, %v264_v49 }
  0xbf   : > { %v267_v52 = vrot.slane %v266_v51, 1 }
  0xc1   : > { %v268_v53 = vadd.f32 %v267_v52, %v266_v51 }
  0xc3   : > { %375 = vpush %v268_v53 }
  0xf4   : > { %s376_s26 = spop %375 }
  0xf5   : > { %s270_s27 = sadd.f32 %s376_s26, %s236_s25 }
  0xf7   : > { %272 = sst [smem:[#allocation2]] %s270_s27  ;;  %s276_s29 = smul.f32 0.00012207031, %s270_s27 }
  0xf9   : > { %378 = sst [smem:[#allocation3]] (%p205_p7), %s276_s29 }
  0xfa   : > { %422 = shalt.err (!%p419_p13)
}
  0xfb   : > { %s452_s9 = smov [#allocation3]  }
  0xfc   : > { %380 = dma.smem_to_hbm (%p510_p8), %s452_s9, 16, %s545_s2, [#allocation4]  }
  0xfd   : > { %436 = dma.done.wait (%p510_p8), [#allocation4], 16  }
  0xfe   : > { %438 = vsyncadd (%p510_p8), [#allocation4], 4294967280 }
  0xff   : > { %292 = sfence }
 0x100 PF: > { %s13_s11 = sadd.s32 1, %s449_s11   ;;  %s547_s9 = smov %s445_s10 }
 0x101   : > { %p10_p0 = scmp.ge.s32.totalorder %s13_s11, 4   ;;  %s548_s10 = smov %s550_s13 }
 0x103   :  { %12 = sbr.rel (!%p10_p0) target bundleno = 2 (0x2), region = 69 }
 0x10a   :  { %298 = vsyncpa [#allocation4], 1 }
 0x10b   :  { %300 = vsyncpa [#allocation4 + $0x1], 1 }

// kernel: _lambda_.13
= control target key start
LH: loop header
LB: loop body
LE: loop exit
PB: predicated region body
PF: predicated region fallthrough
CT: control target
= control target key end

     0   :  { %7 = vsyncpa [#allocation4], 0  ;;  %s834_s9 = smov 0   ;;  %s836_s10 = smov 0   ;;  %s969_s0 = inlined_call_operand.vmem [shape: bf16[4,256,64], index: 0, kind: input, shape index: {}, may-alias: {0,1}]   ;;  %s970_s1 = inlined_call_operand.vmem [shape: bf16[4,256,64], index: 1, kind: input, shape index: {}, may-alias: {0,1}]   ;;  %s971_s2 = inlined_call_operand.hbm [shape: f32[1,1], index: 2, kind: output, shape index: {}]  }
   0x1   :  { %s838_s11 = smov 0  }
   0x2 LB: > { %s565_s12 = sadd.s32 4294967295, %s815_s11   ;;  %s25_s13 = sadd.s32 1, %s811_s10  ;;  %s815_s11 = sphi %s838_s11, %s13_s11   ;;  %s811_s10 = sphi %s836_s10, %s974_s10   ;;  %s807_s9 = sphi %s834_s9, %s973_s9  }
   0x3   : > { %p27_p0 = scmp.ge.s32.totalorder %s25_s13, 2  ;;  %p568_p1 = scmp.ge.s32.totalorder %s815_s11, 1 }
   0x4   : > { %p148_p2 = scmp.lt.s32.totalorder %s815_s11, 3 }
   0x5   : > { %s976_s13 = smov (%p27_p0, %s25_s13), 0 }
   0x6   : > { %p149_p3 = pnand %p568_p1, %p148_p2 }
   0x7   : > { %s189_s14 = sadd.s32 (!%p149_p3), 2, %s807_s9  ;;  %p180_p4 = scmp.lt.s32.totalorder (!%p149_p3), %s807_s9, 3  ;;  %vm405_vm0 = vcmask (!%p149_p3), 523264  }
   0x8   : > { %152 = sbr.rel (%p149_p3) target bundleno = 305 (0x131), region = 28  ;;  %p191_p5 = scmp.lt.s32.totalorder (!%p149_p3), %s189_s14, 3 }
   0x9   : > { %p201_p6 = scmp.eq.s32.totalorder (!%p149_p3), %s807_s9, 0  ;;  %s817_s24 = smov (!%p149_p3), 0.0  }
   0xa   : > { %p205_p7 = scmp.eq.s32.totalorder (!%p149_p3), %s807_s9, 1  ;;  %p936_p8 = scmp.eq.s32.totalorder (!%p149_p3), %s565_s12, 1 }
   0xb   : > { %s777_s4 = scalar_lea.hbm (!%p149_p3), %s971_s2, 16 }
   0xc   : > { %p778_p9 = scmp.ne.s32.totalorder (!%p149_p3), %s971_s2, %s777_s4  ;;  %p783_p12 = scmp.lt.u32.totalorder (!%p149_p3), %s777_s4, %s971_s2 }
   0xe   : > { %p779_p10 = pnand (!%p149_p3), %p778_p9, %p936_p8 }
   0xf   : > { %s181_s15 = scalar_select %p180_p4, %s807_s9, 3 }
  0x10   : > { %s978_s14 = smov (!%p191_p5, %s189_s14), 3  ;;  %743 = sst [smem:[#allocation2]] (%p201_p6), %s817_s24 }
  0x11   : > { %s579_s16 = sshll.u32 %s181_s15, 7  ;;  %s580_s17 = sshll.u32 %s978_s14, 7 }
  0x12   : > { %s861_s20 = scalar_lea.vmem %s969_s0, %s579_s16  ;;  %s866_s23 = scalar_lea.vmem %s970_s1, %s580_s17 }
  0x13   : > { %v584_v0 = vld [vmem:[%s861_s20] sm:$0xff]   ;;  %v711_v1 = vld [vmem:[%s861_s20 + $0x8] sm:$0xff]   ;;  %v712_v7 = vld [vmem:[%s861_s20 + $0x10] sm:$0xff]   ;;  %s372_s25 = sld [smem:[#allocation2]]  ;;  %p780_p11 = pneg %p779_p10 }
  0x14   : > { %v648_v2 = vld [vmem:[%s866_s23] sm:$0xff]   ;;  %v726_v3 = vld [vmem:[%s866_s23 + $0x8] sm:$0xff]   ;;  %v585_v4 = vunpack.c.l.bf16 %v584_v0  ;;  %v586_v5 = vunpack.c.h.bf16 %v584_v0  ;;  %v589_v6 = vunpack.c.l.bf16 %v711_v1  ;;  %v727_v11 = vld [vmem:[%s866_s23 + $0x10] sm:$0xff]   ;;  %v590_v12 = vunpack.c.h.bf16 %v711_v1 }
  0x15   : > { %v649_v8 = vunpack.c.l.bf16 %v648_v2  ;;  %v650_v9 = vunpack.c.h.bf16 %v648_v2  ;;  %v653_v10 = vunpack.c.l.bf16 %v726_v3  ;;  %v654_v13 = vunpack.c.h.bf16 %v726_v3  ;;  %v713_v15 = vld [vmem:[%s861_s20 + $0x18] sm:$0xff]   ;;  %v714_v26 = vld [vmem:[%s861_s20 + $0x20] sm:$0xff]   ;;  %v715_v39 = vld [vmem:[%s861_s20 + $0x28] sm:$0xff]   ;;  %p785_p13 = pnand %p783_p12, %p780_p11 }
  0x16   : > { %v593_v14 = vunpack.c.l.bf16 %v712_v7  ;;  %v657_v16 = vunpack.c.l.bf16 %v727_v11  ;;  %v728_v17 = vld [vmem:[%s866_s23 + $0x18] sm:$0xff]   ;;  %v594_v21 = vunpack.c.h.bf16 %v712_v7  ;;  %v658_v22 = vunpack.c.h.bf16 %v727_v11  ;;  %v729_v27 = vld [vmem:[%s866_s23 + $0x20] sm:$0xff]   ;;  %v730_v45 = vld [vmem:[%s866_s23 + $0x28] sm:$0xff]  }
  0x17   : > { %v340_v18 = vsub.f32 %v585_v4, %v649_v8  ;;  %v341_v19 = vsub.f32 %v586_v5, %v650_v9  ;;  %v342_v20 = vsub.f32 %v589_v6, %v653_v10  ;;  %v343_v23 = vsub.f32 %v590_v12, %v654_v13  ;;  %v716_v53 = vld [vmem:[%s861_s20 + $0x30] sm:$0xff]   ;;  %v717_v3 = vld [vmem:[%s861_s20 + $0x38] sm:$0xff]  }
  0x18   : > { %v597_v24 = vunpack.c.l.bf16 %v713_v15  ;;  %v661_v25 = vunpack.c.l.bf16 %v728_v17  ;;  %v344_v28 = vsub.f32 %v593_v14, %v657_v16  ;;  %v598_v32 = vunpack.c.h.bf16 %v713_v15  ;;  %v731_v59 = vld [vmem:[%s866_s23 + $0x30] sm:$0xff]   ;;  %v732_v9 = vld [vmem:[%s866_s23 + $0x38] sm:$0xff]  }
  0x19   : > { %v373_v29 = vmul.f32 %v340_v18, %v340_v18  ;;  %v374_v30 = vmul.f32 %v341_v19, %v341_v19  ;;  %v375_v31 = vmul.f32 %v342_v20, %v342_v20  ;;  %v662_v33 = vunpack.c.h.bf16 %v728_v17  ;;  %v718_v17 = vld [vmem:[%s861_s20 + $0x40] sm:$0xff]  }
  0x1a   : > { %v345_v34 = vsub.f32 %v594_v21, %v658_v22  ;;  %v376_v35 = vmul.f32 %v343_v23, %v343_v23  ;;  %v601_v36 = vunpack.c.l.bf16 %v714_v26  ;;  %v665_v37 = vunpack.c.l.bf16 %v729_v27  ;;  %v733_v23 = vld [vmem:[%s866_s23 + $0x40] sm:$0xff]  }
  0x1b   : > { %v346_v38 = vsub.f32 %v597_v24, %v661_v25  ;;  %v377_v40 = vmul.f32 %v344_v28, %v344_v28  ;;  %v406_v41 = vsel %vm405_vm0, %v373_v29, 0.0  ;;  %v407_v42 = vsel %vm405_vm0, %v374_v30, 0.0 }
  0x1c   : > { %v409_v43 = vsel %vm405_vm0, %v375_v31, 0.0  ;;  %v602_v44 = vunpack.c.h.bf16 %v714_v26  ;;  %v408_v46 = vadd.f32 %v407_v42, %v406_v41  ;;  %v666_v47 = vunpack.c.h.bf16 %v729_v27  ;;  %v719_v31 = vld [vmem:[%s861_s20 + $0x48] sm:$0xff]  }
  0x1d   : > { %v347_v48 = vsub.f32 %v598_v32, %v662_v33  ;;  %v378_v49 = vmul.f32 %v345_v34, %v345_v34  ;;  %v411_v50 = vsel %vm405_vm0, %v376_v35, 0.0  ;;  %v605_v51 = vunpack.c.l.bf16 %v715_v39 }
  0x1e   : > { %v410_v52 = vadd.f32 %v409_v43, %v408_v46  ;;  %v669_v54 = vunpack.c.l.bf16 %v730_v45  ;;  %v348_v55 = vsub.f32 %v601_v36, %v665_v37  ;;  %v379_v56 = vmul.f32 %v346_v38, %v346_v38  ;;  %v734_v37 = vld [vmem:[%s866_s23 + $0x48] sm:$0xff]  }
  0x1f   : > { %v413_v57 = vsel %vm405_vm0, %v377_v40, 0.0  ;;  %v606_v58 = vunpack.c.h.bf16 %v715_v39  ;;  %v670_v61 = vunpack.c.h.bf16 %v730_v45  ;;  %v349_v62 = vsub.f32 %v602_v44, %v666_v47  ;;  %v720_v45 = vld [vmem:[%s861_s20 + $0x50] sm:$0xff]  }
  0x20   : > { %v412_v60 = vadd.f32 %v411_v50, %v410_v52  ;;  %v380_v63 = vmul.f32 %v347_v48, %v347_v48  ;;  %v415_v0 = vsel %vm405_vm0, %v378_v49, 0.0  ;;  %v609_v1 = vunpack.c.l.bf16 %v716_v53 }
  0x21   : > { %v673_v4 = vunpack.c.l.bf16 %v731_v59  ;;  %v350_v5 = vsub.f32 %v605_v51, %v669_v54  ;;  %v381_v6 = vmul.f32 %v348_v55, %v348_v55  ;;  %v417_v7 = vsel %vm405_vm0, %v379_v56, 0.0  ;;  %v735_v51 = vld [vmem:[%s866_s23 + $0x50] sm:$0xff]  }
  0x22   : > { %v414_v2 = vadd.f32 %v413_v57, %v412_v60  ;;  %v610_v8 = vunpack.c.h.bf16 %v716_v53  ;;  %v674_v11 = vunpack.c.h.bf16 %v731_v59  ;;  %v351_v12 = vsub.f32 %v606_v58, %v670_v61  ;;  %v721_v59 = vld [vmem:[%s861_s20 + $0x58] sm:$0xff]  }
  0x23   : > { %v382_v13 = vmul.f32 %v349_v62, %v349_v62  ;;  %v419_v14 = vsel %vm405_vm0, %v380_v63, 0.0  ;;  %v613_v15 = vunpack.c.l.bf16 %v717_v3  ;;  %v677_v18 = vunpack.c.l.bf16 %v732_v9 }
  0x24   : > { %v416_v10 = vadd.f32 %v415_v0, %v414_v2  ;;  %v352_v19 = vsub.f32 %v609_v1, %v673_v4  ;;  %v383_v20 = vmul.f32 %v350_v5, %v350_v5  ;;  %v421_v21 = vsel %vm405_vm0, %v381_v6, 0.0  ;;  %v736_v1 = vld [vmem:[%s866_s23 + $0x58] sm:$0xff]  }
  0x25   : > { %v614_v22 = vunpack.c.h.bf16 %v717_v3  ;;  %v678_v25 = vunpack.c.h.bf16 %v732_v9  ;;  %v353_v26 = vsub.f32 %v610_v8, %v674_v11  ;;  %v384_v27 = vmul.f32 %v351_v12, %v351_v12  ;;  %v722_v9 = vld [vmem:[%s861_s20 + $0x60] sm:$0xff]  }
  0x26   : > { %v418_v16 = vadd.f32 %v417_v7, %v416_v10  ;;  %v423_v28 = vsel %vm405_vm0, %v382_v13, 0.0  ;;  %v617_v29 = vunpack.c.l.bf16 %v718_v17  ;;  %v681_v32 = vunpack.c.l.bf16 %v733_v23 }
  0x27   : > { %v354_v33 = vsub.f32 %v613_v15, %v677_v18  ;;  %v385_v34 = vmul.f32 %v352_v19, %v352_v19  ;;  %v425_v35 = vsel %vm405_vm0, %v383_v20, 0.0  ;;  %v618_v36 = vunpack.c.h.bf16 %v718_v17  ;;  %v737_v15 = vld [vmem:[%s866_s23 + $0x60] sm:$0xff]  }
  0x28   : > { %v420_v24 = vadd.f32 %v419_v14, %v418_v16  ;;  %v682_v39 = vunpack.c.h.bf16 %v733_v23  ;;  %v355_v40 = vsub.f32 %v614_v22, %v678_v25  ;;  %v386_v41 = vmul.f32 %v353_v26, %v353_v26  ;;  %v723_v23 = vld [vmem:[%s861_s20 + $0x68] sm:$0xff]  }
  0x29   : > { %v427_v42 = vsel %vm405_vm0, %v384_v27, 0.0  ;;  %v621_v43 = vunpack.c.l.bf16 %v719_v31  ;;  %v685_v46 = vunpack.c.l.bf16 %v734_v37  ;;  %v356_v47 = vsub.f32 %v617_v29, %v681_v32  ;;  %v738_v29 = vld [vmem:[%s866_s23 + $0x68] sm:$0xff]  }
  0x2a   : > { %v422_v30 = vadd.f32 %v421_v21, %v420_v24  ;;  %v387_v48 = vmul.f32 %v354_v33, %v354_v33  ;;  %v429_v49 = vsel %vm405_vm0, %v385_v34, 0.0  ;;  %v622_v50 = vunpack.c.h.bf16 %v719_v31 }
  0x2b   : > { %v686_v53 = vunpack.c.h.bf16 %v734_v37  ;;  %v357_v54 = vsub.f32 %v618_v36, %v682_v39  ;;  %v388_v55 = vmul.f32 %v355_v40, %v355_v40  ;;  %v431_v56 = vsel %vm405_vm0, %v386_v41, 0.0  ;;  %v724_v37 = vld [vmem:[%s861_s20 + $0x70] sm:$0xff]  }
  0x2c   : > { %v424_v38 = vadd.f32 %v423_v28, %v422_v30  ;;  %v625_v57 = vunpack.c.l.bf16 %v720_v45  ;;  %v689_v60 = vunpack.c.l.bf16 %v735_v51  ;;  %v358_v61 = vsub.f32 %v621_v43, %v685_v46  ;;  %v739_v43 = vld [vmem:[%s866_s23 + $0x70] sm:$0xff]  }
  0x2d   : > { %v389_v62 = vmul.f32 %v356_v47, %v356_v47  ;;  %v433_v63 = vsel %vm405_vm0, %v387_v48, 0.0  ;;  %v626_v0 = vunpack.c.h.bf16 %v720_v45  ;;  %v690_v3 = vunpack.c.h.bf16 %v735_v51  ;;  %v725_v51 = vld [vmem:[%s861_s20 + $0x78] sm:$0xff]  }
  0x2e   : > { %v426_v44 = vadd.f32 %v425_v35, %v424_v38  ;;  %v359_v4 = vsub.f32 %v622_v50, %v686_v53  ;;  %v390_v5 = vmul.f32 %v357_v54, %v357_v54  ;;  %v435_v6 = vsel %vm405_vm0, %v388_v55, 0.0 }
  0x2f   : > { %v629_v7 = vunpack.c.l.bf16 %v721_v59  ;;  %v693_v10 = vunpack.c.l.bf16 %v736_v1  ;;  %v360_v11 = vsub.f32 %v625_v57, %v689_v60  ;;  %v391_v12 = vmul.f32 %v358_v61, %v358_v61  ;;  %v740_v57 = vld [vmem:[%s866_s23 + $0x78] sm:$0xff]  }
  0x30   : > { %v428_v52 = vadd.f32 %v427_v42, %v426_v44  ;;  %v437_v13 = vsel %vm405_vm0, %v389_v62, 0.0  ;;  %v630_v14 = vunpack.c.h.bf16 %v721_v59  ;;  %v694_v17 = vunpack.c.h.bf16 %v736_v1 }
  0x31   : > { %v361_v18 = vsub.f32 %v626_v0, %v690_v3  ;;  %v392_v19 = vmul.f32 %v359_v4, %v359_v4  ;;  %v439_v20 = vsel %vm405_vm0, %v390_v5, 0.0  ;;  %v633_v21 = vunpack.c.l.bf16 %v722_v9 }
  0x32   : > { %v430_v58 = vadd.f32 %v429_v49, %v428_v52  ;;  %v697_v24 = vunpack.c.l.bf16 %v737_v15  ;;  %v362_v25 = vsub.f32 %v629_v7, %v693_v10  ;;  %v393_v26 = vmul.f32 %v360_v11, %v360_v11 }
  0x33   : > { %v441_v27 = vsel %vm405_vm0, %v391_v12, 0.0  ;;  %v634_v28 = vunpack.c.h.bf16 %v722_v9  ;;  %v698_v31 = vunpack.c.h.bf16 %v737_v15  ;;  %v363_v32 = vsub.f32 %v630_v14, %v694_v17 }
  0x34   : > { %v432_v2 = vadd.f32 %v431_v56, %v430_v58  ;;  %v394_v33 = vmul.f32 %v361_v18, %v361_v18  ;;  %v443_v34 = vsel %vm405_vm0, %v392_v19, 0.0  ;;  %v637_v35 = vunpack.c.l.bf16 %v723_v23 }
  0x35   : > { %v701_v38 = vunpack.c.l.bf16 %v738_v29  ;;  %v364_v39 = vsub.f32 %v633_v21, %v697_v24  ;;  %v395_v40 = vmul.f32 %v362_v25, %v362_v25  ;;  %v445_v41 = vsel %vm405_vm0, %v393_v26, 0.0 }
  0x36   : > { %v434_v8 = vadd.f32 %v433_v63, %v432_v2  ;;  %v638_v42 = vunpack.c.h.bf16 %v723_v23  ;;  %v702_v45 = vunpack.c.h.bf16 %v738_v29  ;;  %v365_v46 = vsub.f32 %v634_v28, %v698_v31 }
  0x37   : > { %v396_v47 = vmul.f32 %v363_v32, %v363_v32  ;;  %v447_v48 = vsel %vm405_vm0, %v394_v33, 0.0  ;;  %v641_v49 = vunpack.c.l.bf16 %v724_v37  ;;  %v705_v52 = vunpack.c.l.bf16 %v739_v43 }
  0x38   : > { %v436_v16 = vadd.f32 %v435_v6, %v434_v8  ;;  %v366_v53 = vsub.f32 %v637_v35, %v701_v38  ;;  %v397_v54 = vmul.f32 %v364_v39, %v364_v39  ;;  %v449_v55 = vsel %vm405_vm0, %v395_v40, 0.0 }
  0x39   : > { %v642_v56 = vunpack.c.h.bf16 %v724_v37  ;;  %v706_v59 = vunpack.c.h.bf16 %v739_v43  ;;  %v367_v60 = vsub.f32 %v638_v42, %v702_v45  ;;  %v398_v61 = vmul.f32 %v365_v46, %v365_v46 }
  0x3a   : > { %v438_v22 = vadd.f32 %v437_v13, %v436_v16  ;;  %v451_v62 = vsel %vm405_vm0, %v396_v47, 0.0  ;;  %v645_v63 = vunpack.c.l.bf16 %v725_v51  ;;  %v709_v1 = vunpack.c.l.bf16 %v740_v57 }
  0x3b   : > { %v368_v2 = vsub.f32 %v641_v49, %v705_v52  ;;  %v399_v3 = vmul.f32 %v366_v53, %v366_v53  ;;  %v453_v4 = vsel %vm405_vm0, %v397_v54, 0.0  ;;  %v646_v5 = vunpack.c.h.bf16 %v725_v51 }
  0x3c   : > { %v440_v30 = vadd.f32 %v439_v20, %v438_v22  ;;  %v710_v7 = vunpack.c.h.bf16 %v740_v57  ;;  %v369_v8 = vsub.f32 %v642_v56, %v706_v59  ;;  %v400_v9 = vmul.f32 %v367_v60, %v367_v60 }
  0x3d   : > { %v455_v10 = vsel %vm405_vm0, %v398_v61, 0.0  ;;  %v370_v12 = vsub.f32 %v645_v63, %v709_v1  ;;  %v401_v13 = vmul.f32 %v368_v2, %v368_v2  ;;  %v457_v14 = vsel %vm405_vm0, %v399_v3, 0.0 }
  0x3e   : > { %v442_v36 = vadd.f32 %v441_v27, %v440_v30  ;;  %v371_v16 = vsub.f32 %v646_v5, %v710_v7  ;;  %v402_v17 = vmul.f32 %v369_v8, %v369_v8  ;;  %v459_v18 = vsel %vm405_vm0, %v400_v9, 0.0 }
  0x3f   : > { %v403_v20 = vmul.f32 %v370_v12, %v370_v12  ;;  %v461_v21 = vsel %vm405_vm0, %v401_v13, 0.0 }
  0x40   : > { %v444_v44 = vadd.f32 %v443_v34, %v442_v36  ;;  %v404_v23 = vmul.f32 %v371_v16, %v371_v16  ;;  %v463_v24 = vsel %vm405_vm0, %v402_v17, 0.0 }
  0x41   : > { %v465_v26 = vsel %vm405_vm0, %v403_v20, 0.0 }
  0x42   : > { %v446_v50 = vadd.f32 %v445_v41, %v444_v44  ;;  %v467_v28 = vsel %vm405_vm0, %v404_v23, 0.0 }
  0x44   : > { %v448_v58 = vadd.f32 %v447_v48, %v446_v50 }
  0x46   : > { %v450_v0 = vadd.f32 %v449_v55, %v448_v58 }
  0x48   : > { %v452_v6 = vadd.f32 %v451_v62, %v450_v0 }
  0x4a   : > { %v454_v11 = vadd.f32 %v453_v4, %v452_v6 }
  0x4c   : > { %v456_v15 = vadd.f32 %v455_v10, %v454_v11 }
  0x4e   : > { %v458_v19 = vadd.f32 %v457_v14, %v456_v15 }
  0x50   : > { %v460_v22 = vadd.f32 %v459_v18, %v458_v19 }
  0x52   : > { %v462_v25 = vadd.f32 %v461_v21, %v460_v22 }
  0x54   : > { %v464_v27 = vadd.f32 %v463_v24, %v462_v25 }
  0x56   : > { %v466_v29 = vadd.f32 %v465_v26, %v464_v27 }
  0x58   : > { %v468_v30 = vadd.f32 %v467_v28, %v466_v29 }
  0x5a   : > { %469 = vadd.xlane.f32.xlu0 %v468_v30 }
  0xe7   : > { %v470_v31 = vpop.xlane.xlu0 %469 }
  0xe8   : > { %v471_v32 = vrot.slane %v470_v31, 4 }
  0xea   : > { %v472_v33 = vadd.f32 %v471_v32, %v470_v31 }
  0xec   : > { %v473_v34 = vrot.slane %v472_v33, 2 }
  0xee   : > { %v474_v35 = vadd.f32 %v473_v34, %v472_v33 }
  0xf0   : > { %v475_v36 = vrot.slane %v474_v35, 1 }
  0xf2   : > { %v476_v37 = vadd.f32 %v475_v36, %v474_v35 }
  0xf4   : > { %741 = vpush %v476_v37 }
 0x125   : > { %s742_s26 = spop %741 }
 0x126   : > { %s478_s27 = sadd.f32 %s742_s26, %s372_s25 }
 0x128   : > { %480 = sst [smem:[#allocation2]] %s478_s27  ;;  %s484_s29 = smul.f32 3.0517578e-05, %s478_s27 }
 0x12a   : > { %744 = sst [smem:[#allocation3]] (%p205_p7), %s484_s29 }
 0x12b   : > { %788 = shalt.err (!%p785_p13)
}
 0x12c   : > { %s818_s9 = smov [#allocation3]  }
 0x12d   : > { %746 = dma.smem_to_hbm (%p936_p8), %s818_s9, 16, %s971_s2, [#allocation4]  }
 0x12e   : > { %802 = dma.done.wait (%p936_p8), [#allocation4], 16  }
 0x12f   : > { %804 = vsyncadd (%p936_p8), [#allocation4], 4294967280 }
 0x130   : > { %500 = sfence }
 0x131 PF: > { %s13_s11 = sadd.s32 1, %s815_s11   ;;  %s973_s9 = smov %s811_s10 }
 0x132   : > { %p10_p0 = scmp.ge.s32.totalorder %s13_s11, 4   ;;  %s974_s10 = smov %s976_s13 }
 0x134   :  { %12 = sbr.rel (!%p10_p0) target bundleno = 2 (0x2), region = 69 }
 0x13b   :  { %506 = vsyncpa [#allocation4], 1 }
 0x13c   :  { %508 = vsyncpa [#allocation4 + $0x1], 1 }

// kernel: _lambda_.14
= control target key start
LH: loop header
LB: loop body
LE: loop exit
PB: predicated region body
PF: predicated region fallthrough
CT: control target
= control target key end

     0   :  { %s666_s6 = smov 0   ;;  %s668_s7 = smov 0   ;;  %s787_s0 = inlined_call_operand.vmem [shape: bf16[4,256,64], index: 0, kind: input, shape index: {}]   ;;  %s788_s1 = inlined_call_operand.vmem [shape: f32[4,64,64], index: 1, kind: output, shape index: {}]  }
   0x1   :  { %s670_s8 = smov 0  }
   0x2 LB: > { %s23_s9 = sadd.s32 1, %s649_s7  ;;  %p509_p0 = scmp.ge.s32.totalorder %s653_s8, 1  ;;  %s653_s8 = sphi %s670_s8, %s11_s8   ;;  %s649_s7 = sphi %s668_s7, %s790_s7   ;;  %s645_s6 = sphi %s666_s6, %s789_s6  }
   0x3   : > { %p25_p1 = scmp.ge.s32.totalorder %s23_s9, 4  ;;  %p106_p2 = scmp.lt.s32.totalorder %s653_s8, 5 }
   0x5   : > { %s792_s9 = smov (%p25_p1, %s23_s9), 0  ;;  %p107_p3 = pnand %p509_p0, %p106_p2 }
   0x6   : > { %p131_p4 = scmp.lt.s32.totalorder (!%p107_p3), %s645_s6, 3  ;;  %vm150_vm0 = vcmask (!%p107_p3), 523264   ;;  %v655_v24 = vmov (!%p107_p3), 0.0  }
   0x7   : > { %110 = sbr.rel (%p107_p3) target bundleno = 369 (0x171), region = 24 }
   0xe   : > { %s794_s6 = smov (!%p131_p4, %s645_s6), 3 }
   0xf   : > { %s532_s10 = sshll.u32 %s794_s6, 7  ;;  %s533_s14 = sshll.u32 %s794_s6, 6 }
  0x10   : > { %s690_s13 = scalar_lea.vmem %s787_s0, %s532_s10  ;;  %s712_s17 = scalar_lea.vmem %s788_s1, %s533_s14 }
  0x11   : > { %v615_v0 = vld [vmem:[%s690_s13 + $0x40] sm:$0xff]   ;;  %v617_v2 = vld [vmem:[%s690_s13 + $0x48] sm:$0xff]   ;;  %v619_v4 = vld [vmem:[%s690_s13 + $0x50] sm:$0xff]   ;;  %151 = vst.msk [vmem:[%s712_s17] sm:$0xff] %vm150_vm0, %v655_v24 }
  0x12   : > { %v616_v1 = vld [vmem:[%s690_s13] sm:$0xff]   ;;  %311 = vxpose.xlu0.c.b16.start [1/8] (narrow) %v615_v0, 64  ;;  %534 = vmatprep.subr.bf16.mxu0 %v615_v0  ;;  %v618_v3 = vld [vmem:[%s690_s13 + $0x8] sm:$0xff]   ;;  %v620_v5 = vld [vmem:[%s690_s13 + $0x10] sm:$0xff]   ;;  %152 = vst.msk [vmem:[%s712_s17 + $0x8] sm:$0xff] %vm150_vm0, %v655_v24 }
  0x13   : > { %295 = vxpose.xlu1.c.b16.start [1/8] (narrow) %v616_v1, 64  ;;  %535 = vmatpush3.bf16.msra.mxu0 %v616_v1  ;;  %v621_v6 = vld [vmem:[%s690_s13 + $0x58] sm:$0xff]   ;;  %v623_v8 = vld [vmem:[%s690_s13 + $0x60] sm:$0xff]   ;;  %v625_v10 = vld [vmem:[%s690_s13 + $0x68] sm:$0xff]   ;;  %153 = vst.msk [vmem:[%s712_s17 + $0x10] sm:$0xff] %vm150_vm0, %v655_v24 }
  0x14   : > { %536 = vmatprep.subr.bf16.mxu0 %v617_v2  ;;  %574 = vmatprep.subr.bf16.mxu1 %v615_v0  ;;  %v622_v7 = vld [vmem:[%s690_s13 + $0x18] sm:$0xff]   ;;  %v624_v9 = vld [vmem:[%s690_s13 + $0x20] sm:$0xff]   ;;  %v626_v11 = vld [vmem:[%s690_s13 + $0x28] sm:$0xff]   ;;  %154 = vst.msk [vmem:[%s712_s17 + $0x18] sm:$0xff] %vm150_vm0, %v655_v24 }
  0x15   : > { %582 = vmatpush3.bf16.msra.mxu1 %v616_v1  ;;  %v627_v12 = vld [vmem:[%s690_s13 + $0x70] sm:$0xff]   ;;  %v629_v14 = vld [vmem:[%s690_s13 + $0x78] sm:$0xff]   ;;  %155 = vst.msk [vmem:[%s712_s17 + $0x20] sm:$0xff] %vm150_vm0, %v655_v24  ;;  %156 = vst.msk [vmem:[%s712_s17 + $0x28] sm:$0xff] %vm150_vm0, %v655_v24 }
  0x16   : > { %312 = vxpose.xlu0.c.b16.cont [2/8] (narrow) %v617_v2, 64  ;;  %575 = vmatprep.subr.bf16.mxu1 %v617_v2  ;;  %v628_v13 = vld [vmem:[%s690_s13 + $0x30] sm:$0xff]   ;;  %v630_v15 = vld [vmem:[%s690_s13 + $0x38] sm:$0xff]   ;;  %157 = vst.msk [vmem:[%s712_s17 + $0x30] sm:$0xff] %vm150_vm0, %v655_v24  ;;  %158 = vst.msk [vmem:[%s712_s17 + $0x38] sm:$0xff] %vm150_vm0, %v655_v24 }
  0x17   : > { %296 = vxpose.xlu1.c.b16.cont [2/8] (narrow) %v618_v3, 64  ;;  %537 = vmatpush3.bf16.msra.mxu0 %v618_v3 }
  0x18   : > { %538 = vmatprep.subr.bf16.mxu0 %v619_v4  ;;  %v191_v26 = vld [vmem:[%s712_s17] sm:$0xff] }
  0x19   : > { %583 = vmatpush3.bf16.msra.mxu1 %v618_v3  ;;  %v192_v30 = vld [vmem:[%s712_s17 + $0x8] sm:$0xff] }
  0x1a   : > { %313 = vxpose.xlu0.c.b16.cont [3/8] (narrow) %v619_v4, 64  ;;  %576 = vmatprep.subr.bf16.mxu1 %v619_v4  ;;  %v193_v37 = vld [vmem:[%s712_s17 + $0x10] sm:$0xff] }
  0x1b   : > { %297 = vxpose.xlu1.c.b16.cont [3/8] (narrow) %v620_v5, 64  ;;  %539 = vmatpush3.bf16.msra.mxu0 %v620_v5  ;;  %v194_v45 = vld [vmem:[%s712_s17 + $0x18] sm:$0xff] }
  0x1c   : > { %540 = vmatprep.subr.bf16.mxu0 %v621_v6  ;;  %v195_v39 = vld [vmem:[%s712_s17 + $0x20] sm:$0xff]  ;;  %v196_v47 = vld [vmem:[%s712_s17 + $0x28] sm:$0xff] }
  0x1d   : > { %584 = vmatpush3.bf16.msra.mxu1 %v620_v5  ;;  %v197_v60 = vld [vmem:[%s712_s17 + $0x30] sm:$0xff]  ;;  %v198_v0 = vld [vmem:[%s712_s17 + $0x38] sm:$0xff] }
  0x1e   : > { %314 = vxpose.xlu0.c.b16.cont [4/8] (narrow) %v621_v6, 64  ;;  %577 = vmatprep.subr.bf16.mxu1 %v621_v6 }
  0x1f   : > { %298 = vxpose.xlu1.c.b16.cont [4/8] (narrow) %v622_v7, 64  ;;  %541 = vmatpush3.bf16.msra.mxu0 %v622_v7 }
  0x20   : > { %542 = vmatprep.subr.bf16.mxu0 %v623_v8 }
  0x21   : > { %585 = vmatpush3.bf16.msra.mxu1 %v622_v7 }
  0x22   : > { %315 = vxpose.xlu0.c.b16.cont [5/8] (narrow) %v623_v8, 64  ;;  %578 = vmatprep.subr.bf16.mxu1 %v623_v8 }
  0x23   : > { %299 = vxpose.xlu1.c.b16.cont [5/8] (narrow) %v624_v9, 64  ;;  %543 = vmatpush3.bf16.msra.mxu0 %v624_v9 }
  0x24   : > { %544 = vmatprep.subr.bf16.mxu0 %v625_v10 }
  0x25   : > { %586 = vmatpush3.bf16.msra.mxu1 %v624_v9 }
  0x26   : > { %316 = vxpose.xlu0.c.b16.cont [6/8] (narrow) %v625_v10, 64  ;;  %579 = vmatprep.subr.bf16.mxu1 %v625_v10 }
  0x27   : > { %300 = vxpose.xlu1.c.b16.cont [6/8] (narrow) %v626_v11, 64  ;;  %545 = vmatpush3.bf16.msra.mxu0 %v626_v11 }
  0x28   : > { %546 = vmatprep.subr.bf16.mxu0 %v627_v12 }
  0x29   : > { %587 = vmatpush3.bf16.msra.mxu1 %v626_v11 }
  0x2a   : > { %317 = vxpose.xlu0.c.b16.cont [7/8] (narrow) %v627_v12, 64  ;;  %580 = vmatprep.subr.bf16.mxu1 %v627_v12 }
  0x2b   : > { %301 = vxpose.xlu1.c.b16.cont [7/8] (narrow) %v628_v13, 64  ;;  %547 = vmatpush3.bf16.msra.mxu0 %v628_v13 }
  0x2c   : > { %548 = vmatprep.subr.bf16.mxu0 %v629_v14 }
  0x2d   : > { %588 = vmatpush3.bf16.msra.mxu1 %v628_v13 }
  0x2e   : > { %318 = vxpose.xlu0.c.b16.end [8/8] (narrow) %v629_v14, 64  ;;  %581 = vmatprep.subr.bf16.mxu1 %v629_v14 }
  0x2f   : > { %302 = vxpose.xlu1.c.b16.end [8/8] (narrow) %v630_v15, 64  ;;  %549 = vmatpush3.bf16.msra.mxu0 %v630_v15 }
  0x31   : > { %589 = vmatpush3.bf16.msra.mxu1 %v630_v15 }
  0x78   : > { %v319_v16 = vpop.trf.xlu0 }
  0x79   : > { %359 = vmatprep.mubr.bf16.mxu0 %v319_v16  ;;  %v303_v17 = vpop.trf.xlu1 }
  0x7a   : > { %360 = vmatmul.mubr.bf16.vlgmr.msra.gmra.mrb[0].mxu0 %v303_v17 }
  0x7c   : > { %v320_v18 = vpop.trf.xlu0 }
  0x7d   : > { %v304_v19 = vpop.trf.xlu1  ;;  %367 = vmatprep.mubr.bf16.mxu0 %v320_v18 }
  0x80   : > { %v321_v20 = vpop.trf.xlu0 }
  0x81   : > { %375 = vmatprep.mubr.bf16.mxu1 %v321_v20  ;;  %v305_v21 = vpop.trf.xlu1 }
  0x82   : > { %368 = vmatmul.mubr.bf16.gmra.mrb[4].mxu0 %v304_v19  ;;  %376 = vmatmul.mubr.bf16.vlgmr.msra.gmra.mrb[0].mxu1 %v305_v21 }
  0x84   : > { %v322_v22 = vpop.trf.xlu0 }
  0x85   : > { %383 = vmatprep.mubr.bf16.mxu1 %v322_v22  ;;  %v306_v23 = vpop.trf.xlu1 }
  0x8a   : > { %384 = vmatmul.mubr.bf16.gmra.mrb[4].mxu1 %v306_v23 }
 0x14d   : > { %v550_v25 = vpop.f32.mrb[0].mxu0 }
 0x14e   : > { %v551_v27 = vpop.f32.mrb[1].mxu0 }
 0x14f   : > { %v552_v28 = vadd.f32 %v551_v27, %v550_v25  ;;  %v553_v29 = vpop.f32.mrb[2].mxu0 }
 0x150   : > { %v554_v31 = vpop.f32.mrb[3].mxu0 }
 0x151   : > { %v392_v32 = vadd.f32 %v552_v28, %v191_v26  ;;  %v555_v33 = vadd.f32 %v554_v31, %v553_v29 }
 0x153   : > { %401 = vst.msk [vmem:[%s712_s17] sm:$0xff] %vm150_vm0, %v392_v32  ;;  %v393_v34 = vadd.f32 %v555_v33, %v192_v30 }
 0x155   : > { %402 = vst.msk [vmem:[%s712_s17 + $0x8] sm:$0xff] %vm150_vm0, %v393_v34  ;;  %v556_v35 = vpop.f32.mrb[4].mxu0  ;;  %v562_v36 = vpop.f32.mrb[0].mxu1 }
 0x156   : > { %v557_v38 = vpop.f32.mrb[5].mxu0  ;;  %v563_v40 = vpop.f32.mrb[1].mxu1 }
 0x157   : > { %v558_v41 = vadd.f32 %v557_v38, %v556_v35  ;;  %v564_v42 = vadd.f32 %v563_v40, %v562_v36  ;;  %v559_v43 = vpop.f32.mrb[6].mxu0  ;;  %v565_v44 = vpop.f32.mrb[2].mxu1 }
 0x158   : > { %v560_v46 = vpop.f32.mrb[7].mxu0  ;;  %v566_v48 = vpop.f32.mrb[3].mxu1 }
 0x159   : > { %v394_v49 = vadd.f32 %v558_v41, %v193_v37  ;;  %v396_v50 = vadd.f32 %v564_v42, %v195_v39  ;;  %v561_v51 = vadd.f32 %v560_v46, %v559_v43  ;;  %v567_v52 = vadd.f32 %v566_v48, %v565_v44 }
 0x15a   : > { %v412_v53 = vld [vmem:[%s712_s17] sm:$0xff] }
 0x15b   : > { %v420_v54 = vmul.f32 6.1035156e-05, %v412_v53  ;;  %403 = vst.msk [vmem:[%s712_s17 + $0x10] sm:$0xff] %vm150_vm0, %v394_v49  ;;  %405 = vst.msk [vmem:[%s712_s17 + $0x20] sm:$0xff] %vm150_vm0, %v396_v50  ;;  %v395_v55 = vadd.f32 %v561_v51, %v194_v45  ;;  %v397_v56 = vadd.f32 %v567_v52, %v196_v47 }
 0x15c   : > { %v413_v57 = vld [vmem:[%s712_s17 + $0x8] sm:$0xff] }
 0x15d   : > { %428 = vst.msk [vmem:[%s712_s17] sm:$0xff] %vm150_vm0, %v420_v54  ;;  %v421_v58 = vmul.f32 6.1035156e-05, %v413_v57  ;;  %404 = vst.msk [vmem:[%s712_s17 + $0x18] sm:$0xff] %vm150_vm0, %v395_v55  ;;  %v568_v59 = vpop.f32.mrb[4].mxu1 }
 0x15e   : > { %406 = vst.msk [vmem:[%s712_s17 + $0x28] sm:$0xff] %vm150_vm0, %v397_v56  ;;  %v569_v61 = vpop.f32.mrb[5].mxu1 }
 0x15f   : > { %429 = vst.msk [vmem:[%s712_s17 + $0x8] sm:$0xff] %vm150_vm0, %v421_v58  ;;  %v570_v62 = vadd.f32 %v569_v61, %v568_v59  ;;  %v571_v63 = vpop.f32.mrb[6].mxu1 }
 0x160   : > { %v572_v1 = vpop.f32.mrb[7].mxu1 }
 0x161   : > { %v398_v2 = vadd.f32 %v570_v62, %v197_v60  ;;  %v573_v3 = vadd.f32 %v572_v1, %v571_v63 }
 0x162   : > { %v414_v4 = vld [vmem:[%s712_s17 + $0x10] sm:$0xff]  ;;  %v416_v5 = vld [vmem:[%s712_s17 + $0x20] sm:$0xff] }
 0x163   : > { %v422_v6 = vmul.f32 6.1035156e-05, %v414_v4  ;;  %v424_v7 = vmul.f32 6.1035156e-05, %v416_v5  ;;  %407 = vst.msk [vmem:[%s712_s17 + $0x30] sm:$0xff] %vm150_vm0, %v398_v2  ;;  %v399_v8 = vadd.f32 %v573_v3, %v198_v0 }
 0x164   : > { %v415_v9 = vld [vmem:[%s712_s17 + $0x18] sm:$0xff] }
 0x165   : > { %v417_v10 = vld [vmem:[%s712_s17 + $0x28] sm:$0xff]  ;;  %430 = vst.msk [vmem:[%s712_s17 + $0x10] sm:$0xff] %vm150_vm0, %v422_v6  ;;  %432 = vst.msk [vmem:[%s712_s17 + $0x20] sm:$0xff] %vm150_vm0, %v424_v7  ;;  %v423_v11 = vmul.f32 6.1035156e-05, %v415_v9 }
 0x166   : > { %v425_v12 = vmul.f32 6.1035156e-05, %v417_v10  ;;  %408 = vst.msk [vmem:[%s712_s17 + $0x38] sm:$0xff] %vm150_vm0, %v399_v8 }
 0x167   : > { %431 = vst.msk [vmem:[%s712_s17 + $0x18] sm:$0xff] %vm150_vm0, %v423_v11 }
 0x168   : > { %433 = vst.msk [vmem:[%s712_s17 + $0x28] sm:$0xff] %vm150_vm0, %v425_v12 }
 0x16a   : > { %v418_v13 = vld [vmem:[%s712_s17 + $0x30] sm:$0xff] }
 0x16b   : > { %v426_v14 = vmul.f32 6.1035156e-05, %v418_v13 }
 0x16d   : > { %v419_v15 = vld [vmem:[%s712_s17 + $0x38] sm:$0xff]  ;;  %434 = vst.msk [vmem:[%s712_s17 + $0x30] sm:$0xff] %vm150_vm0, %v426_v14 }
 0x16e   : > { %v427_v16 = vmul.f32 6.1035156e-05, %v419_v15 }
 0x170   : > { %435 = vst.msk [vmem:[%s712_s17 + $0x38] sm:$0xff] %vm150_vm0, %v427_v16 }
 0x171 PF: > { %s11_s8 = sadd.s32 1, %s653_s8   ;;  %s789_s6 = smov %s649_s7 }
 0x172   : > { %p8_p5 = scmp.ge.s32.totalorder %s11_s8, 6   ;;  %s790_s7 = smov %s792_s9 }
 0x174   :  { %10 = sbr.rel (!%p8_p5) target bundleno = 2 (0x2), region = 62 }

// kernel: _lambda_.10
= control target key start
LH: loop header
LB: loop body
LE: loop exit
PB: predicated region body
PF: predicated region fallthrough
CT: control target
= control target key end

     0   :  { %s2661_s15 = smov 0   ;;  %s2663_s16 = smov 0   ;;  %s3386_s0 = inlined_call_operand.vmem [shape: bf16[8,10,18,64], index: 0, kind: input, shape index: {}]   ;;  %s3387_s1 = inlined_call_operand.vmem [shape: bf16[576,64], index: 1, kind: input, shape index: {}]   ;;  %s3388_s2 = inlined_call_operand.vmem [shape: f32[1,64], index: 2, kind: input, shape index: {}]   ;;  %s3389_s3 = inlined_call_operand.vmem [shape: bf16[4,16,16,64], index: 3, kind: output, shape index: {0}]   ;;  %s3390_s4 = inlined_call_operand.vmem [shape: bf16[4,8,8,64], index: 4, kind: output, shape index: {1}]  }
   0x1   :  { %s2665_s17 = smov 0   ;;  %s2667_s18 = smov 0  }
   0x2   :  { %s2669_s19 = smov 0  }
   0x3 LB: > { %s24_s20 = sadd.s32 1, %s2624_s17  ;;  %s27_s21 = sadd.s32 1, %s2628_s18  ;;  %s2632_s19 = sphi %s2669_s19, %s15_s19   ;;  %s2628_s18 = sphi %s2667_s18, %s3395_s18   ;;  %s2624_s17 = sphi %s2665_s17, %s3394_s17   ;;  %s2620_s16 = sphi %s2663_s16, %s3393_s16   ;;  %s2616_s15 = sphi %s2661_s15, %s3392_s15  }
   0x4   : > { %p25_p0 = scmp.ge.s32.totalorder %s24_s20, 2  ;;  %p2150_p1 = scmp.ge.s32.totalorder %s2632_s19, 1 }
   0x5   : > { %p189_p2 = scmp.lt.s32.totalorder %s2632_s19, 9 }
   0x6   : > { %s3397_s20 = smov (%p25_p0, %s24_s20), 0  ;;  %s3399_s21 = smov (!%p25_p0, %s27_s21), %s2628_s18 }
   0x7   : > { %p190_p3 = pnand %p2150_p1, %p189_p2  ;;  %p29_p4 = scmp.ge.s32.totalorder %s3399_s21, 4 }
   0x8   : > { %s2151_s22 = sshll.u32 (!%p190_p3), %s2620_s16, 1  ;;  %v2558_v0 = vld [vmem:[%s3387_s1 + $0xc0] sm:$0xff] (!%p190_p3)   ;;  %v2562_v4 = vld [vmem:[%s3387_s1 + $0xc8] sm:$0xff] (!%p190_p3)   ;;  %vm356_vm0 = vsmask.f32 (!%p190_p3), 7424  ;;  %vm469_vm1 = vcmask (!%p190_p3), 1046528  }
   0x9   : > { %s3401_s21 = smov (%p29_p4, %s3399_s21), 0  ;;  %193 = sbr.rel (%p190_p3) target bundleno = 543 (0x21f), region = 32 }
   0xa   : > { %s232_s25 = sadd.s32 (!%p190_p3), %s2616_s15, %s2151_s22  ;;  %2387 = vmatprep.subr.bf16.mxu1 (!%p190_p3), %v2558_v0  ;;  %v2559_v1 = vld [vmem:[%s3387_s1 + $0x80] sm:$0xff] (!%p190_p3)   ;;  %v2563_v5 = vld [vmem:[%s3387_s1 + $0x88] sm:$0xff] (!%p190_p3)   ;;  %vm576_vm2 = vcmask (!%p190_p3), 523264   ;;  %s2153_s30 = sshll.u32 (!%p190_p3), %s2616_s15, 3  ;;  %vm1355_vm3 = vcmask (!%p190_p3), 519168   ;;  %vm1572_vm4 = vcmask (!%p190_p3), 517120  }
   0xb   : > { %p233_p5 = scmp.lt.s32.totalorder (!%p190_p3), %s232_s25, 7  ;;  %v2560_v2 = vld [vmem:[%s3387_s1 + $0x40] sm:$0xff] (!%p190_p3)   ;;  %2388 = vmatpush3.bf16.msra.mxu1 (!%p190_p3), %v2559_v1  ;;  %v2564_v6 = vld [vmem:[%s3387_s1 + $0x48] sm:$0xff] (!%p190_p3)   ;;  %p241_p6 = scmp.lt.s32.totalorder (!%p190_p3), %s2620_s16, 3  ;;  %vm1957_vm5 = vcmask (!%p190_p3), 1041409   ;;  %vm1959_vm6 = vcmask (!%p190_p3), 1042434  }
   0xc   : > { %v2561_v3 = vld [vmem:[%s3387_s1] sm:$0xff] (!%p190_p3)   ;;  %2323 = vmatprep.subr.bf16.mxu0 (!%p190_p3), %v2560_v2  ;;  %2389 = vmatprep.subr.bf16.mxu1 (!%p190_p3), %v2562_v4  ;;  %v2565_v7 = vld [vmem:[%s3387_s1 + $0x8] sm:$0xff] (!%p190_p3)   ;;  %p243_p7 = scmp.lt.s32.totalorder (!%p190_p3), %s2153_s30, 15  ;;  %vm1961_vm7 = vcmask (!%p190_p3), 1043459   ;;  %s2157_s12 = sshll.u32 (!%p190_p3), %s2616_s15, 2  ;;  %vm1963_vm8 = vcmask (!%p190_p3), 1044484  }
   0xd   : > { %2324 = vmatpush3.bf16.msra.mxu0 (!%p190_p3), %v2561_v3  ;;  %p3250_p8 = scmp.lt.s32.totalorder (!%p190_p3), %s2157_s12, 7  ;;  %vm1965_vm9 = vcmask (!%p190_p3), 1045509   ;;  %vm1967_vm10 = vcmask (!%p190_p3), 1046534   ;;  %vm1969_vm11 = vcmask (!%p190_p3), 1047559  }
   0xe   : > { %2325 = vmatprep.subr.bf16.mxu0 (!%p190_p3), %v2564_v6 }
   0xf   : > { %2390 = vmatpush3.bf16.msra.mxu1 (!%p190_p3), %v2563_v5 }
  0x10   : > { %s3403_s25 = smov (!%p233_p5, %s232_s25), 7  ;;  %s3405_s16 = smov (!%p241_p6, %s2620_s16), 3 }
  0x11   : > { %s2495_s8 = smul.u32 120, %s3403_s25  ;;  %2326 = vmatpush3.bf16.msra.mxu0 %v2565_v7  ;;  %s2634_s25 = smov 64  }
  0x12   : > { %s3407_s30 = smov (!%p243_p7, %s2153_s30), 15  ;;  %s2155_s6 = sshll.u32 %s3405_s16, 5 }
  0x13   : > { %s2721_s22 = scalar_lea.vmem %s3386_s0, %s2495_s8  ;;  %s2154_s5 = sshll.u32 %s3407_s30, 1 }
  0x14   : > { %v2727_v8 = vld [vmem:[%s2721_s22 + $0xc] sm:$0xff]   ;;  %v2539_v9 = vld [vmem:[%s2721_s22 + $0x14] ss:$0 sps:$4 sm:$0x11]   ;;  %v2731_v10 = vld [vmem:[%s2721_s22 + $0x18] sm:$0xff]   ;;  %s247_s7 = sadd.s32 %s2155_s6, %s2154_s5  ;;  %s3409_s12 = smov (!%p3250_p8, %s2157_s12), 7 }
  0x15   : > { %v473_v11 = vrot.slane %v2727_v8, 1  ;;  %v474_v12 = vrot.slane %v2539_v9, 1  ;;  %v2541_v13 = vld [vmem:[%s2721_s22 + $0x20] ss:$0 sps:$4 sm:$0x11]   ;;  %v382_v15 = vshrl.u32 %v2731_v10, 16 }
  0x16   : > { %v2736_v14 = vld [vmem:[%s2721_s22] sm:$0xff]   ;;  %v384_v16 = vshll.u32 %v2731_v10, 16  ;;  %v389_v18 = vshll.u32 %v2541_v13, 16  ;;  %v2744_v19 = vld [vmem:[%s2721_s22 + $0x8] ss:$0 sps:$4 sm:$0x11]  }
  0x17   : > { %v2741_v17 = vsel %vm469_vm1, %v473_v11, %v474_v12  ;;  %v358_v21 = vshrl.u32 %v2736_v14, 16  ;;  %v360_v22 = vshll.u32 %v2736_v14, 16  ;;  %v2751_v23 = vld [vmem:[%s2721_s22 + $0x24] sm:$0xff]   ;;  %v365_v25 = vshll.u32 %v2744_v19, 16  ;;  %v2767_v38 = vld [vmem:[%s2721_s22 + $0x30] sm:$0xff]   ;;  %v2778_v48 = vld [vmem:[%s2721_s22 + $0x3c] sm:$0xff]  }
  0x18   : > { %533 = vrot.lane.b32.xlu1 %v2741_v17, %s2634_s25  ;;  %v386_v20 = vrot.slane %v384_v16, 1  ;;  %v391_v24 = vrot.slane %v389_v18, 1  ;;  %v2755_v28 = vld [vmem:[%s2721_s22 + $0x2c] ss:$0 sps:$4 sm:$0x11]   ;;  %v394_v29 = vshrl.u32 %v2751_v23, 16 }
  0x19   : > { %v362_v27 = vrot.slane %v360_v22, 1  ;;  %v396_v30 = vshll.u32 %v2751_v23, 16  ;;  %v367_v31 = vrot.slane %v365_v25, 1  ;;  %v401_v35 = vshll.u32 %v2755_v28, 16  ;;  %v2801_v61 = vld [vmem:[%s2721_s22 + $0x48] sm:$0xff]   ;;  %v2809_v3 = vld [vmem:[%s2721_s22 + $0x54] sm:$0xff]  }
  0x1a   : > { %v387_v26 = vor.u32 %v386_v20, %v382_v15  ;;  %v372_v36 = vshll.u32 %v2727_v8, 16  ;;  %v377_v37 = vshll.u32 %v2539_v9, 16  ;;  %v2770_v39 = vld [vmem:[%s2721_s22 + $0x38] ss:$0 sps:$4 sm:$0x11]   ;;  %v370_v43 = vshrl.u32 %v2727_v8, 16 }
  0x1b   : > { %v363_v33 = vor.u32 %v362_v27, %v358_v21  ;;  %v398_v34 = vrot.slane %v396_v30, 1  ;;  %v403_v42 = vrot.slane %v401_v35, 1  ;;  %v408_v45 = vshll.u32 %v2767_v38, 16  ;;  %v2781_v49 = vld [vmem:[%s2721_s22 + $0x44] ss:$0 sps:$4 sm:$0x11]  }
  0x1c   : > { %v2760_v32 = vsel %vm356_vm0, %v387_v26, %v391_v24  ;;  %v374_v44 = vrot.slane %v372_v36, 1  ;;  %v476_v46 = vrot.slane %v2731_v10, 1  ;;  %v477_v47 = vrot.slane %v2541_v13, 1  ;;  %v2816_v6 = vld [vmem:[%s2721_s22 + $0x50] ss:$0 sps:$4 sm:$0x11]  }
  0x1d   : > { %457 = vrot.lane.b32.xlu0 %v2760_v32, %s2634_s25  ;;  %v368_v40 = vsel %vm356_vm0, %v363_v33, %v367_v31  ;;  %v399_v41 = vor.u32 %v398_v34, %v394_v29  ;;  %v379_v51 = vrot.slane %v377_v37, 1  ;;  %v406_v52 = vshrl.u32 %v2767_v38, 16  ;;  %v2823_v11 = vld [vmem:[%s2721_s22 + $0x5c] ss:$0 sps:$4 sm:$0x11]   ;;  %v2566_v12 = vld [vmem:[%s3387_s1 + $0xd0] sm:$0xff]  }
  0x1e   : > { %453 = vrot.lane.b32.xlu1 %v368_v40, %s2634_s25  ;;  %v375_v53 = vor.u32 %v374_v44, %v370_v43  ;;  %v410_v54 = vrot.slane %v408_v45, 1  ;;  %v413_v55 = vshll.u32 %v2770_v39, 16  ;;  %v420_v56 = vshll.u32 %v2778_v48, 16  ;;  %2391 = vmatprep.subr.bf16.mxu1 %v2566_v12  ;;  %v2567_v29 = vld [vmem:[%s3387_s1 + $0x90] sm:$0xff]   ;;  %v2572_v44 = vld [vmem:[%s3387_s1 + $0x58] sm:$0xff]   ;;  %s2156_s8 = sshll.u32 %s247_s7, 2 }
  0x1f   : > { %v2786_v50 = vsel %vm356_vm0, %v399_v41, %v403_v42  ;;  %v2794_v57 = vsel %vm469_vm1, %v476_v46, %v477_v47  ;;  %v418_v58 = vshrl.u32 %v2778_v48, 16  ;;  %v425_v60 = vshll.u32 %v2781_v49, 16  ;;  %v2568_v31 = vld [vmem:[%s3387_s1 + $0x50] sm:$0xff]   ;;  %2392 = vmatpush3.bf16.msra.mxu1 %v2567_v29  ;;  %v2867_v37 = vld [vmem:[%s2721_s22 + $0x68] ss:$0 sps:$4 sm:$0x11]   ;;  %s3141_s11 = scalar_lea.vmem %s3389_s3, %s2156_s8 }
  0x20   : > { %v422_v59 = vrot.slane %v420_v56, 1  ;;  %v2804_v62 = vsel %vm356_vm0, %v375_v53, %v379_v51  ;;  %v411_v63 = vor.u32 %v410_v54, %v406_v52  ;;  %v415_v0 = vrot.slane %v413_v55, 1  ;;  %v2569_v35 = vld [vmem:[%s3387_s1 + $0x10] sm:$0xff]   ;;  %2327 = vmatprep.subr.bf16.mxu0 %v2568_v31  ;;  %v2571_v42 = vld [vmem:[%s3387_s1 + $0x98] sm:$0xff]   ;;  %v2574_v51 = vld [vmem:[%s3387_s1 + $0xe0] sm:$0xff]   ;;  %s2158_s14 = sshll.u32 %s3405_s16, 3 }
  0x21   : > { %499 = vrot.lane.b32.xlu0 %v2727_v8, %s2634_s25  ;;  %v427_v2 = vrot.slane %v425_v60, 1  ;;  %v479_v4 = vrot.slane %v2751_v23, 1  ;;  %v480_v5 = vrot.slane %v2755_v28, 1  ;;  %v432_v7 = vshll.u32 %v2801_v61, 16  ;;  %v2847_v28 = vld [vmem:[%s2721_s22 + $0x60] sm:$0xff]   ;;  %2328 = vmatpush3.bf16.msra.mxu0 %v2569_v35  ;;  %v2573_v47 = vld [vmem:[%s3387_s1 + $0x18] sm:$0xff]   ;;  %s257_s15 = sadd.s32 %s2158_s14, %s3409_s12 }
  0x22   : > { %501 = vrot.lane.b32.xlu1 %v2731_v10, %s2634_s25  ;;  %v423_v1 = vor.u32 %v422_v59, %v418_v58  ;;  %v2820_v9 = vsel %vm356_vm0, %v411_v63, %v415_v0  ;;  %v482_v13 = vrot.slane %v2767_v38, 1  ;;  %v483_v15 = vrot.slane %v2770_v39, 1  ;;  %v2570_v39 = vld [vmem:[%s3387_s1 + $0xd8] sm:$0xff]   ;;  %2329 = vmatprep.subr.bf16.mxu0 %v2572_v44  ;;  %v2575_v54 = vld [vmem:[%s3387_s1 + $0xa0] sm:$0xff]   ;;  %v2902_v56 = vld [vmem:[%s2721_s22 + $0x6c] sm:$0xff]   ;;  %s2159_s16 = sshll.u32 %s257_s15, 2 }
  0x23   : > { %v430_v18 = vshrl.u32 %v2801_v61, 16  ;;  %v485_v20 = vrot.slane %v2778_v48, 1  ;;  %v444_v21 = vshll.u32 %v2809_v3, 16  ;;  %v437_v22 = vshll.u32 %v2816_v6, 16  ;;  %2393 = vmatprep.subr.bf16.mxu1 %v2570_v39  ;;  %v2576_v58 = vld [vmem:[%s3387_s1 + $0x60] sm:$0xff]   ;;  %v2578_v0 = vld [vmem:[%s3387_s1 + $0xe8] sm:$0xff]  }
  0x24   : > { %v2833_v16 = vsel %vm356_vm0, %v423_v1, %v427_v2  ;;  %v486_v24 = vrot.slane %v2781_v49, 1  ;;  %v2843_v25 = vsel %vm469_vm1, %v479_v4, %v480_v5  ;;  %v434_v26 = vrot.slane %v432_v7, 1  ;;  %2394 = vmatpush3.bf16.msra.mxu1 %v2571_v42  ;;  %v2577_v63 = vld [vmem:[%s3387_s1 + $0x20] sm:$0xff]   ;;  %v2579_v2 = vld [vmem:[%s3387_s1 + $0xa8] sm:$0xff]   ;;  %v2585_v29 = vld [vmem:[%s3387_s1 + $0x30] sm:$0xff]  }
  0x25   : > { %459 = vrot.lane.b32.xlu0 %v2786_v50, %s2634_s25  ;;  %v442_v27 = vshrl.u32 %v2809_v3, 16  ;;  %v449_v30 = vshll.u32 %v2823_v11, 16  ;;  %v2859_v33 = vsel %vm469_vm1, %v482_v13, %v483_v15  ;;  %v446_v34 = vrot.slane %v444_v21, 1  ;;  %2330 = vmatpush3.bf16.msra.mxu0 %v2573_v47  ;;  %v2580_v4 = vld [vmem:[%s3387_s1 + $0x68] sm:$0xff]   ;;  %v2583_v21 = vld [vmem:[%s3387_s1 + $0xb0] sm:$0xff]  }
  0x26   : > { %535 = vrot.lane.b32.xlu1 %v2794_v57, %s2634_s25  ;;  %v439_v36 = vrot.slane %v437_v22, 1  ;;  %v435_v40 = vor.u32 %v434_v26, %v430_v18  ;;  %v488_v41 = vrot.slane %v2801_v61, 1  ;;  %v521_v46 = vshll.u32 %v2847_v28, 16  ;;  %2395 = vmatprep.subr.bf16.mxu1 %v2574_v51  ;;  %v2933_v12 = vld [vmem:[%s2721_s22 + $0x74] ss:$0 sps:$4 sm:$0x11]  }
  0x27   : > { %v451_v43 = vrot.slane %v449_v30, 1  ;;  %v447_v45 = vor.u32 %v446_v34, %v442_v27  ;;  %v489_v49 = vrot.slane %v2816_v6, 1  ;;  %v519_v53 = vshrl.u32 %v2847_v28, 16  ;;  %2331 = vmatprep.subr.bf16.mxu0 %v2576_v58  ;;  %v2581_v13 = vld [vmem:[%s3387_s1 + $0x28] sm:$0xff]   ;;  %v2582_v18 = vld [vmem:[%s3387_s1 + $0xf0] sm:$0xff]   ;;  %v2587_v34 = vld [vmem:[%s3387_s1 + $0xb8] sm:$0xff]  }
  0x28   : > { %v2892_v52 = vsel %vm356_vm0, %v435_v40, %v439_v36  ;;  %v526_v55 = vshll.u32 %v2867_v37, 16  ;;  %v523_v60 = vrot.slane %v521_v46, 1  ;;  %2396 = vmatpush3.bf16.msra.mxu1 %v2575_v54  ;;  %v2919_v1 = vsel %vm469_vm1, %v485_v20, %v486_v24  ;;  %v2584_v24 = vld [vmem:[%s3387_s1 + $0x70] sm:$0xff]   ;;  %v2588_v36 = vld [vmem:[%s3387_s1 + $0x78] sm:$0xff]  }
  0x29   : > { %455 = vrot.lane.b32.xlu0 %v2804_v62, %s2634_s25  ;;  %v2908_v59 = vsel %vm356_vm0, %v447_v45, %v451_v43  ;;  %2332 = vmatpush3.bf16.msra.mxu0 %v2577_v63  ;;  %v2930_v5 = vsel %vm469_vm1, %v488_v41, %v489_v49  ;;  %v560_v15 = vshll.u32 %v2902_v56, 16  ;;  %v491_v20 = vrot.slane %v2809_v3, 1  ;;  %v2589_v40 = vld [vmem:[%s3387_s1 + $0x38] sm:$0xff]   ;;  %v2590_v41 = vld [vmem:[%s3387_s1 + $0x100] sm:$0xff]  }
  0x2a   : > { %503 = vrot.lane.b32.xlu1 %v2751_v23, %s2634_s25  ;;  %2397 = vmatprep.subr.bf16.mxu1 %v2578_v0  ;;  %v524_v6 = vor.u32 %v523_v60, %v519_v53  ;;  %v528_v7 = vrot.slane %v526_v55, 1  ;;  %v492_v22 = vrot.slane %v2823_v11, 1  ;;  %v558_v27 = vshrl.u32 %v2902_v56, 16  ;;  %v2586_v11 = vld [vmem:[%s3387_s1 + $0xf8] sm:$0xff]   ;;  %v2591_v55 = vld [vmem:[%s3387_s1 + $0x108] sm:$0xff]  }
  0x2b   : > { %2333 = vmatprep.subr.bf16.mxu0 %v2580_v4  ;;  %v562_v30 = vrot.slane %v560_v15, 1  ;;  %v565_v31 = vshll.u32 %v2933_v12, 16  ;;  %v530_v35 = vrot.slane %v2847_v28, 1  ;;  %v531_v39 = vrot.slane %v2867_v37, 1 }
  0x2c   : > { %2398 = vmatpush3.bf16.msra.mxu1 %v2579_v2  ;;  %v2955_v26 = vsel %vm356_vm0, %v524_v6, %v528_v7  ;;  %v2986_v42 = vsel %vm469_vm1, %v491_v20, %v492_v22  ;;  %v470_v47 = vrot.slane %v2736_v14, 1  ;;  %v471_v49 = vrot.slane %v2744_v19, 1  ;;  %v2593_v7 = vld [vmem:[%s3387_s1 + $0x118] sm:$0xff]  }
  0x2d   : > { %461 = vrot.lane.b32.xlu0 %v2820_v9, %s2634_s25  ;;  %2334 = vmatpush3.bf16.msra.mxu0 %v2581_v13  ;;  %v563_v43 = vor.u32 %v562_v30, %v558_v27  ;;  %v567_v44 = vrot.slane %v565_v31, 1  ;;  %v2991_v37 = vsel %vm469_vm1, %v530_v35, %v531_v39 }
  0x2e   : > { %463 = vrot.lane.b32.xlu1 %v2833_v16, %s2634_s25  ;;  %2399 = vmatprep.subr.bf16.mxu1 %v2582_v18  ;;  %v472_v60 = vsel %vm469_vm1, %v470_v47, %v471_v49 }
  0x2f   : > { %2335 = vmatprep.subr.bf16.mxu0 %v2584_v24  ;;  %v568_v45 = vsel %vm356_vm0, %v563_v43, %v567_v44 }
  0x30   : > { %2400 = vmatpush3.bf16.msra.mxu1 %v2583_v21 }
  0x31   : > { %537 = vrot.lane.b32.xlu0 %v2843_v25, %s2634_s25  ;;  %2336 = vmatpush3.bf16.msra.mxu0 %v2585_v29 }
  0x32   : > { %539 = vrot.lane.b32.xlu1 %v2859_v33, %s2634_s25  ;;  %2401 = vmatprep.subr.bf16.mxu1 %v2586_v11 }
  0x33   : > { %2337 = vmatprep.subr.bf16.mxu0 %v2588_v36 }
  0x34   : > { %2402 = vmatpush3.bf16.msra.mxu1 %v2587_v34 }
  0x35   : > { %505 = vrot.lane.b32.xlu0 %v2767_v38, %s2634_s25  ;;  %2338 = vmatpush3.bf16.msra.mxu0 %v2589_v40 }
  0x36   : > { %507 = vrot.lane.b32.xlu1 %v2778_v48, %s2634_s25  ;;  %2463 = vmatprep.subr.bf16.mxu0 %v2590_v41 }
  0x37   : > { %2487 = vmatprep.subr.bf16.mxu1 %v2590_v41 }
  0x39   : > { %465 = vrot.lane.b32.xlu0 %v2892_v52, %s2634_s25 }
  0x3a   : > { %467 = vrot.lane.b32.xlu1 %v2908_v59, %s2634_s25 }
  0x3d   : > { %541 = vrot.lane.b32.xlu0 %v2919_v1, %s2634_s25 }
  0x3e   : > { %543 = vrot.lane.b32.xlu1 %v2930_v5, %s2634_s25 }
  0x41   : > { %509 = vrot.lane.b32.xlu0 %v2801_v61, %s2634_s25 }
  0x42   : > { %569 = vrot.lane.b32.xlu1 %v2955_v26, %s2634_s25 }
  0x45   : > { %511 = vrot.lane.b32.xlu0 %v2809_v3, %s2634_s25 }
  0x46   : > { %513 = vrot.lane.b32.xlu1 %v2847_v28, %s2634_s25 }
  0x49   : > { %545 = vrot.lane.b32.xlu0 %v2986_v42, %s2634_s25 }
  0x4a   : > { %547 = vrot.lane.b32.xlu1 %v2991_v37, %s2634_s25 }
  0x4d   : > { %571 = vrot.lane.b32.xlu0 %v568_v45, %s2634_s25  ;;  %s3274_s25 = scalar_lea.vmem %s3390_s4, %s2159_s16 }
  0x8a   : > { %v534_v46 = vpop.permute.xlu1 %533 }
  0x8b   : > { %v635_v53 = vsel %vm576_vm2, %v2804_v62, %v534_v46 }
  0x8f   : > { %v458_v51 = vpop.permute.xlu0 %457 }
  0x90   : > { %v584_v54 = vsel %vm576_vm2, %v2731_v10, %v458_v51  ;;  %v454_v58 = vpop.permute.xlu1 %453  ;;  %v2592_v10 = vld [vmem:[%s3387_s1 + $0x110] sm:$0xff]  }
  0x91   : > { %1113 = vmatprep.mubr.bf16.mxu1 %v584_v54  ;;  %v578_v19 = vsel %vm576_vm2, %v2736_v14, %v454_v58 }
  0x92   : > { %1114 = vmatmul.mubr.bf16.vlgmr.msra.gmra.mrb[0].mxu1 %v635_v53 }
  0x93   : > { %v500_v63 = vpop.permute.xlu0 %499  ;;  %2491 = vmatpush3.bf16.msra.mxu1 %v2590_v41 }
  0x94   : > { %v603_v0 = vsel %vm576_vm2, %v472_v60, %v500_v63  ;;  %2488 = vmatprep.subr.bf16.mxu1 %v2591_v55  ;;  %v502_v62 = vpop.permute.xlu1 %501 }
  0x95   : > { %1016 = vmatprep.mubr.bf16.mxu0 %v603_v0  ;;  %v607_v2 = vsel %vm576_vm2, %v2741_v17, %v502_v62 }
  0x96   : > { %1017 = vmatmul.mubr.bf16.vlgmr.msra.gmra.mrb[0].mxu0 %v578_v19 }
  0x97   : > { %2464 = vmatpush3.bf16.msra.mxu0 %v2590_v41  ;;  %v460_v4 = vpop.permute.xlu0 %459  ;;  %1024 = vmatprep.mubr.bf16.mxu0 %v607_v2 }
  0x98   : > { %v587_v14 = vsel %vm576_vm2, %v2751_v23, %v460_v4  ;;  %2465 = vmatprep.subr.bf16.mxu0 %v2591_v55  ;;  %2492 = vmatpush3.bf16.msra.mxu1 %v2591_v55  ;;  %v536_v6 = vpop.permute.xlu1 %535 }
  0x99   : > { %1121 = vmatprep.mubr.bf16.mxu1 %v587_v14  ;;  %2489 = vmatprep.subr.bf16.mxu1 %v2592_v10  ;;  %v639_v13 = vsel %vm576_vm2, %v2760_v32, %v536_v6 }
  0x9a   : > { %1122 = vmatmul.mubr.bf16.gmra.mrb[4].mxu1 %v639_v13 }
  0x9b   : > { %v456_v15 = vpop.permute.xlu0 %455  ;;  %2466 = vmatpush3.bf16.msra.mxu0 %v2591_v55 }
  0x9c   : > { %v581_v17 = vsel %vm576_vm2, %v2727_v8, %v456_v15  ;;  %2467 = vmatprep.subr.bf16.mxu0 %v2592_v10  ;;  %2493 = vmatpush3.bf16.msra.mxu1 %v2592_v10  ;;  %v504_v23 = vpop.permute.xlu1 %503 }
  0x9d   : > { %2490 = vmatprep.subr.bf16.mxu1 %v2593_v7  ;;  %v611_v18 = vsel %vm576_vm2, %v2794_v57, %v504_v23 }
  0x9e   : > { %1025 = vmatmul.mubr.bf16.gmra.mrb[4].mxu0 %v581_v17 }
  0x9f   : > { %v462_v20 = vpop.permute.xlu0 %461  ;;  %1032 = vmatprep.mubr.bf16.mxu0 %v611_v18  ;;  %2468 = vmatpush3.bf16.msra.mxu0 %v2592_v10 }
  0xa0   : > { %v590_v32 = vsel %vm576_vm2, %v2767_v38, %v462_v20  ;;  %2469 = vmatprep.subr.bf16.mxu0 %v2593_v7  ;;  %2494 = vmatpush3.bf16.msra.mxu1 %v2593_v7  ;;  %v464_v21 = vpop.permute.xlu1 %463 }
  0xa1   : > { %1129 = vmatprep.mubr.bf16.mxu1 %v590_v32  ;;  %v593_v8 = vsel %vm576_vm2, %v2778_v48, %v464_v21 }
  0xa3   : > { %v538_v22 = vpop.permute.xlu0 %537  ;;  %2470 = vmatpush3.bf16.msra.mxu0 %v2593_v7 }
  0xa4   : > { %v643_v24 = vsel %vm576_vm2, %v2786_v50, %v538_v22  ;;  %v540_v27 = vpop.permute.xlu1 %539 }
  0xa5   : > { %1130 = vmatmul.mubr.bf16.gmra.mrb[8].mxu1 %v643_v24  ;;  %v647_v11 = vsel %vm576_vm2, %v2820_v9, %v540_v27 }
  0xa6   : > { %1033 = vmatmul.mubr.bf16.gmra.mrb[8].mxu0 %v584_v54  ;;  %1137 = vmatprep.mubr.bf16.mxu1 %v593_v8 }
  0xa7   : > { %v506_v29 = vpop.permute.xlu0 %505 }
  0xa8   : > { %v615_v38 = vsel %vm576_vm2, %v2843_v25, %v506_v29  ;;  %v508_v30 = vpop.permute.xlu1 %507 }
  0xa9   : > { %1040 = vmatprep.mubr.bf16.mxu0 %v615_v38  ;;  %v619_v50 = vsel %vm576_vm2, %v2859_v33, %v508_v30 }
  0xab   : > { %v466_v31 = vpop.permute.xlu0 %465 }
  0xac   : > { %v596_v48 = vsel %vm576_vm2, %v2801_v61, %v466_v31  ;;  %v468_v34 = vpop.permute.xlu1 %467 }
  0xad   : > { %1138 = vmatmul.mubr.bf16.gmra.mrb[12].mxu1 %v647_v11  ;;  %v599_v39 = vsel %vm576_vm2, %v2809_v3, %v468_v34 }
  0xae   : > { %1041 = vmatmul.mubr.bf16.gmra.mrb[12].mxu0 %v587_v14  ;;  %1145 = vmatprep.mubr.bf16.mxu1 %v596_v48 }
  0xaf   : > { %v542_v35 = vpop.permute.xlu0 %541  ;;  %1048 = vmatprep.mubr.bf16.mxu0 %v619_v50 }
  0xb0   : > { %v651_v36 = vsel %vm576_vm2, %v2833_v16, %v542_v35  ;;  %v544_v40 = vpop.permute.xlu1 %543 }
  0xb1   : > { %v655_v44 = vsel %vm576_vm2, %v2892_v52, %v544_v40 }
  0xb3   : > { %v510_v9 = vpop.permute.xlu0 %509 }
  0xb4   : > { %v623_v61 = vsel %vm576_vm2, %v2919_v1, %v510_v9  ;;  %v570_v43 = vpop.permute.xlu1 %569 }
  0xb5   : > { %1146 = vmatmul.mubr.bf16.gmra.mrb[16].mxu1 %v651_v36  ;;  %v666_v16 = vsel %vm576_vm2, %v2847_v28, %v570_v43 }
  0xb6   : > { %1049 = vmatmul.mubr.bf16.gmra.mrb[16].mxu0 %v590_v32  ;;  %1153 = vmatprep.mubr.bf16.mxu1 %v599_v39 }
  0xb7   : > { %1056 = vmatprep.mubr.bf16.mxu0 %v623_v61  ;;  %v512_v41 = vpop.permute.xlu0 %511 }
  0xb8   : > { %v627_v3 = vsel %vm576_vm2, %v2930_v5, %v512_v41  ;;  %v514_v47 = vpop.permute.xlu1 %513 }
  0xb9   : > { %v631_v52 = vsel %vm576_vm2, %v2986_v42, %v514_v47 }
  0xbb   : > { %v546_v45 = vpop.permute.xlu0 %545 }
  0xbc   : > { %v659_v49 = vsel %vm576_vm2, %v2908_v59, %v546_v45  ;;  %v548_v28 = vpop.permute.xlu1 %547  ;;  %v573_v59 = vrot.slane %v2902_v56, 1 }
  0xbd   : > { %1154 = vmatmul.mubr.bf16.gmra.mrb[20].mxu1 %v655_v44  ;;  %v663_v53 = vsel %vm576_vm2, %v2955_v26, %v548_v28  ;;  %v574_v26 = vrot.slane %v2933_v12, 1 }
  0xbe   : > { %1057 = vmatmul.mubr.bf16.gmra.mrb[20].mxu0 %v593_v8  ;;  %1161 = vmatprep.mubr.bf16.mxu1 %v666_v16 }
  0xbf   : > { %1064 = vmatprep.mubr.bf16.mxu0 %v627_v3  ;;  %v572_v46 = vpop.permute.xlu0 %571 }
  0xc0   : > { %v669_v51 = vsel %vm576_vm2, %v2902_v56, %v572_v46  ;;  %v3083_v56 = vld [vmem:[%s3388_s2] ss:$0 sm:$0xff] }
  0xc5   : > { %1162 = vmatmul.mubr.bf16.gmra.mrb[24].mxu1 %v659_v49 }
  0xc6   : > { %1065 = vmatmul.mubr.bf16.gmra.mrb[24].mxu0 %v596_v48  ;;  %1169 = vmatprep.mubr.bf16.mxu1 %v669_v51 }
  0xc7   : > { %1072 = vmatprep.mubr.bf16.mxu0 %v631_v52 }
  0xcd   : > { %1170 = vmatmul.mubr.bf16.gmra.mrb[28].mxu1 %v663_v53 }
  0xce   : > { %1073 = vmatmul.mubr.bf16.gmra.mrb[28].mxu0 %v599_v39  ;;  %2479 = vmatprep.mubr.msk.bf16.mxu1 %vm576_vm2, %v2930_v5  ;;  %v575_v5 = vsel %vm469_vm1, %v573_v59, %v574_v26 }
  0xcf   : > { %2471 = vmatprep.mubr.msk.bf16.mxu0 %vm576_vm2, %v2794_v57 }
  0xd5   : > { %2480 = vmatmul.mubr.msk.bf16.vlgmr.msra.gmra.mrb[32].mxu1 %vm576_vm2, %v2986_v42 }
  0xd6   : > { %2472 = vmatmul.mubr.msk.bf16.vlgmr.msra.gmra.mrb[32].mxu0 %vm576_vm2, %v2843_v25  ;;  %2483 = vmatprep.mubr.msk.bf16.mxu1 %vm576_vm2, %v2991_v37 }
  0xd7   : > { %2475 = vmatprep.mubr.msk.bf16.mxu0 %vm576_vm2, %v2859_v33 }
  0xdd   : > { %2484 = vmatmul.mubr.msk.bf16.gmra.mrb[36].mxu1 %vm576_vm2, %v575_v5 }
  0xde   : > { %2476 = vmatmul.mubr.msk.bf16.gmra.mrb[36].mxu0 %vm576_vm2, %v2919_v1 }
 0x165   : > { %v2403_v57 = vpop.f32.mrb[0].mxu1 }
 0x166   : > { %v2404_v42 = vpop.f32.mrb[1].mxu1 }
 0x167   : > { %v2405_v25 = vadd.f32 %v2404_v42, %v2403_v57  ;;  %v2406_v54 = vpop.f32.mrb[2].mxu1 }
 0x168   : > { %v2407_v55 = vpop.f32.mrb[3].mxu1 }
 0x169   : > { %v2408_v37 = vadd.f32 %v2407_v55, %v2406_v54  ;;  %v2339_v58 = vpop.f32.mrb[0].mxu0 }
 0x16a   : > { %v2340_v33 = vpop.f32.mrb[1].mxu0 }
 0x16b   : > { %v2341_v12 = vadd.f32 %v2340_v33, %v2339_v58  ;;  %v2342_v60 = vpop.f32.mrb[2].mxu0 }
 0x16c   : > { %v2343_v63 = vpop.f32.mrb[3].mxu0 }
 0x16d   : > { %v1019_v19 = vadd.f32 %v2341_v12, %v3083_v56  ;;  %v2344_v0 = vadd.f32 %v2343_v63, %v2342_v60  ;;  %v2409_v1 = vpop.f32.mrb[4].mxu1 }
 0x16e   : > { %v2410_v10 = vpop.f32.mrb[5].mxu1 }
 0x16f   : > { %v1022_v62 = vadd.f32 %v2344_v0, %v3083_v56  ;;  %v3087_v2 = vadd.f32 %v2405_v25, %v1019_v19  ;;  %v2411_v4 = vadd.f32 %v2410_v10, %v2409_v1  ;;  %v2412_v14 = vpop.f32.mrb[6].mxu1 }
 0x170   : > { %v2413_v7 = vpop.f32.mrb[7].mxu1 }
 0x171   : > { %v2345_v6 = vpop.f32.mrb[4].mxu0  ;;  %v3089_v13 = vadd.f32 %v2408_v37, %v1022_v62  ;;  %v2414_v15 = vadd.f32 %v2413_v7, %v2412_v14 }
 0x172   : > { %v2346_v17 = vpop.f32.mrb[5].mxu0 }
 0x173   : > { %v2347_v23 = vadd.f32 %v2346_v17, %v2345_v6  ;;  %v2348_v18 = vpop.f32.mrb[6].mxu0 }
 0x174   : > { %v2349_v20 = vpop.f32.mrb[7].mxu0 }
 0x175   : > { %v1027_v32 = vadd.f32 %v2347_v23, %v3083_v56  ;;  %v2350_v21 = vadd.f32 %v2349_v20, %v2348_v18 }
 0x177   : > { %v1030_v22 = vadd.f32 %v2350_v21, %v3083_v56  ;;  %v3093_v8 = vadd.f32 %v2411_v4, %v1027_v32 }
 0x178   : > { %v2415_v24 = vpop.f32.mrb[8].mxu1 }
 0x179   : > { %v2351_v27 = vpop.f32.mrb[8].mxu0  ;;  %v2416_v29 = vpop.f32.mrb[9].mxu1  ;;  %v3095_v38 = vadd.f32 %v2414_v15, %v1030_v22 }
 0x17a   : > { %v2417_v30 = vadd.f32 %v2416_v29, %v2415_v24  ;;  %v2352_v11 = vpop.f32.mrb[9].mxu0  ;;  %v2418_v31 = vpop.f32.mrb[10].mxu1 }
 0x17b   : > { %v2353_v48 = vadd.f32 %v2352_v11, %v2351_v27  ;;  %v2354_v50 = vpop.f32.mrb[10].mxu0  ;;  %v2419_v34 = vpop.f32.mrb[11].mxu1 }
 0x17c   : > { %v2420_v35 = vadd.f32 %v2419_v34, %v2418_v31  ;;  %v2355_v36 = vpop.f32.mrb[11].mxu0 }
 0x17d   : > { %v1035_v39 = vadd.f32 %v2353_v48, %v3083_v56  ;;  %v2356_v9 = vadd.f32 %v2355_v36, %v2354_v50 }
 0x17f   : > { %v1038_v40 = vadd.f32 %v2356_v9, %v3083_v56  ;;  %v3099_v61 = vadd.f32 %v2417_v30, %v1035_v39 }
 0x180   : > { %v2421_v41 = vpop.f32.mrb[12].mxu1 }
 0x181   : > { %v2357_v43 = vpop.f32.mrb[12].mxu0  ;;  %v2422_v44 = vpop.f32.mrb[13].mxu1  ;;  %v3101_v16 = vadd.f32 %v2420_v35, %v1038_v40 }
 0x182   : > { %v2423_v3 = vadd.f32 %v2422_v44, %v2421_v41  ;;  %v2358_v45 = vpop.f32.mrb[13].mxu0  ;;  %v2424_v46 = vpop.f32.mrb[14].mxu1 }
 0x183   : > { %v2359_v47 = vadd.f32 %v2358_v45, %v2357_v43  ;;  %v2360_v49 = vpop.f32.mrb[14].mxu0  ;;  %v2425_v51 = vpop.f32.mrb[15].mxu1 }
 0x184   : > { %v2426_v52 = vadd.f32 %v2425_v51, %v2424_v46  ;;  %v2361_v28 = vpop.f32.mrb[15].mxu0 }
 0x185   : > { %v1043_v53 = vadd.f32 %v2359_v47, %v3083_v56  ;;  %v2362_v59 = vadd.f32 %v2361_v28, %v2360_v49 }
 0x187   : > { %v1046_v26 = vadd.f32 %v2362_v59, %v3083_v56  ;;  %v3105_v5 = vadd.f32 %v2423_v3, %v1043_v53 }
 0x188   : > { %v2427_v57 = vpop.f32.mrb[16].mxu1 }
 0x189   : > { %v2363_v42 = vpop.f32.mrb[16].mxu0  ;;  %v2428_v25 = vpop.f32.mrb[17].mxu1  ;;  %v3107_v54 = vadd.f32 %v2426_v52, %v1046_v26  ;;  %v2635_v26 = vmov 1983009808  }
 0x18a   : > { %v2429_v55 = vadd.f32 %v2428_v25, %v2427_v57  ;;  %v2364_v37 = vpop.f32.mrb[17].mxu0  ;;  %v2430_v58 = vpop.f32.mrb[18].mxu1  ;;  %v1406_v57 = vunpack.c.l.s4 %v2635_v26 }
 0x18b   : > { %v2365_v33 = vadd.f32 %v2364_v37, %v2363_v42  ;;  %v2366_v12 = vpop.f32.mrb[18].mxu0  ;;  %v2431_v60 = vpop.f32.mrb[19].mxu1  ;;  %v1408_v42 = vlaneseq }
 0x18c   : > { %v2432_v63 = vadd.f32 %v2431_v60, %v2430_v58  ;;  %v2367_v19 = vpop.f32.mrb[19].mxu0 }
 0x18d   : > { %v1051_v0 = vadd.f32 %v2365_v33, %v3083_v56  ;;  %v2368_v1 = vadd.f32 %v2367_v19, %v2366_v12  ;;  %v1409_v19 = vshrl.u32 %v1408_v42, 7 }
 0x18f   : > { %v1054_v62 = vadd.f32 %v2368_v1, %v3083_v56  ;;  %v3111_v10 = vadd.f32 %v2429_v55, %v1051_v0 }
 0x190   : > { %v2433_v4 = vpop.f32.mrb[20].mxu1 }
 0x191   : > { %v2369_v14 = vpop.f32.mrb[20].mxu0  ;;  %v2434_v6 = vpop.f32.mrb[21].mxu1  ;;  %v3113_v7 = vadd.f32 %v2432_v63, %v1054_v62  ;;  %v1407_v63 = vunpack.c.0.s8 %v1406_v57 }
 0x192   : > { %v2435_v15 = vadd.f32 %v2434_v6, %v2433_v4  ;;  %v2370_v17 = vpop.f32.mrb[21].mxu0  ;;  %v2436_v23 = vpop.f32.mrb[22].mxu1 }
 0x193   : > { %v2371_v18 = vadd.f32 %v2370_v17, %v2369_v14  ;;  %v2372_v20 = vpop.f32.mrb[22].mxu0  ;;  %v2437_v32 = vpop.f32.mrb[23].mxu1 }
 0x194   : > { %v2438_v21 = vadd.f32 %v2437_v32, %v2436_v23  ;;  %v2373_v22 = vpop.f32.mrb[23].mxu0 }
 0x195   : > { %v1059_v24 = vadd.f32 %v2371_v18, %v3083_v56  ;;  %v2374_v27 = vadd.f32 %v2373_v22, %v2372_v20  ;;  %v3135_v18 = vsub.s32 %v1407_v63, %v1409_v19 }
 0x197   : > { %v1062_v29 = vadd.f32 %v2374_v27, %v3083_v56  ;;  %v1156_v30 = vadd.f32 %v2435_v15, %v1059_v24 }
 0x198   : > { %v2439_v11 = vpop.f32.mrb[24].mxu1 }
 0x199   : > { %v2375_v31 = vpop.f32.mrb[24].mxu0  ;;  %v2440_v48 = vpop.f32.mrb[25].mxu1  ;;  %v1159_v50 = vadd.f32 %v2438_v21, %v1062_v29 }
 0x19a   : > { %v2441_v34 = vadd.f32 %v2440_v48, %v2439_v11  ;;  %v2376_v35 = vpop.f32.mrb[25].mxu0  ;;  %v2442_v36 = vpop.f32.mrb[26].mxu1 }
 0x19b   : > { %v2377_v39 = vadd.f32 %v2376_v35, %v2375_v31  ;;  %v2378_v9 = vpop.f32.mrb[26].mxu0  ;;  %v2443_v40 = vpop.f32.mrb[27].mxu1 }
 0x19c   : > { %v2444_v41 = vadd.f32 %v2443_v40, %v2442_v36  ;;  %v2379_v43 = vpop.f32.mrb[27].mxu0 }
 0x19d   : > { %v1067_v44 = vadd.f32 %v2377_v39, %v3083_v56  ;;  %v2380_v3 = vadd.f32 %v2379_v43, %v2378_v9 }
 0x19f   : > { %v1070_v45 = vadd.f32 %v2380_v3, %v3083_v56  ;;  %v3124_v46 = vadd.f32 %v2441_v34, %v1067_v44 }
 0x1a0   : > { %v2445_v47 = vpop.f32.mrb[28].mxu1 }
 0x1a1   : > { %v2381_v49 = vpop.f32.mrb[28].mxu0  ;;  %v2446_v51 = vpop.f32.mrb[29].mxu1  ;;  %v3126_v52 = vadd.f32 %v2444_v41, %v1070_v45 }
 0x1a2   : > { %v2447_v28 = vadd.f32 %v2446_v51, %v2445_v47  ;;  %v2382_v53 = vpop.f32.mrb[29].mxu0  ;;  %v2448_v59 = vpop.f32.mrb[30].mxu1 }
 0x1a3   : > { %v2383_v25 = vadd.f32 %v2382_v53, %v2381_v49  ;;  %v2384_v55 = vpop.f32.mrb[30].mxu0  ;;  %v2449_v37 = vpop.f32.mrb[31].mxu1 }
 0x1a4   : > { %v2450_v58 = vadd.f32 %v2449_v37, %v2448_v59  ;;  %v2385_v33 = vpop.f32.mrb[31].mxu0 }
 0x1a5   : > { %v1075_v12 = vadd.f32 %v2383_v25, %v3083_v56  ;;  %v2386_v60 = vadd.f32 %v2385_v33, %v2384_v55 }
 0x1a7   : > { %v1078_v0 = vadd.f32 %v2386_v60, %v3083_v56  ;;  %v1172_v1 = vadd.f32 %v2447_v28, %v1075_v12 }
 0x1a8   : > { %v2481_v62 = vpop.f32.mrb[32].mxu1 }
 0x1a9   : > { %v1253_v4 = vadd.f32 %v2481_v62, %v1156_v30  ;;  %v2473_v14 = vpop.f32.mrb[32].mxu0  ;;  %v1244_v6 = vpop.f32.mrb[33].mxu1  ;;  %v3131_v15 = vadd.f32 %v2450_v58, %v1078_v0 }
 0x1aa   : > { %v1221_v17 = vadd.f32 %v2473_v14, %v3093_v8  ;;  %v1245_v23 = vadd.f32 %v1244_v6, %v3111_v10  ;;  %v1212_v20 = vpop.f32.mrb[33].mxu0  ;;  %v2482_v32 = vpop.f32.mrb[34].mxu1 }
 0x1ab   : > { %v1285_v21 = vmax.f32 %v1253_v4, 0.0  ;;  %v1213_v56 = vadd.f32 %v1212_v20, %v3087_v2  ;;  %v1256_v22 = vadd.f32 %v2482_v32, %v1159_v50  ;;  %v2474_v24 = vpop.f32.mrb[34].mxu0  ;;  %v1247_v27 = vpop.f32.mrb[35].mxu1 }
 0x1ac   : > { %v1277_v8 = vmax.f32 %v1221_v17, 0.0  ;;  %v1283_v29 = vmax.f32 %v1245_v23, 0.0  ;;  %v1224_v10 = vadd.f32 %v2474_v24, %v3095_v38  ;;  %v1248_v30 = vadd.f32 %v1247_v27, %v3113_v7  ;;  %v1215_v11 = vpop.f32.mrb[35].mxu0 }
 0x1ad   : > { %v2285_v31 = vpack.c.bf16 %v1285_v21, %v1285_v21  ;;  %v1385_v2 = vsel %vm576_vm2, %v1285_v21, -inf  ;;  %v1275_v48 = vmax.f32 %v1213_v56, 0.0  ;;  %v1286_v50 = vmax.f32 %v1256_v22, 0.0 }
 0x1ae   : > { %v2277_v34 = vpack.c.bf16 %v1277_v8, %v1277_v8  ;;  %v1373_v35 = vsel %vm576_vm2, %v1277_v8, -inf  ;;  %v2283_v36 = vpack.c.bf16 %v1283_v29, %v1283_v29  ;;  %v1384_v39 = vsel %vm576_vm2, %v1283_v29, -inf }
 0x1af   : > { %1366 = vst.msk [vmem:[%s3141_s11 + $0x28] sm:$0xf] %vm1355_vm3, %v2285_v31  ;;  %v1386_v38 = vmax.f32 %v1384_v39, %v1385_v2  ;;  %v2275_v9 = vpack.c.bf16 %v1275_v48, %v1275_v48  ;;  %v1372_v7 = vsel %vm576_vm2, %v1275_v48, -inf  ;;  %v2286_v40 = vpack.c.bf16 %v1286_v50, %v1286_v50 }
 0x1b0   : > { %1358 = vst.msk [vmem:[%s3141_s11 + $0x8] sm:$0xf] %vm1355_vm3, %v2277_v34  ;;  %1364 = vst.msk [vmem:[%s3141_s11 + $0x20] sm:$0xf] %vm1355_vm3, %v2283_v36  ;;  %v1374_v41 = vmax.f32 %v1372_v7, %v1373_v35  ;;  %v3156_v43 = vsel %vm576_vm2, %v1286_v50, -inf  ;;  %v1278_v44 = vmax.f32 %v1224_v10, 0.0  ;;  %v3166_v51 = vadd.f32 %v1215_v11, %v3089_v13 }
 0x1b1   : > { %v3158_v3 = vmax.f32 %v1248_v30, 0.0  ;;  %v2485_v45 = vpop.f32.mrb[36].mxu1  ;;  %v1472_v47 = vcombine.high %v1386_v38, %v1386_v38  ;;  %v1479_v49 = vrot.slane %v1386_v38, %v3135_v18  ;;  %1356 = vst.msk [vmem:[%s3141_s11] sm:$0xf] %vm1355_vm3, %v2275_v9  ;;  %1367 = vst.msk [vmem:[%s3141_s11 + $0x2c] sm:$0xf] %vm1355_vm3, %v2286_v40 }
 0x1b2   : > { %v3168_v28 = vadd.f32 %v2485_v45, %v1172_v1  ;;  %v3170_v53 = vpop.f32.mrb[36].mxu0  ;;  %v3172_v59 = vpop.f32.mrb[37].mxu1  ;;  %v1404_v26 = vcombine.high %v1374_v41, %v1374_v41  ;;  %v1411_v57 = vrot.slane %v1374_v41, %v3135_v18  ;;  %v2278_v42 = vpack.c.bf16 %v1278_v44, %v1278_v44 }
 0x1b3   : > { %v3176_v25 = vsel %vm576_vm2, %v1278_v44, -inf  ;;  %v3178_v55 = vpop.f32.mrb[37].mxu0  ;;  %v3180_v37 = vpop.f32.mrb[38].mxu1  ;;  %v1486_v13 = vrot.slane %v1472_v47, %v3135_v18  ;;  %v1487_v58 = vcombine.high %v1479_v49, %v1479_v49  ;;  %v1685_v33 = vsel %vm1572_vm4, %v1479_v49, -inf }
 0x1b4   : > { %v2284_v12 = vpack.c.bf16 %v3158_v3, %v3158_v3  ;;  %v3186_v60 = vpop.f32.mrb[38].mxu0  ;;  %v3188_v63 = vpop.f32.mrb[39].mxu1  ;;  %v1686_v19 = vrot.slane %v1685_v33, 4  ;;  %v1418_v0 = vrot.slane %v1404_v26, %v3135_v18  ;;  %v1419_v1 = vcombine.high %v1411_v57, %v1411_v57  ;;  %1359 = vst.msk [vmem:[%s3141_s11 + $0xc] sm:$0xf] %vm1355_vm3, %v2278_v42 }
 0x1b5   : > { %v1573_v62 = vsel %vm1572_vm4, %v1411_v57, -inf  ;;  %v3194_v4 = vpop.f32.mrb[39].mxu0  ;;  %v1488_v14 = vcombine.high %v1486_v13, %v1486_v13  ;;  %v1692_v6 = vsel %vm1572_vm4, %v1487_v58, -inf  ;;  %v1699_v17 = vsel %vm1572_vm4, %v1486_v13, -inf }
 0x1b6   : > { %v1574_v23 = vrot.slane %v1573_v62, 4  ;;  %1365 = vst.msk [vmem:[%s3141_s11 + $0x24] sm:$0xf] %vm1355_vm3, %v2284_v12  ;;  %v1687_v20 = vmax.f32 %v1685_v33, %v1686_v19  ;;  %v1693_v32 = vrot.slane %v1692_v6, 4  ;;  %v1700_v21 = vrot.slane %v1699_v17, 4 }
 0x1b7   : > { %v1420_v56 = vcombine.high %v1418_v0, %v1418_v0  ;;  %v1706_v22 = vsel %vm1572_vm4, %v1488_v14, -inf  ;;  %v1580_v27 = vsel %vm1572_vm4, %v1419_v1, -inf  ;;  %v1587_v8 = vsel %vm1572_vm4, %v1418_v0, -inf }
 0x1b8   : > { %v1575_v24 = vmax.f32 %v1573_v62, %v1574_v23  ;;  %v1688_v29 = vrot.slane %v1687_v20, 2  ;;  %v1694_v10 = vmax.f32 %v1692_v6, %v1693_v32  ;;  %v1701_v30 = vmax.f32 %v1699_v17, %v1700_v21 }
 0x1b9   : > { %v1707_v11 = vrot.slane %v1706_v22, 4  ;;  %v1581_v2 = vrot.slane %v1580_v27, 4  ;;  %v1588_v48 = vrot.slane %v1587_v8, 4  ;;  %v1594_v50 = vsel %vm1572_vm4, %v1420_v56, -inf }
 0x1ba   : > { %v1576_v31 = vrot.slane %v1575_v24, 2  ;;  %v1689_v34 = vmax.f32 %v1687_v20, %v1688_v29  ;;  %v1695_v35 = vrot.slane %v1694_v10, 2  ;;  %v1702_v36 = vrot.slane %v1701_v30, 2 }
 0x1bb   : > { %v1708_v39 = vmax.f32 %v1706_v22, %v1707_v11  ;;  %v1582_v9 = vmax.f32 %v1580_v27, %v1581_v2  ;;  %v1589_v7 = vmax.f32 %v1587_v8, %v1588_v48  ;;  %v1595_v40 = vrot.slane %v1594_v50, 4 }
 0x1bc   : > { %v1577_v38 = vmax.f32 %v1575_v24, %v1576_v31  ;;  %v1690_v41 = vrot.slane %v1689_v34, 1  ;;  %v1696_v44 = vmax.f32 %v1694_v10, %v1695_v35  ;;  %v1703_v45 = vmax.f32 %v1701_v30, %v1702_v36 }
 0x1bd   : > { %v1709_v47 = vrot.slane %v1708_v39, 2  ;;  %v1583_v26 = vrot.slane %v1582_v9, 2  ;;  %v1590_v57 = vrot.slane %v1589_v7, 2  ;;  %v1596_v42 = vmax.f32 %v1594_v50, %v1595_v40 }
 0x1be   : > { %v1578_v49 = vrot.slane %v1577_v38, 1  ;;  %v1691_v13 = vmax.f32 %v1689_v34, %v1690_v41  ;;  %v1697_v58 = vrot.slane %v1696_v44, 1  ;;  %v1704_v33 = vrot.slane %v1703_v45, 1 }
 0x1bf   : > { %v1710_v12 = vmax.f32 %v1708_v39, %v1709_v47  ;;  %v1584_v0 = vmax.f32 %v1582_v9, %v1583_v26  ;;  %v1591_v1 = vmax.f32 %v1589_v7, %v1590_v57  ;;  %v1597_v62 = vrot.slane %v1596_v42, 2 }
 0x1c0   : > { %v1579_v19 = vmax.f32 %v1577_v38, %v1578_v49  ;;  %v1698_v14 = vmax.f32 %v1696_v44, %v1697_v58  ;;  %v1705_v6 = vmax.f32 %v1703_v45, %v1704_v33  ;;  %v2307_v23 = vpack.c.bf16 %v1691_v13, %v1691_v13 }
 0x1c1   : > { %v1711_v17 = vrot.slane %v1710_v12, 1  ;;  %v1585_v20 = vrot.slane %v1584_v0, 1  ;;  %v1592_v32 = vrot.slane %v1591_v1, 1  ;;  %v1598_v21 = vmax.f32 %v1596_v42, %v1597_v62 }
 0x1c2   : > { %v2291_v56 = vpack.c.bf16 %v1579_v19, %v1579_v19  ;;  %v2308_v24 = vpack.c.bf16 %v1698_v14, %v1698_v14  ;;  %v2309_v27 = vpack.c.bf16 %v1705_v6, %v1705_v6  ;;  %v1941_v8 = vunpack.c.l.b16 %v2307_v23 }
 0x1c3   : > { %v1712_v22 = vmax.f32 %v1710_v12, %v1711_v17  ;;  %v1586_v29 = vmax.f32 %v1584_v0, %v1585_v20  ;;  %v1593_v10 = vmax.f32 %v1591_v1, %v1592_v32  ;;  %v1599_v30 = vrot.slane %v1598_v21, 1 }
 0x1c4   : > { %v1925_v11 = vunpack.c.l.b16 %v2291_v56  ;;  %v1942_v2 = vunpack.c.l.b16 %v2308_v24  ;;  %v1943_v48 = vunpack.c.l.b16 %v2309_v27  ;;  %v1387_v50 = vsel %vm576_vm2, %v3158_v3, -inf }
 0x1c5   : > { %v2310_v31 = vpack.c.bf16 %v1712_v22, %v1712_v22  ;;  %v1600_v34 = vmax.f32 %v1598_v21, %v1599_v30  ;;  %v2292_v35 = vpack.c.bf16 %v1586_v29, %v1586_v29  ;;  %v2293_v36 = vpack.c.bf16 %v1593_v10, %v1593_v10 }
 0x1c6   : > { %v1389_v39 = vmax.f32 %v1387_v50, %v3156_v43  ;;  %v1978_v9 = vsel %vm1957_vm5, %v1942_v2, %v1941_v8  ;;  %v1276_v7 = vmax.f32 %v3166_v51, 0.0  ;;  %v1289_v40 = vmax.f32 %v3168_v28, 0.0 }
 0x1c7   : > { %v1944_v38 = vunpack.c.l.b16 %v2310_v31  ;;  %v1979_v41 = vsel %vm1959_vm6, %v1943_v48, %v1978_v9  ;;  %v2294_v44 = vpack.c.bf16 %v1600_v34, %v1600_v34  ;;  %v1926_v45 = vunpack.c.l.b16 %v2292_v35 }
 0x1c8   : > { %v1927_v47 = vunpack.c.l.b16 %v2293_v36  ;;  %v1489_v49 = vcombine.high %v1389_v39, %v1389_v39  ;;  %v1496_v3 = vrot.slane %v1389_v39, %v3135_v18  ;;  %v2276_v43 = vpack.c.bf16 %v1276_v7, %v1276_v7 }
 0x1c9   : > { %v3213_v26 = vsel %vm1961_vm7, %v1944_v38, %v1979_v41  ;;  %v1928_v57 = vunpack.c.l.b16 %v2294_v44  ;;  %v1958_v42 = vsel %vm1957_vm5, %v1926_v45, %v1925_v11  ;;  %v1375_v51 = vsel %vm576_vm2, %v1276_v7, -inf }
 0x1ca   : > { %v2289_v28 = vpack.c.bf16 %v1289_v40, %v1289_v40  ;;  %v1960_v13 = vsel %vm1959_vm6, %v1927_v47, %v1958_v42  ;;  %v1503_v58 = vrot.slane %v1489_v49, %v3135_v18  ;;  %v1504_v33 = vcombine.high %v1496_v3, %v1496_v3  ;;  %1357 = vst.msk [vmem:[%s3141_s11 + $0x4] sm:$0xf] %vm1355_vm3, %v2276_v43 }
 0x1cb   : > { %v1713_v12 = vsel %vm1572_vm4, %v1496_v3, -inf  ;;  %v1377_v0 = vmax.f32 %v1375_v51, %v3176_v25  ;;  %v3224_v1 = vsel %vm1961_vm7, %v1928_v57, %v1960_v13  ;;  %v3229_v62 = vsel %vm576_vm2, %v1289_v40, -inf }
 0x1cc   : > { %v1714_v19 = vrot.slane %v1713_v12, 4  ;;  %1370 = vst.msk [vmem:[%s3141_s11 + $0x38] sm:$0xf] %vm1355_vm3, %v2289_v28  ;;  %v1505_v14 = vcombine.high %v1503_v58, %v1503_v58  ;;  %v1720_v6 = vsel %vm1572_vm4, %v1504_v33, -inf  ;;  %v1727_v17 = vsel %vm1572_vm4, %v1503_v58, -inf }
 0x1cd   : > { %v1237_v23 = vadd.f32 %v3170_v53, %v3105_v5  ;;  %v1721_v32 = vrot.slane %v1720_v6, 4  ;;  %v1728_v21 = vrot.slane %v1727_v17, 4  ;;  %v1421_v25 = vcombine.high %v1377_v0, %v1377_v0 }
 0x1ce   : > { %v1715_v20 = vmax.f32 %v1713_v12, %v1714_v19  ;;  %v1734_v56 = vsel %vm1572_vm4, %v1505_v14, -inf  ;;  %v1428_v22 = vrot.slane %v1377_v0, %v3135_v18  ;;  %v3242_v27 = vadd.f32 %v3172_v59, %v3124_v46 }
 0x1cf   : > { %v3238_v24 = vmax.f32 %v1237_v23, 0.0  ;;  %v1722_v29 = vmax.f32 %v1720_v6, %v1721_v32  ;;  %v1729_v10 = vmax.f32 %v1727_v17, %v1728_v21  ;;  %v1735_v5 = vrot.slane %v1734_v56, 4 }
 0x1d0   : > { %v1716_v8 = vrot.slane %v1715_v20, 2  ;;  %v1435_v53 = vrot.slane %v1421_v25, %v3135_v18  ;;  %v1436_v30 = vcombine.high %v1428_v22, %v1428_v22  ;;  %v1601_v11 = vsel %vm1572_vm4, %v1428_v22, -inf }
 0x1d1   : > { %v2281_v31 = vpack.c.bf16 %v3238_v24, %v3238_v24  ;;  %v1723_v59 = vrot.slane %v1722_v29, 2  ;;  %v1730_v2 = vrot.slane %v1729_v10, 2  ;;  %v1736_v48 = vmax.f32 %v1734_v56, %v1735_v5 }
 0x1d2   : > { %v1717_v46 = vmax.f32 %v1715_v20, %v1716_v8  ;;  %v1437_v50 = vcombine.high %v1435_v53, %v1435_v53  ;;  %v1602_v34 = vrot.slane %v1601_v11, 4  ;;  %v1608_v35 = vsel %vm1572_vm4, %v1436_v30, -inf }
 0x1d3   : > { %v1615_v36 = vsel %vm1572_vm4, %v1435_v53, -inf  ;;  %1362 = vst.msk [vmem:[%s3141_s11 + $0x18] sm:$0xf] %vm1355_vm3, %v2281_v31  ;;  %v1724_v38 = vmax.f32 %v1722_v29, %v1723_v59  ;;  %v1731_v9 = vmax.f32 %v1729_v10, %v1730_v2  ;;  %v1737_v7 = vrot.slane %v1736_v48, 2 }
 0x1d4   : > { %v1718_v39 = vrot.slane %v1717_v46, 1  ;;  %v1603_v40 = vmax.f32 %v1601_v11, %v1602_v34  ;;  %v1609_v41 = vrot.slane %v1608_v35, 4  ;;  %v1616_v44 = vrot.slane %v1615_v36, 4 }
 0x1d5   : > { %v1622_v45 = vsel %vm1572_vm4, %v1437_v50, -inf  ;;  %v1725_v49 = vrot.slane %v1724_v38, 1  ;;  %v1732_v3 = vrot.slane %v1731_v9, 1  ;;  %v1738_v43 = vmax.f32 %v1736_v48, %v1737_v7 }
 0x1d6   : > { %v1719_v47 = vmax.f32 %v1717_v46, %v1718_v39  ;;  %v1604_v57 = vrot.slane %v1603_v40, 2  ;;  %v1610_v42 = vmax.f32 %v1608_v35, %v1609_v41  ;;  %v1617_v51 = vmax.f32 %v1615_v36, %v1616_v44 }
 0x1d7   : > { %v1623_v28 = vrot.slane %v1622_v45, 4  ;;  %v1726_v13 = vmax.f32 %v1724_v38, %v1725_v49  ;;  %v1733_v58 = vmax.f32 %v1731_v9, %v1732_v3  ;;  %v1739_v33 = vrot.slane %v1738_v43, 1 }
 0x1d8   : > { %v2311_v12 = vpack.c.bf16 %v1719_v47, %v1719_v47  ;;  %v1605_v19 = vmax.f32 %v1603_v40, %v1604_v57  ;;  %v1611_v0 = vrot.slane %v1610_v42, 2  ;;  %v1618_v14 = vrot.slane %v1617_v51, 2 }
 0x1d9   : > { %v1624_v6 = vmax.f32 %v1622_v45, %v1623_v28  ;;  %v1740_v17 = vmax.f32 %v1738_v43, %v1739_v33  ;;  %v2312_v23 = vpack.c.bf16 %v1726_v13, %v1726_v13  ;;  %v2313_v20 = vpack.c.bf16 %v1733_v58, %v1733_v58 }
 0x1da   : > { %v1945_v32 = vunpack.c.l.b16 %v2311_v12  ;;  %v1606_v21 = vrot.slane %v1605_v19, 1  ;;  %v1612_v25 = vmax.f32 %v1610_v42, %v1611_v0  ;;  %v1619_v56 = vmax.f32 %v1617_v51, %v1618_v14 }
 0x1db   : > { %v1625_v22 = vrot.slane %v1624_v6, 2  ;;  %v2314_v8 = vpack.c.bf16 %v1740_v17, %v1740_v17  ;;  %v1946_v29 = vunpack.c.l.b16 %v2312_v23  ;;  %v1947_v10 = vunpack.c.l.b16 %v2313_v20 }
 0x1dc   : > { %v1981_v5 = vsel %vm1963_vm8, %v1945_v32, %v3213_v26  ;;  %v1607_v53 = vmax.f32 %v1605_v19, %v1606_v21  ;;  %v1613_v30 = vrot.slane %v1612_v25, 1  ;;  %v1620_v11 = vrot.slane %v1619_v56, 1 }
 0x1dd   : > { %v1626_v31 = vmax.f32 %v1624_v6, %v1625_v22  ;;  %v1948_v46 = vunpack.c.l.b16 %v2314_v8  ;;  %v1982_v59 = vsel %vm1965_vm9, %v1946_v29, %v1981_v5  ;;  %v1379_v2 = vsel %vm576_vm2, %v3238_v24, -inf }
 0x1de   : > { %v1287_v48 = vmax.f32 %v3242_v27, 0.0  ;;  %v1983_v50 = vsel %vm1967_vm10, %v1947_v10, %v1982_v59  ;;  %v1614_v34 = vmax.f32 %v1612_v25, %v1613_v30  ;;  %v1621_v35 = vmax.f32 %v1619_v56, %v1620_v11 }
 0x1df   : > { %v1627_v36 = vrot.slane %v1626_v31, 1  ;;  %v1984_v26 = vsel %vm1969_vm11, %v1948_v46, %v1983_v50  ;;  %v2295_v39 = vpack.c.bf16 %v1607_v53, %v1607_v53  ;;  %v1229_v45 = vadd.f32 %v3178_v55, %v3099_v61 }
 0x1e0   : > { %v2287_v38 = vpack.c.bf16 %v1287_v48, %v1287_v48  ;;  %v1390_v24 = vsel %vm576_vm2, %v1287_v48, -inf  ;;  %v1994_v9 = vpack.c.b16 %v1984_v26, %v1984_v26  ;;  %v2296_v27 = vpack.c.bf16 %v1614_v34, %v1614_v34 }
 0x1e1   : > { %v1628_v7 = vmax.f32 %v1626_v31, %v1627_v36  ;;  %v2297_v40 = vpack.c.bf16 %v1621_v35, %v1621_v35  ;;  %v1929_v41 = vunpack.c.l.b16 %v2295_v39  ;;  %v1392_v44 = vmax.f32 %v1390_v24, %v3229_v62 }
 0x1e2   : > { %1368 = vst.msk [vmem:[%s3141_s11 + $0x30] sm:$0xf] %vm1355_vm3, %v2287_v38  ;;  %v1272_v47 = vadd.f32 %v3180_v37, %v3131_v15  ;;  %2002 = vst.msk [vmem:[%s3274_s25 + $0x8] sm:$0xf] %vm1355_vm3, %v1994_v9  ;;  %v1930_v3 = vunpack.c.l.b16 %v2296_v27  ;;  %v1240_v57 = vadd.f32 %v3186_v60, %v3107_v54  ;;  %v1279_v28 = vmax.f32 %v1229_v45, 0.0 }
 0x1e3   : > { %v2298_v49 = vpack.c.bf16 %v1628_v7, %v1628_v7  ;;  %v1931_v43 = vunpack.c.l.b16 %v2297_v40  ;;  %v1964_v42 = vsel %vm1963_vm8, %v1929_v41, %v3224_v1  ;;  %v1506_v51 = vcombine.high %v1392_v44, %v1392_v44 }
 0x1e4   : > { %v1513_v62 = vrot.slane %v1392_v44, %v3135_v18  ;;  %v1966_v61 = vsel %vm1965_vm9, %v1930_v3, %v1964_v42  ;;  %v3293_v55 = vmax.f32 %v1272_v47, 0.0  ;;  %v3295_v15 = vmax.f32 %v1240_v57, 0.0 }
 0x1e5   : > { %v1932_v13 = vunpack.c.l.b16 %v2298_v49  ;;  %v1968_v37 = vsel %vm1967_vm10, %v1931_v43, %v1966_v61  ;;  %v1520_v58 = vrot.slane %v1506_v51, %v3135_v18  ;;  %v2279_v12 = vpack.c.bf16 %v1279_v28, %v1279_v28 }
 0x1e6   : > { %v1521_v54 = vcombine.high %v1513_v62, %v1513_v62  ;;  %v1741_v60 = vsel %vm1572_vm4, %v1513_v62, -inf  ;;  %v1378_v19 = vsel %vm576_vm2, %v1279_v28, -inf  ;;  %v2290_v56 = vpack.c.bf16 %v3293_v55, %v3293_v55 }
 0x1e7   : > { %v1970_v1 = vsel %vm1969_vm11, %v1932_v13, %v1968_v37  ;;  %v1742_v33 = vrot.slane %v1741_v60, 4  ;;  %v1522_v14 = vcombine.high %v1520_v58, %v1520_v58  ;;  %v1755_v17 = vsel %vm1572_vm4, %v1520_v58, -inf  ;;  %1360 = vst.msk [vmem:[%s3141_s11 + $0x10] sm:$0xf] %vm1355_vm3, %v2279_v12 }
 0x1e8   : > { %v1992_v0 = vpack.c.b16 %v1970_v1, %v1970_v1  ;;  %v1748_v6 = vsel %vm1572_vm4, %v1521_v54, -inf  ;;  %v1756_v32 = vrot.slane %v1755_v17, 4  ;;  %v1380_v21 = vmax.f32 %v1378_v19, %v1379_v2  ;;  %1371 = vst.msk [vmem:[%s3141_s11 + $0x3c] sm:$0xf] %vm1355_vm3, %v2290_v56 }
 0x1e9   : > { %v1743_v23 = vmax.f32 %v1741_v60, %v1742_v33  ;;  %v1749_v20 = vrot.slane %v1748_v6, 4  ;;  %v1762_v25 = vsel %vm1572_vm4, %v1522_v14, -inf  ;;  %v2282_v22 = vpack.c.bf16 %v3295_v15, %v3295_v15 }
 0x1ea   : > { %2000 = vst.msk [vmem:[%s3274_s25] sm:$0xf] %vm1355_vm3, %v1992_v0  ;;  %v1757_v10 = vmax.f32 %v1755_v17, %v1756_v32  ;;  %v1763_v5 = vrot.slane %v1762_v25, 4  ;;  %v1438_v53 = vcombine.high %v1380_v21, %v1380_v21  ;;  %v1445_v30 = vrot.slane %v1380_v21, %v3135_v18 }
 0x1eb   : > { %v1744_v8 = vrot.slane %v1743_v23, 2  ;;  %v1750_v29 = vmax.f32 %v1748_v6, %v1749_v20  ;;  %1363 = vst.msk [vmem:[%s3141_s11 + $0x1c] sm:$0xf] %vm1355_vm3, %v2282_v22  ;;  %v1264_v11 = vadd.f32 %v3188_v63, %v3126_v52  ;;  %v1394_v0 = vsel %vm576_vm2, %v3293_v55, -inf }
 0x1ec   : > { %v1758_v59 = vrot.slane %v1757_v10, 2  ;;  %v1764_v2 = vmax.f32 %v1762_v25, %v1763_v5  ;;  %v1452_v48 = vrot.slane %v1438_v53, %v3135_v18  ;;  %v1453_v50 = vcombine.high %v1445_v30, %v1445_v30 }
 0x1ed   : > { %v1745_v31 = vmax.f32 %v1743_v23, %v1744_v8  ;;  %v1751_v46 = vrot.slane %v1750_v29, 2  ;;  %v1629_v34 = vsel %vm1572_vm4, %v1445_v30, -inf  ;;  %v1288_v57 = vmax.f32 %v1264_v11, 0.0 }
 0x1ee   : > { %v1759_v26 = vmax.f32 %v1757_v10, %v1758_v59  ;;  %v1765_v39 = vrot.slane %v1764_v2, 2  ;;  %v1454_v38 = vcombine.high %v1452_v48, %v1452_v48  ;;  %v1630_v24 = vrot.slane %v1629_v34, 4 }
 0x1ef   : > { %v1746_v35 = vrot.slane %v1745_v31, 1  ;;  %v1752_v36 = vmax.f32 %v1750_v29, %v1751_v46  ;;  %v1636_v9 = vsel %vm1572_vm4, %v1453_v50, -inf  ;;  %v1643_v7 = vsel %vm1572_vm4, %v1452_v48, -inf }
 0x1f0   : > { %v1760_v27 = vrot.slane %v1759_v26, 1  ;;  %v1766_v40 = vmax.f32 %v1764_v2, %v1765_v39  ;;  %v1631_v41 = vmax.f32 %v1629_v34, %v1630_v24  ;;  %v1637_v44 = vrot.slane %v1636_v9, 4 }
 0x1f1   : > { %v1747_v52 = vmax.f32 %v1745_v31, %v1746_v35  ;;  %v1753_v63 = vrot.slane %v1752_v36, 1  ;;  %v1644_v45 = vrot.slane %v1643_v7, 4  ;;  %v1650_v47 = vsel %vm1572_vm4, %v1454_v38, -inf }
 0x1f2   : > { %v1761_v3 = vmax.f32 %v1759_v26, %v1760_v27  ;;  %v1767_v43 = vrot.slane %v1766_v40, 1  ;;  %v1632_v42 = vrot.slane %v1631_v41, 2  ;;  %v1638_v51 = vmax.f32 %v1636_v9, %v1637_v44 }
 0x1f3   : > { %v1754_v49 = vmax.f32 %v1752_v36, %v1753_v63  ;;  %v1645_v62 = vmax.f32 %v1643_v7, %v1644_v45  ;;  %v1651_v28 = vrot.slane %v1650_v47, 4  ;;  %v2315_v61 = vpack.c.bf16 %v1747_v52, %v1747_v52 }
 0x1f4   : > { %v1768_v13 = vmax.f32 %v1766_v40, %v1767_v43  ;;  %v2317_v58 = vpack.c.bf16 %v1761_v3, %v1761_v3  ;;  %v1633_v54 = vmax.f32 %v1631_v41, %v1632_v42  ;;  %v1639_v60 = vrot.slane %v1638_v51, 2 }
 0x1f5   : > { %v2316_v37 = vpack.c.bf16 %v1754_v49, %v1754_v49  ;;  %v1646_v1 = vrot.slane %v1645_v62, 2  ;;  %v1652_v33 = vmax.f32 %v1650_v47, %v1651_v28  ;;  %v2288_v14 = vpack.c.bf16 %v1288_v57, %v1288_v57 }
 0x1f6   : > { %v2318_v12 = vpack.c.bf16 %v1768_v13, %v1768_v13  ;;  %v1634_v6 = vrot.slane %v1633_v54, 1  ;;  %v1640_v17 = vmax.f32 %v1638_v51, %v1639_v60  ;;  %v1949_v32 = vunpack.c.l.b16 %v2315_v61 }
 0x1f7   : > { %v1950_v19 = vunpack.c.l.b16 %v2316_v37  ;;  %v1647_v23 = vmax.f32 %v1645_v62, %v1646_v1  ;;  %v1653_v20 = vrot.slane %v1652_v33, 2  ;;  %1369 = vst.msk [vmem:[%s3141_s11 + $0x34] sm:$0xf] %vm1355_vm3, %v2288_v14  ;;  %v1393_v21 = vsel %vm576_vm2, %v1288_v57, -inf }
 0x1f8   : > { %v1232_v25 = vadd.f32 %v3194_v4, %v3101_v16  ;;  %v1951_v56 = vunpack.c.l.b16 %v2317_v58  ;;  %v1635_v22 = vmax.f32 %v1633_v54, %v1634_v6  ;;  %v1641_v8 = vrot.slane %v1640_v17, 1 }
 0x1f9   : > { %v1648_v29 = vrot.slane %v1647_v23, 1  ;;  %v1985_v10 = vsel %vm1957_vm5, %v1950_v19, %v1949_v32  ;;  %v1654_v55 = vmax.f32 %v1652_v33, %v1653_v20  ;;  %v1395_v5 = vmax.f32 %v1393_v21, %v1394_v0 }
 0x1fa   : > { %v1280_v53 = vmax.f32 %v1232_v25, 0.0  ;;  %v1952_v30 = vunpack.c.l.b16 %v2318_v12  ;;  %v1642_v11 = vmax.f32 %v1640_v17, %v1641_v8  ;;  %v1382_v46 = vsel %vm576_vm2, %v3295_v15, -inf }
 0x1fb   : > { %v1649_v31 = vmax.f32 %v1647_v23, %v1648_v29  ;;  %v1655_v59 = vrot.slane %v1654_v55, 1  ;;  %v1523_v2 = vcombine.high %v1395_v5, %v1395_v5  ;;  %v1530_v16 = vrot.slane %v1395_v5, %v3135_v18 }
 0x1fc   : > { %v2280_v4 = vpack.c.bf16 %v1280_v53, %v1280_v53  ;;  %v1986_v48 = vsel %vm1959_vm6, %v1951_v56, %v1985_v10  ;;  %v2299_v50 = vpack.c.bf16 %v1635_v22, %v1635_v22  ;;  %v2300_v34 = vpack.c.bf16 %v1642_v11, %v1642_v11 }
 0x1fd   : > { %v1381_v35 = vsel %vm576_vm2, %v1280_v53, -inf  ;;  %v2301_v36 = vpack.c.bf16 %v1649_v31, %v1649_v31  ;;  %v1537_v26 = vrot.slane %v1523_v2, %v3135_v18  ;;  %v1538_v39 = vcombine.high %v1530_v16, %v1530_v16 }
 0x1fe   : > { %v1769_v38 = vsel %vm1572_vm4, %v1530_v16, -inf  ;;  %1361 = vst.msk [vmem:[%s3141_s11 + $0x14] sm:$0xf] %vm1355_vm3, %v2280_v4  ;;  %v3342_v15 = vmax.f32 %v1654_v55, %v1655_v59  ;;  %v1383_v9 = vmax.f32 %v1381_v35, %v1382_v46  ;;  %v1934_v7 = vunpack.c.l.b16 %v2300_v34 }
 0x1ff   : > { %v1770_v24 = vrot.slane %v1769_v38, 4  ;;  %v1539_v52 = vcombine.high %v1537_v26, %v1537_v26  ;;  %v1776_v63 = vsel %vm1572_vm4, %v1538_v39, -inf  ;;  %v1783_v27 = vsel %vm1572_vm4, %v1537_v26, -inf }
 0x200   : > { %v1777_v41 = vrot.slane %v1776_v63, 4  ;;  %v1784_v44 = vrot.slane %v1783_v27, 4  ;;  %v1987_v45 = vsel %vm1961_vm7, %v1952_v30, %v1986_v48  ;;  %v1933_v47 = vunpack.c.l.b16 %v2299_v50 }
 0x201   : > { %v1771_v40 = vmax.f32 %v1769_v38, %v1770_v24  ;;  %v1935_v49 = vunpack.c.l.b16 %v2301_v36  ;;  %v1790_v3 = vsel %vm1572_vm4, %v1539_v52, -inf  ;;  %v1455_v43 = vcombine.high %v1383_v9, %v1383_v9 }
 0x202   : > { %v1778_v42 = vmax.f32 %v1776_v63, %v1777_v41  ;;  %v1785_v51 = vmax.f32 %v1783_v27, %v1784_v44  ;;  %v1791_v62 = vrot.slane %v1790_v3, 4  ;;  %v2302_v28 = vpack.c.bf16 %v3342_v15, %v3342_v15 }
 0x203   : > { %v1772_v57 = vrot.slane %v1771_v40, 2  ;;  %v1971_v13 = vsel %vm1957_vm5, %v1934_v7, %v1933_v47  ;;  %v1462_v61 = vrot.slane %v1383_v9, %v3135_v18  ;;  %v1469_v37 = vrot.slane %v1455_v43, %v3135_v18 }
 0x204   : > { %v1779_v54 = vrot.slane %v1778_v42, 2  ;;  %v1786_v60 = vrot.slane %v1785_v51, 2  ;;  %v1792_v1 = vmax.f32 %v1790_v3, %v1791_v62  ;;  %v1972_v41 = vsel %vm1959_vm6, %v1935_v49, %v1971_v13 }
 0x205   : > { %v1773_v58 = vmax.f32 %v1771_v40, %v1772_v57  ;;  %v1470_v33 = vcombine.high %v1462_v61, %v1462_v61  ;;  %v1471_v12 = vcombine.high %v1469_v37, %v1469_v37  ;;  %v1657_v19 = vsel %vm1572_vm4, %v1462_v61, -inf }
 0x206   : > { %v1671_v0 = vsel %vm1572_vm4, %v1469_v37, -inf  ;;  %v1780_v6 = vmax.f32 %v1778_v42, %v1779_v54  ;;  %v1787_v17 = vmax.f32 %v1785_v51, %v1786_v60  ;;  %v1793_v23 = vrot.slane %v1792_v1, 2 }
 0x207   : > { %v1774_v14 = vrot.slane %v1773_v58, 1  ;;  %v1658_v20 = vrot.slane %v1657_v19, 4  ;;  %v1664_v32 = vsel %vm1572_vm4, %v1470_v33, -inf  ;;  %v1672_v21 = vrot.slane %v1671_v0, 4 }
 0x208   : > { %v1678_v18 = vsel %vm1572_vm4, %v1471_v12, -inf  ;;  %v1781_v56 = vrot.slane %v1780_v6, 1  ;;  %v1788_v22 = vrot.slane %v1787_v17, 1  ;;  %v1794_v8 = vmax.f32 %v1792_v1, %v1793_v23 }
 0x209   : > { %v1775_v25 = vmax.f32 %v1773_v58, %v1774_v14  ;;  %v1659_v29 = vmax.f32 %v1657_v19, %v1658_v20  ;;  %v1665_v10 = vrot.slane %v1664_v32, 4  ;;  %v1673_v55 = vmax.f32 %v1671_v0, %v1672_v21 }
 0x20a   : > { %v1679_v5 = vrot.slane %v1678_v18, 4  ;;  %v1782_v53 = vmax.f32 %v1780_v6, %v1781_v56  ;;  %v1789_v30 = vmax.f32 %v1787_v17, %v1788_v22  ;;  %v1795_v11 = vrot.slane %v1794_v8, 1 }
 0x20b   : > { %v2319_v31 = vpack.c.bf16 %v1775_v25, %v1775_v25  ;;  %v1660_v46 = vrot.slane %v1659_v29, 2  ;;  %v1666_v59 = vmax.f32 %v1664_v32, %v1665_v10  ;;  %v1674_v2 = vrot.slane %v1673_v55, 2 }
 0x20c   : > { %v1680_v16 = vmax.f32 %v1678_v18, %v1679_v5  ;;  %v1796_v4 = vmax.f32 %v1794_v8, %v1795_v11  ;;  %v2320_v48 = vpack.c.bf16 %v1782_v53, %v1782_v53  ;;  %v2321_v50 = vpack.c.bf16 %v1789_v30, %v1789_v30 }
 0x20d   : > { %v1953_v34 = vunpack.c.l.b16 %v2319_v31  ;;  %v1661_v35 = vmax.f32 %v1659_v29, %v1660_v46  ;;  %v1667_v36 = vrot.slane %v1666_v59, 2  ;;  %v1675_v26 = vmax.f32 %v1673_v55, %v1674_v2 }
 0x20e   : > { %v1681_v39 = vrot.slane %v1680_v16, 2  ;;  %v2322_v38 = vpack.c.bf16 %v1796_v4, %v1796_v4  ;;  %v1954_v15 = vunpack.c.l.b16 %v2320_v48  ;;  %v1955_v24 = vunpack.c.l.b16 %v2321_v50 }
 0x20f   : > { %v1988_v9 = vsel %vm1963_vm8, %v1953_v34, %v1987_v45  ;;  %v1662_v7 = vrot.slane %v1661_v35, 1  ;;  %v1668_v52 = vmax.f32 %v1666_v59, %v1667_v36  ;;  %v1676_v63 = vrot.slane %v1675_v26, 1 }
 0x210   : > { %v1682_v27 = vmax.f32 %v1680_v16, %v1681_v39  ;;  %v1936_v40 = vunpack.c.l.b16 %v2302_v28  ;;  %v1956_v44 = vunpack.c.l.b16 %v2322_v38  ;;  %v1989_v47 = vsel %vm1965_vm9, %v1954_v15, %v1988_v9 }
 0x211   : > { %v1990_v3 = vsel %vm1967_vm10, %v1955_v24, %v1989_v47  ;;  %v1663_v43 = vmax.f32 %v1661_v35, %v1662_v7  ;;  %v1669_v57 = vrot.slane %v1668_v52, 1  ;;  %v1677_v42 = vmax.f32 %v1675_v26, %v1676_v63 }
 0x212   : > { %v1991_v51 = vsel %vm1969_vm11, %v1956_v44, %v1990_v3  ;;  %v1683_v62 = vrot.slane %v1682_v27, 1  ;;  %v1973_v54 = vsel %vm1961_vm7, %v1936_v40, %v1972_v41 }
 0x213   : > { %v1995_v45 = vpack.c.b16 %v1991_v51, %v1991_v51  ;;  %v1670_v61 = vmax.f32 %v1668_v52, %v1669_v57  ;;  %v2303_v37 = vpack.c.bf16 %v1663_v43, %v1663_v43  ;;  %v2305_v28 = vpack.c.bf16 %v1677_v42, %v1677_v42 }
 0x214   : > { %v1684_v58 = vmax.f32 %v1682_v27, %v1683_v62 }
 0x215   : > { %2003 = vst.msk [vmem:[%s3274_s25 + $0xc] sm:$0xf] %vm1355_vm3, %v1995_v45  ;;  %v2304_v49 = vpack.c.bf16 %v1670_v61, %v1670_v61  ;;  %v1937_v13 = vunpack.c.l.b16 %v2303_v37  ;;  %v1939_v12 = vunpack.c.l.b16 %v2305_v28 }
 0x216   : > { %v2306_v60 = vpack.c.bf16 %v1684_v58, %v1684_v58 }
 0x217   : > { %v1938_v1 = vunpack.c.l.b16 %v2304_v49  ;;  %v1974_v33 = vsel %vm1963_vm8, %v1937_v13, %v1973_v54 }
 0x218   : > { %v1940_v19 = vunpack.c.l.b16 %v2306_v60 }
 0x219   : > { %v1975_v0 = vsel %vm1965_vm9, %v1938_v1, %v1974_v33 }
 0x21a   : > { %v1976_v14 = vsel %vm1967_vm10, %v1939_v12, %v1975_v0 }
 0x21b   : > { %v1977_v6 = vsel %vm1969_vm11, %v1940_v19, %v1976_v14 }
 0x21c   : > { %v1993_v17 = vpack.c.b16 %v1977_v6, %v1977_v6 }
 0x21e   : > { %2001 = vst.msk [vmem:[%s3274_s25 + $0x4] sm:$0xf] %vm1355_vm3, %v1993_v17 }
 0x21f PF: > { %s15_s19 = sadd.s32 1, %s2632_s19   ;;  %s3392_s15 = smov %s2624_s17 }
 0x220   : > { %p12_p9 = scmp.ge.s32.totalorder %s15_s19, 10   ;;  %s3393_s16 = smov %s2628_s18 }
 0x221   : > { %s3394_s17 = smov %s3397_s20  ;;  %s3395_s18 = smov %s3401_s21 }
 0x222   :  { %14 = sbr.rel (!%p12_p9) target bundleno = 3 (0x3), region = 74 }

// kernel: _lambda_.15
= control target key start
LH: loop header
LB: loop body
LE: loop exit
PB: predicated region body
PF: predicated region fallthrough
CT: control target
= control target key end

     0   :  { %s637_s6 = smov 0   ;;  %s639_s7 = smov 0   ;;  %s700_s0 = inlined_call_operand.vmem [shape: bf16[4,64,128], index: 0, kind: input, shape index: {}]   ;;  %s701_s1 = inlined_call_operand.vmem [shape: f32[4,128,128], index: 1, kind: output, shape index: {}]  }
   0x1   :  { %s641_s8 = smov 0  }
   0x2 LB: > { %s23_s9 = sadd.s32 1, %s621_s7  ;;  %p508_p0 = scmp.ge.s32.totalorder %s625_s8, 1  ;;  %s625_s8 = sphi %s641_s8, %s11_s8   ;;  %s621_s7 = sphi %s639_s7, %s703_s7   ;;  %s617_s6 = sphi %s637_s6, %s702_s6  }
   0x3   : > { %p25_p1 = scmp.ge.s32.totalorder %s23_s9, 4  ;;  %p106_p2 = scmp.lt.s32.totalorder %s625_s8, 5 }
   0x5   : > { %s705_s9 = smov (%p25_p1, %s23_s9), 0  ;;  %p107_p3 = pnand %p508_p0, %p106_p2 }
   0x6   : > { %p131_p4 = scmp.lt.s32.totalorder (!%p107_p3), %s617_s6, 3  ;;  %vm230_vm0 = vcmask (!%p107_p3), 523264  }
   0x7   : > { %110 = sbr.rel (%p107_p3) target bundleno = 367 (0x16f), region = 24 }
   0xe   : > { %s707_s6 = smov (!%p131_p4, %s617_s6), 3 }
   0xf   : > { %s527_s10 = sshll.u32 %s707_s6, 5  ;;  %s528_s14 = sshll.u32 %s707_s6, 7 }
  0x10   : > { %s138_s13 = scalar_lea.vmem %s700_s0, %s527_s10  ;;  %s673_s17 = scalar_lea.vmem %s701_s1, %s528_s14 }
  0x11   : > { %v599_v0 = vld [vmem:[%s138_s13] sm:$0xff]   ;;  %v600_v1 = vld [vmem:[%s138_s13 + $0x8] sm:$0xff]   ;;  %v601_v2 = vld [vmem:[%s138_s13 + $0x10] sm:$0xff]  }
  0x12   : > { %214 = vxpose.xlu0.c.b16.start [1/4] (short) %v599_v0, 128  ;;  %541 = vmatprep.subr.bf16.mxu0 %v599_v0  ;;  %v602_v3 = vld [vmem:[%s138_s13 + $0x18] sm:$0xff]  }
  0x13   : > { %542 = vmatpush3.bf16.msra.mxu0 %v599_v0  ;;  %565 = vmatprep.subr.bf16.mxu1 %v599_v0 }
  0x14   : > { %543 = vmatprep.subr.bf16.mxu0 %v600_v1  ;;  %569 = vmatpush3.bf16.msra.mxu1 %v599_v0 }
  0x15   : > { %566 = vmatprep.subr.bf16.mxu1 %v600_v1 }
  0x16   : > { %215 = vxpose.xlu0.c.b16.cont [2/4] (short) %v600_v1, 128 }
  0x17   : > { %544 = vmatpush3.bf16.msra.mxu0 %v600_v1 }
  0x18   : > { %545 = vmatprep.subr.bf16.mxu0 %v601_v2  ;;  %570 = vmatpush3.bf16.msra.mxu1 %v600_v1 }
  0x19   : > { %567 = vmatprep.subr.bf16.mxu1 %v601_v2 }
  0x1a   : > { %216 = vxpose.xlu0.c.b16.cont [3/4] (short) %v601_v2, 128 }
  0x1b   : > { %546 = vmatpush3.bf16.msra.mxu0 %v601_v2 }
  0x1c   : > { %547 = vmatprep.subr.bf16.mxu0 %v602_v3  ;;  %571 = vmatpush3.bf16.msra.mxu1 %v601_v2 }
  0x1d   : > { %568 = vmatprep.subr.bf16.mxu1 %v602_v3 }
  0x1e   : > { %217 = vxpose.xlu0.c.b16.end [4/4] (short) %v602_v3, 128 }
  0x1f   : > { %548 = vmatpush3.bf16.msra.mxu0 %v602_v3 }
  0x20   : > { %572 = vmatpush3.bf16.msra.mxu1 %v602_v3 }
  0x78   : > { %v222_v4 = vpop.trf.xlu0 }
  0x79   : > { %549 = vmatprep.mubr.msk.bf16.mxu0 %vm230_vm0, %v222_v4 }
  0x7c   : > { %v223_v5 = vpop.trf.xlu0 }
  0x7d   : > { %550 = vmatmul.mubr.msk.bf16.vlgmr.msra.gmra.mrb[0].mxu0 %vm230_vm0, %v223_v5 }
  0x80   : > { %v224_v6 = vpop.trf.xlu0 }
  0x81   : > { %553 = vmatprep.mubr.msk.bf16.mxu0 %vm230_vm0, %v224_v6 }
  0x84   : > { %v225_v7 = vpop.trf.xlu0 }
  0x85   : > { %554 = vmatmul.mubr.msk.bf16.gmra.mrb[4].mxu0 %vm230_vm0, %v225_v7 }
  0x88   : > { %v226_v8 = vpop.trf.xlu0 }
  0x89   : > { %557 = vmatprep.mubr.msk.bf16.mxu1 %vm230_vm0, %v226_v8 }
  0x8c   : > { %v227_v9 = vpop.trf.xlu0 }
  0x8d   : > { %558 = vmatmul.mubr.msk.bf16.vlgmr.msra.gmra.mrb[0].mxu1 %vm230_vm0, %v227_v9 }
  0x90   : > { %v228_v10 = vpop.trf.xlu0 }
  0x91   : > { %561 = vmatprep.mubr.msk.bf16.mxu1 %vm230_vm0, %v228_v10 }
  0x94   : > { %v229_v11 = vpop.trf.xlu0 }
  0x95   : > { %562 = vmatmul.mubr.msk.bf16.gmra.mrb[4].mxu1 %vm230_vm0, %v229_v11 }
 0x150   : > { %v551_v12 = vpop.f32.mrb[0].mxu0 }
 0x151   : > { %v289_v13 = vpop.f32.mrb[1].mxu0  ;;  %v405_v15 = vmul.f32 0.00012207031, %v551_v12 }
 0x152   : > { %v552_v14 = vpop.f32.mrb[2].mxu0  ;;  %v403_v17 = vmul.f32 0.00012207031, %v289_v13 }
 0x153   : > { %v292_v16 = vpop.f32.mrb[3].mxu0  ;;  %421 = vst [vmem:[%s673_s17 + $0x10] sm:$0xff] %v405_v15  ;;  %v406_v18 = vmul.f32 0.00012207031, %v552_v14 }
 0x154   : > { %419 = vst [vmem:[%s673_s17] sm:$0xff] %v403_v17  ;;  %v404_v19 = vmul.f32 0.00012207031, %v292_v16 }
 0x155   : > { %422 = vst [vmem:[%s673_s17 + $0x18] sm:$0xff] %v406_v18 }
 0x156   : > { %420 = vst [vmem:[%s673_s17 + $0x8] sm:$0xff] %v404_v19 }
 0x158   : > { %v555_v20 = vpop.f32.mrb[4].mxu0 }
 0x159   : > { %v305_v21 = vpop.f32.mrb[5].mxu0  ;;  %v409_v23 = vmul.f32 0.00012207031, %v555_v20 }
 0x15a   : > { %v556_v22 = vpop.f32.mrb[6].mxu0  ;;  %v407_v25 = vmul.f32 0.00012207031, %v305_v21 }
 0x15b   : > { %v308_v24 = vpop.f32.mrb[7].mxu0  ;;  %425 = vst [vmem:[%s673_s17 + $0x30] sm:$0xff] %v409_v23  ;;  %v410_v26 = vmul.f32 0.00012207031, %v556_v22 }
 0x15c   : > { %423 = vst [vmem:[%s673_s17 + $0x20] sm:$0xff] %v407_v25  ;;  %v408_v27 = vmul.f32 0.00012207031, %v308_v24 }
 0x15d   : > { %426 = vst [vmem:[%s673_s17 + $0x38] sm:$0xff] %v410_v26 }
 0x15e   : > { %424 = vst [vmem:[%s673_s17 + $0x28] sm:$0xff] %v408_v27 }
 0x160   : > { %v559_v28 = vpop.f32.mrb[0].mxu1 }
 0x161   : > { %v321_v29 = vpop.f32.mrb[1].mxu1  ;;  %v413_v31 = vmul.f32 0.00012207031, %v559_v28 }
 0x162   : > { %v560_v30 = vpop.f32.mrb[2].mxu1  ;;  %v411_v33 = vmul.f32 0.00012207031, %v321_v29 }
 0x163   : > { %v324_v32 = vpop.f32.mrb[3].mxu1  ;;  %429 = vst [vmem:[%s673_s17 + $0x50] sm:$0xff] %v413_v31  ;;  %v414_v34 = vmul.f32 0.00012207031, %v560_v30 }
 0x164   : > { %427 = vst [vmem:[%s673_s17 + $0x40] sm:$0xff] %v411_v33  ;;  %v412_v35 = vmul.f32 0.00012207031, %v324_v32 }
 0x165   : > { %430 = vst [vmem:[%s673_s17 + $0x58] sm:$0xff] %v414_v34 }
 0x166   : > { %428 = vst [vmem:[%s673_s17 + $0x48] sm:$0xff] %v412_v35 }
 0x168   : > { %v563_v36 = vpop.f32.mrb[4].mxu1 }
 0x169   : > { %v337_v37 = vpop.f32.mrb[5].mxu1  ;;  %v417_v39 = vmul.f32 0.00012207031, %v563_v36 }
 0x16a   : > { %v564_v38 = vpop.f32.mrb[6].mxu1  ;;  %v415_v41 = vmul.f32 0.00012207031, %v337_v37 }
 0x16b   : > { %v340_v40 = vpop.f32.mrb[7].mxu1  ;;  %433 = vst [vmem:[%s673_s17 + $0x70] sm:$0xff] %v417_v39  ;;  %v418_v42 = vmul.f32 0.00012207031, %v564_v38 }
 0x16c   : > { %431 = vst [vmem:[%s673_s17 + $0x60] sm:$0xff] %v415_v41  ;;  %v416_v43 = vmul.f32 0.00012207031, %v340_v40 }
 0x16d   : > { %434 = vst [vmem:[%s673_s17 + $0x78] sm:$0xff] %v418_v42 }
 0x16e   : > { %432 = vst [vmem:[%s673_s17 + $0x68] sm:$0xff] %v416_v43 }
 0x16f PF: > { %s11_s8 = sadd.s32 1, %s625_s8   ;;  %s702_s6 = smov %s621_s7 }
 0x170   : > { %p8_p5 = scmp.ge.s32.totalorder %s11_s8, 6   ;;  %s703_s7 = smov %s705_s9 }
 0x172   :  { %10 = sbr.rel (!%p8_p5) target bundleno = 2 (0x2), region = 62 }

// kernel: _lambda_.11
= control target key start
LH: loop header
LB: loop body
LE: loop exit
PB: predicated region body
PF: predicated region fallthrough
CT: control target
= control target key end

     0   :  { %s1535_s12 = smov 0   ;;  %s1537_s13 = smov 0   ;;  %s1925_s0 = inlined_call_operand.vmem [shape: bf16[4,10,10,64], index: 0, kind: input, shape index: {}]   ;;  %s1926_s1 = inlined_call_operand.vmem [shape: bf16[576,128], index: 1, kind: input, shape index: {}]   ;;  %s1927_s2 = inlined_call_operand.vmem [shape: f32[1,128], index: 2, kind: input, shape index: {}]   ;;  %s1928_s3 = inlined_call_operand.vmem [shape: bf16[4,8,8,128], index: 3, kind: output, shape index: {}]  }
   0x1   :  { %s1539_s14 = smov 0  }
   0x2 LB: > { %s25_s15 = sadd.s32 1, %s1508_s13  ;;  %p1192_p0 = scmp.ge.s32.totalorder %s1512_s14, 1  ;;  %s1512_s14 = sphi %s1539_s14, %s13_s14   ;;  %s1508_s13 = sphi %s1537_s13, %s1930_s13   ;;  %s1504_s12 = sphi %s1535_s12, %s1929_s12  }
   0x3   : > { %p27_p1 = scmp.ge.s32.totalorder %s25_s15, 4  ;;  %p155_p2 = scmp.lt.s32.totalorder %s1512_s14, 5 }
   0x5   : > { %s1932_s15 = smov (%p27_p1, %s25_s15), 0  ;;  %p156_p3 = pnand %p1192_p0, %p155_p2 }
   0x6   : > { %p185_p4 = scmp.lt.s32.totalorder (!%p156_p3), %s1504_s12, 3  ;;  %v1454_v0 = vld [vmem:[%s1926_s1 + $0xc0] sm:$0xff] (!%p156_p3)   ;;  %v1458_v4 = vld [vmem:[%s1926_s1 + $0xc8] sm:$0xff] (!%p156_p3)   ;;  %s1514_s5 = smov (!%p156_p3), 64   ;;  %v1462_v40 = vld [vmem:[%s1926_s1 + $0xd0] sm:$0xff] (!%p156_p3)   ;;  %vm412_vm0 = vcmask (!%p156_p3), 523264  }
   0x7   : > { %159 = sbr.rel (%p156_p3) target bundleno = 420 (0x1a4), region = 32  ;;  %v1455_v1 = vld [vmem:[%s1926_s1 + $0x80] sm:$0xff] (!%p156_p3)   ;;  %1338 = vmatprep.subr.bf16.mxu1 (!%p156_p3), %v1454_v0  ;;  %v1459_v5 = vld [vmem:[%s1926_s1 + $0x88] sm:$0xff] (!%p156_p3)   ;;  %v1463_v43 = vld [vmem:[%s1926_s1 + $0x90] sm:$0xff] (!%p156_p3)  }
   0x8   : > { %v1456_v2 = vld [vmem:[%s1926_s1 + $0x40] sm:$0xff] (!%p156_p3)   ;;  %1339 = vmatpush3.bf16.msra.mxu1 (!%p156_p3), %v1455_v1  ;;  %v1460_v24 = vld [vmem:[%s1926_s1 + $0x48] sm:$0xff] (!%p156_p3)   ;;  %v1464_v54 = vld [vmem:[%s1926_s1 + $0x50] sm:$0xff] (!%p156_p3)  }
   0x9   : > { %v1457_v3 = vld [vmem:[%s1926_s1] sm:$0xff] (!%p156_p3)   ;;  %1298 = vmatprep.subr.bf16.mxu0 (!%p156_p3), %v1456_v2  ;;  %1340 = vmatprep.subr.bf16.mxu1 (!%p156_p3), %v1458_v4  ;;  %v1461_v35 = vld [vmem:[%s1926_s1 + $0x8] sm:$0xff] (!%p156_p3)   ;;  %v1465_v58 = vld [vmem:[%s1926_s1 + $0x10] sm:$0xff] (!%p156_p3)  }
   0xa   : > { %1299 = vmatpush3.bf16.msra.mxu0 (!%p156_p3), %v1457_v3  ;;  %v1466_v63 = vld [vmem:[%s1926_s1 + $0xd8] sm:$0xff] (!%p156_p3)  }
   0xb   : > { %1300 = vmatprep.subr.bf16.mxu0 (!%p156_p3), %v1460_v24 }
   0xc   : > { %1341 = vmatpush3.bf16.msra.mxu1 (!%p156_p3), %v1459_v5  ;;  %v1467_v5 = vld [vmem:[%s1926_s1 + $0x98] sm:$0xff] (!%p156_p3)  }
   0xd   : > { %1342 = vmatprep.subr.bf16.mxu1 (!%p156_p3), %v1462_v40 }
   0xe   : > { %s1934_s12 = smov (!%p185_p4, %s1504_s12), 3  ;;  %1301 = vmatpush3.bf16.msra.mxu0 %v1461_v35  ;;  %v1473_v35 = vld [vmem:[%s1926_s1 + $0x20] sm:$0xff]  }
   0xf   : > { %s1410_s22 = smul.u32 80, %s1934_s12  ;;  %1302 = vmatprep.subr.bf16.mxu0 %v1464_v54  ;;  %s1274_s27 = sshll.u32 %s1934_s12, 5 }
  0x10   : > { %1343 = vmatpush3.bf16.msra.mxu1 %v1463_v43  ;;  %v1477_v43 = vld [vmem:[%s1926_s1 + $0x28] sm:$0xff]   ;;  %s199_s30 = scalar_lea.vmem %s1928_s3, %s1274_s27 }
  0x11   : > { %s1574_s29 = scalar_lea.vmem %s1925_s0, %s1410_s22  ;;  %1344 = vmatprep.subr.bf16.mxu1 %v1466_v63  ;;  %v1486_v63 = vld [vmem:[%s1926_s1 + $0x100] sm:$0xff]  }
  0x12   : > { %v1580_v6 = vld [vmem:[%s1574_s29 + $0x8] sm:$0xf]  ;;  %v205_v7 = vld [vmem:[%s1574_s29 + $0xc] sm:$0x1]  ;;  %v1584_v8 = vld [vmem:[%s1574_s29 + $0x10] sm:$0xf]  ;;  %1303 = vmatpush3.bf16.msra.mxu0 %v1465_v58 }
  0x13   : > { %v1204_v9 = vcombine.low %v1580_v6, %v1580_v6  ;;  %v1589_v10 = vcombine.low %v1580_v6, %v205_v7  ;;  %v207_v11 = vld [vmem:[%s1574_s29 + $0x14] sm:$0x1]  ;;  %v1593_v12 = vld [vmem:[%s1574_s29 + $0x18] sm:$0xf]  ;;  %v209_v13 = vld [vmem:[%s1574_s29 + $0x1c] sm:$0x1]  ;;  %v1205_v20 = vcombine.low %v1584_v8, %v1584_v8 }
  0x14   : > { %v1198_v14 = vcombine.low %v1584_v8, %v207_v11  ;;  %v1598_v15 = vcombine.low %v1593_v12, %v209_v13  ;;  %v1601_v16 = vld [vmem:[%s1574_s29] sm:$0xf]  ;;  %v203_v17 = vld [vmem:[%s1574_s29 + $0x4] sm:$0x1]  ;;  %v1605_v18 = vld [vmem:[%s1574_s29 + $0x28] sm:$0xf]  ;;  %1345 = vmatpush3.bf16.msra.mxu1 %v1467_v5 }
  0x15   : > { %352 = vrot.lane.b32.xlu1 %v1204_v9, %s1514_s5  ;;  %v335_v19 = vrot.slane %v1589_v10, 1  ;;  %v272_v21 = vshll.u32 %v1589_v10, 16  ;;  %v1613_v22 = vcombine.low %v1601_v16, %v203_v17  ;;  %v213_v23 = vld [vmem:[%s1574_s29 + $0x2c] sm:$0x1]  ;;  %v1620_v27 = vld [vmem:[%s1574_s29 + $0x20] sm:$0xf]  ;;  %v1208_v54 = vcombine.low %v1605_v18, %v1605_v18 }
  0x16   : > { %v277_v25 = vshrl.u32 %v1198_v14, 16  ;;  %v279_v26 = vshll.u32 %v1198_v14, 16  ;;  %v286_v28 = vshll.u32 %v1598_v15, 16  ;;  %v211_v30 = vld [vmem:[%s1574_s29 + $0x24] sm:$0x1]  ;;  %v284_v32 = vshrl.u32 %v1598_v15, 16 }
  0x17   : > { %379 = vrot.lane.b32.xlu0 %v335_v19, %s1514_s5  ;;  %v265_v29 = vshll.u32 %v1613_v22, 16  ;;  %v1630_v33 = vcombine.low %v1605_v18, %v213_v23  ;;  %v1200_v34 = vcombine.low %v1620_v27, %v211_v30  ;;  %v1637_v36 = vrot.slane %v1198_v14, 1  ;;  %v1656_v50 = vld [vmem:[%s1574_s29 + $0x38] sm:$0xf]  ;;  %v217_v51 = vld [vmem:[%s1574_s29 + $0x3c] sm:$0x1] }
  0x18   : > { %v281_v31 = vrot.slane %v279_v26, 1  ;;  %v288_v37 = vrot.slane %v286_v28, 1  ;;  %v270_v38 = vshrl.u32 %v1589_v10, 16  ;;  %v274_v39 = vrot.slane %v272_v21, 1  ;;  %v1660_v52 = vld [vmem:[%s1574_s29 + $0x40] sm:$0xf] }
  0x19   : > { %354 = vrot.lane.b32.xlu1 %v1205_v20, %s1514_s5  ;;  %v300_v42 = vshll.u32 %v1630_v33, 16  ;;  %v263_v44 = vshrl.u32 %v1613_v22, 16  ;;  %v267_v45 = vrot.slane %v265_v29, 1  ;;  %v298_v46 = vshrl.u32 %v1630_v33, 16  ;;  %v219_v53 = vld [vmem:[%s1574_s29 + $0x44] sm:$0x1] }
  0x1a   : > { %v1643_v41 = vor.u32 %v281_v31, %v277_v25  ;;  %v293_v47 = vshll.u32 %v1200_v34, 16  ;;  %v1653_v48 = vor.u32 %v288_v37, %v284_v32  ;;  %v1668_v55 = vor.u32 %v274_v39, %v270_v38  ;;  %v1671_v56 = vld [vmem:[%s1574_s29 + $0x48] sm:$0xf]  ;;  %v221_v57 = vld [vmem:[%s1574_s29 + $0x4c] sm:$0x1]  ;;  %v1468_v13 = vld [vmem:[%s1926_s1 + $0x58] sm:$0xff]  }
  0x1b   : > { %v302_v49 = vrot.slane %v300_v42, 1  ;;  %v291_v59 = vshrl.u32 %v1200_v34, 16  ;;  %v1678_v60 = vld [vmem:[%s1574_s29 + $0x30] sm:$0xf]  ;;  %v268_v61 = vor.u32 %v267_v45, %v263_v44  ;;  %v1690_v1 = vcombine.low %v1656_v50, %v217_v51  ;;  %v215_v2 = vld [vmem:[%s1574_s29 + $0x34] sm:$0x1]  ;;  %1304 = vmatprep.subr.bf16.mxu0 %v1468_v13 }
  0x1c   : > { %322 = vrot.lane.b32.xlu0 %v1643_v41, %s1514_s5  ;;  %v295_v62 = vrot.slane %v293_v47, 1  ;;  %v1694_v3 = vcombine.low %v1660_v52, %v219_v53  ;;  %v1697_v4 = vcombine.low %v1671_v56, %v221_v57  ;;  %v1702_v7 = vrot.slane %v1200_v34, 1  ;;  %v1469_v21 = vld [vmem:[%s1926_s1 + $0x18] sm:$0xff]   ;;  %v1470_v26 = vld [vmem:[%s1926_s1 + $0xe0] sm:$0xff]   ;;  %v1474_v38 = vld [vmem:[%s1926_s1 + $0xe8] sm:$0xff]  }
  0x1d   : > { %381 = vrot.lane.b32.xlu1 %v1637_v36, %s1514_s5  ;;  %v1687_v0 = vor.u32 %v302_v49, %v298_v46  ;;  %v312_v17 = vshrl.u32 %v1690_v1, 16  ;;  %v1202_v20 = vcombine.low %v1678_v60, %v215_v2  ;;  %v1207_v23 = vcombine.low %v1620_v27, %v1620_v27  ;;  %1305 = vmatpush3.bf16.msra.mxu0 %v1469_v21  ;;  %v1471_v30 = vld [vmem:[%s1926_s1 + $0xa0] sm:$0xff]   ;;  %v1476_v42 = vld [vmem:[%s1926_s1 + $0x68] sm:$0xff]   ;;  %v1478_v44 = vld [vmem:[%s1926_s1 + $0xf0] sm:$0xff]  }
  0x1e   : > { %v378_v9 = vrot.slane %v1694_v3, 1  ;;  %v411_v11 = vrot.slane %v1697_v4, 1  ;;  %v1710_v14 = vor.u32 %v295_v62, %v291_v59  ;;  %v314_v24 = vshll.u32 %v1690_v1, 16  ;;  %1346 = vmatprep.subr.bf16.mxu1 %v1470_v26  ;;  %v1472_v32 = vld [vmem:[%s1926_s1 + $0x60] sm:$0xff]   ;;  %v1479_v46 = vld [vmem:[%s1926_s1 + $0xb0] sm:$0xff]   ;;  %v1482_v53 = vld [vmem:[%s1926_s1 + $0xf8] sm:$0xff]  }
  0x1f   : > { %v1206_v28 = vcombine.low %v1593_v12, %v1593_v12  ;;  %v307_v29 = vshll.u32 %v1202_v20, 16  ;;  %v1741_v34 = vrot.slane %v1598_v15, 1  ;;  %1347 = vmatpush3.bf16.msra.mxu1 %v1471_v30  ;;  %v305_v37 = vshrl.u32 %v1202_v20, 16  ;;  %1306 = vmatprep.subr.bf16.mxu0 %v1472_v32  ;;  %v1475_v15 = vld [vmem:[%s1926_s1 + $0xa8] sm:$0xff]   ;;  %v1480_v49 = vld [vmem:[%s1926_s1 + $0x70] sm:$0xff]   ;;  %v1483_v58 = vld [vmem:[%s1926_s1 + $0xb8] sm:$0xff]  }
  0x20   : > { %324 = vrot.lane.b32.xlu0 %v1653_v48, %s1514_s5  ;;  %v1724_v25 = vcombine.low %v378_v9, %v411_v11  ;;  %v316_v31 = vrot.slane %v314_v24, 1  ;;  %1348 = vmatprep.subr.bf16.mxu1 %v1474_v38  ;;  %v1209_v47 = vcombine.low %v1678_v60, %v1678_v60  ;;  %v1481_v51 = vld [vmem:[%s1926_s1 + $0x30] sm:$0xff]   ;;  %v1790_v57 = vrot.slane %v1202_v20, 1  ;;  %v1485_v62 = vld [vmem:[%s1926_s1 + $0x38] sm:$0xff]  }
  0x21   : > { %320 = vrot.lane.b32.xlu1 %v1668_v55, %s1514_s5  ;;  %v309_v39 = vrot.slane %v307_v29, 1  ;;  %1307 = vmatpush3.bf16.msra.mxu0 %v1473_v35  ;;  %v403_v59 = vshll.u32 %v1697_v4, 16  ;;  %v1808_v2 = vrot.slane %v1630_v33, 1  ;;  %v374_v5 = vshll.u32 %v1694_v3, 16 }
  0x22   : > { %v1755_v40 = vor.u32 %v316_v31, %v312_v17  ;;  %1308 = vmatprep.subr.bf16.mxu0 %v1476_v42  ;;  %v1211_v11 = vcombine.low %v1660_v52, %v1660_v52  ;;  %v401_v13 = vshrl.u32 %v1697_v4, 16  ;;  %v1210_v33 = vcombine.low %v1656_v50, %v1656_v50 }
  0x23   : > { %1349 = vmatpush3.bf16.msra.mxu1 %v1475_v15  ;;  %v1768_v45 = vor.u32 %v309_v39, %v305_v37  ;;  %v405_v17 = vrot.slane %v403_v59, 1  ;;  %v372_v20 = vshrl.u32 %v1694_v3, 16  ;;  %v376_v21 = vrot.slane %v374_v5, 1 }
  0x24   : > { %318 = vrot.lane.b32.xlu0 %v268_v61, %s1514_s5  ;;  %1350 = vmatprep.subr.bf16.mxu1 %v1478_v44  ;;  %v1484_v61 = vld [vmem:[%s1926_s1 + $0x78] sm:$0xff]   ;;  %v1829_v4 = vrot.slane %v1690_v1, 1 }
  0x25   : > { %328 = vrot.lane.b32.xlu1 %v1687_v0, %s1514_s5  ;;  %1309 = vmatpush3.bf16.msra.mxu0 %v1477_v43  ;;  %v1823_v24 = vor.u32 %v376_v21, %v372_v20 }
  0x26   : > { %1310 = vmatprep.subr.bf16.mxu0 %v1480_v49 }
  0x27   : > { %1351 = vmatpush3.bf16.msra.mxu1 %v1479_v46 }
  0x28   : > { %326 = vrot.lane.b32.xlu0 %v1710_v14, %s1514_s5  ;;  %1352 = vmatprep.subr.bf16.mxu1 %v1482_v53 }
  0x29   : > { %358 = vrot.lane.b32.xlu1 %v1207_v23, %s1514_s5  ;;  %1311 = vmatpush3.bf16.msra.mxu0 %v1481_v51  ;;  %v406_v23 = vor.u32 %v405_v17, %v401_v13 }
  0x2a   : > { %1312 = vmatprep.subr.bf16.mxu0 %v1484_v61 }
  0x2b   : > { %1353 = vmatpush3.bf16.msra.mxu1 %v1483_v58 }
  0x2c   : > { %356 = vrot.lane.b32.xlu0 %v1206_v28, %s1514_s5  ;;  %1402 = vmatprep.subr.bf16.mxu1 %v1486_v63  ;;  %v334_v28 = vrot.slane %v1613_v22, 1 }
  0x2d   : > { %385 = vrot.lane.b32.xlu1 %v1702_v7, %s1514_s5  ;;  %1313 = vmatpush3.bf16.msra.mxu0 %v1485_v62 }
  0x2e   : > { %1386 = vmatprep.subr.bf16.mxu0 %v1486_v63 }
  0x30   : > { %383 = vrot.lane.b32.xlu0 %v1741_v34, %s1514_s5 }
  0x31   : > { %332 = vrot.lane.b32.xlu1 %v1755_v40, %s1514_s5 }
  0x34   : > { %330 = vrot.lane.b32.xlu0 %v1768_v45, %s1514_s5 }
  0x35   : > { %362 = vrot.lane.b32.xlu1 %v1209_v47, %s1514_s5 }
  0x38   : > { %360 = vrot.lane.b32.xlu0 %v1208_v54, %s1514_s5 }
  0x39   : > { %389 = vrot.lane.b32.xlu1 %v1790_v57, %s1514_s5 }
  0x3c   : > { %387 = vrot.lane.b32.xlu0 %v1808_v2, %s1514_s5 }
  0x3d   : > { %366 = vrot.lane.b32.xlu1 %v1211_v11, %s1514_s5 }
  0x40   : > { %364 = vrot.lane.b32.xlu0 %v1210_v33, %s1514_s5 }
  0x41   : > { %409 = vrot.lane.b32.xlu1 %v406_v23, %s1514_s5 }
  0x44   : > { %407 = vrot.lane.b32.xlu0 %v1823_v24, %s1514_s5 }
  0x45   : > { %393 = vrot.lane.b32.xlu1 %v378_v9, %s1514_s5 }
  0x48   : > { %391 = vrot.lane.b32.xlu0 %v1829_v4, %s1514_s5 }
  0x87   : > { %v353_v26 = vpop.permute.xlu1 %352 }
  0x88   : > { %v439_v31 = vsel %vm412_vm0, %v334_v28, %v353_v26 }
  0x89   : > { %v380_v29 = vpop.permute.xlu0 %379 }
  0x8a   : > { %v463_v10 = vsel %vm412_vm0, %v1668_v55, %v380_v29 }
  0x8b   : > { %v355_v30 = vpop.permute.xlu1 %354 }
  0x8c   : > { %v442_v1 = vsel %vm412_vm0, %v335_v19, %v355_v30 }
  0x8d   : > { %v1216_v32 = vcombine.low %v439_v31, %v442_v1 }
  0x8e   : > { %v323_v35 = vpop.permute.xlu0 %322 }
  0x8f   : > { %v382_v37 = vpop.permute.xlu1 %381  ;;  %920 = vmatprep.mubr.bf16.mxu0 %v1216_v32  ;;  %v421_v22 = vsel %vm412_vm0, %v1584_v8, %v323_v35  ;;  %v1487_v8 = vld [vmem:[%s1926_s1 + $0x108] sm:$0xff]  }
  0x90   : > { %v466_v3 = vsel %vm412_vm0, %v1643_v41, %v382_v37 }
  0x91   : > { %v1217_v19 = vcombine.low %v463_v10, %v466_v3 }
  0x92   : > { %v325_v9 = vpop.permute.xlu0 %324 }
  0x93   : > { %v424_v38 = vsel %vm412_vm0, %v1593_v12, %v325_v9  ;;  %v321_v39 = vpop.permute.xlu1 %320 }
  0x94   : > { %v1218_v15 = vcombine.low %v421_v22, %v424_v38  ;;  %v418_v42 = vsel %vm412_vm0, %v1580_v6, %v321_v39 }
  0x96   : > { %985 = vmatprep.mubr.bf16.mxu1 %v1218_v15  ;;  %v319_v43 = vpop.permute.xlu0 %318 }
  0x97   : > { %v415_v41 = vsel %vm412_vm0, %v1601_v16, %v319_v43  ;;  %986 = vmatmul.mubr.bf16.vlgmr.msra.gmra.mrb[0].mxu1 %v1217_v19  ;;  %v329_v44 = vpop.permute.xlu1 %328  ;;  %v1488_v16 = vld [vmem:[%s1926_s1 + $0x110] sm:$0xff]  }
  0x98   : > { %v1215_v12 = vcombine.low %v415_v41, %v418_v42  ;;  %1406 = vmatpush3.bf16.msra.mxu1 %v1486_v63  ;;  %v430_v55 = vsel %vm412_vm0, %v1605_v18, %v329_v44 }
  0x99   : > { %1403 = vmatprep.subr.bf16.mxu1 %v1487_v8 }
  0x9a   : > { %921 = vmatmul.mubr.bf16.vlgmr.msra.gmra.mrb[0].mxu0 %v1215_v12  ;;  %v327_v46 = vpop.permute.xlu0 %326 }
  0x9b   : > { %v427_v6 = vsel %vm412_vm0, %v1620_v27, %v327_v46  ;;  %v359_v47 = vpop.permute.xlu1 %358  ;;  %1387 = vmatpush3.bf16.msra.mxu0 %v1486_v63  ;;  %v1489_v27 = vld [vmem:[%s1926_s1 + $0x118] sm:$0xff]  }
  0x9c   : > { %v1222_v49 = vcombine.low %v427_v6, %v430_v55  ;;  %1388 = vmatprep.subr.bf16.mxu0 %v1487_v8  ;;  %1407 = vmatpush3.bf16.msra.mxu1 %v1487_v8  ;;  %v448_v51 = vsel %vm412_vm0, %v1741_v34, %v359_v47 }
  0x9d   : > { %1404 = vmatprep.subr.bf16.mxu1 %v1488_v16 }
  0x9e   : > { %993 = vmatprep.mubr.bf16.mxu1 %v1222_v49  ;;  %v357_v18 = vpop.permute.xlu0 %356 }
  0x9f   : > { %v445_v53 = vsel %vm412_vm0, %v1637_v36, %v357_v18  ;;  %v386_v54 = vpop.permute.xlu1 %385  ;;  %1389 = vmatpush3.bf16.msra.mxu0 %v1487_v8 }
  0xa0   : > { %v1220_v58 = vcombine.low %v445_v53, %v448_v51  ;;  %1390 = vmatprep.subr.bf16.mxu0 %v1488_v16  ;;  %1408 = vmatpush3.bf16.msra.mxu1 %v1488_v16  ;;  %v472_v59 = vsel %vm412_vm0, %v1710_v14, %v386_v54 }
  0xa1   : > { %1405 = vmatprep.subr.bf16.mxu1 %v1489_v27 }
  0xa2   : > { %928 = vmatprep.mubr.bf16.mxu0 %v1220_v58  ;;  %v384_v61 = vpop.permute.xlu0 %383 }
  0xa3   : > { %v469_v62 = vsel %vm412_vm0, %v1653_v48, %v384_v61  ;;  %929 = vmatmul.mubr.bf16.gmra.mrb[4].mxu0 %v1218_v15  ;;  %v333_v63 = vpop.permute.xlu1 %332 }
  0xa4   : > { %v1221_v5 = vcombine.low %v469_v62, %v472_v59  ;;  %1391 = vmatpush3.bf16.msra.mxu0 %v1488_v16  ;;  %1409 = vmatpush3.bf16.msra.mxu1 %v1489_v27  ;;  %v436_v11 = vsel %vm412_vm0, %v1656_v50, %v333_v63 }
  0xa5   : > { %1392 = vmatprep.subr.bf16.mxu0 %v1489_v27 }
  0xa6   : > { %994 = vmatmul.mubr.bf16.gmra.mrb[4].mxu1 %v1221_v5  ;;  %v331_v13 = vpop.permute.xlu0 %330 }
  0xa7   : > { %v433_v14 = vsel %vm412_vm0, %v1678_v60, %v331_v13  ;;  %v363_v17 = vpop.permute.xlu1 %362 }
  0xa8   : > { %v1226_v33 = vcombine.low %v433_v14, %v436_v11  ;;  %1393 = vmatpush3.bf16.msra.mxu0 %v1489_v27  ;;  %v454_v48 = vsel %vm412_vm0, %v1808_v2, %v363_v17 }
  0xaa   : > { %1001 = vmatprep.mubr.bf16.mxu1 %v1226_v33  ;;  %v361_v20 = vpop.permute.xlu0 %360 }
  0xab   : > { %v451_v21 = vsel %vm412_vm0, %v1702_v7, %v361_v20  ;;  %v390_v23 = vpop.permute.xlu1 %389 }
  0xac   : > { %v1224_v26 = vcombine.low %v451_v21, %v454_v48  ;;  %v478_v50 = vsel %vm412_vm0, %v1768_v45, %v390_v23  ;;  %v1219_v45 = vcombine.low %v1637_v36, %v1741_v34  ;;  %v1223_v36 = vcombine.low %v1702_v7, %v1808_v2 }
  0xad   : > { %v1227_v34 = vcombine.low %v1790_v57, %v1829_v4 }
  0xae   : > { %936 = vmatprep.mubr.bf16.mxu0 %v1224_v26  ;;  %v388_v28 = vpop.permute.xlu0 %387 }
  0xaf   : > { %v475_v60 = vsel %vm412_vm0, %v1687_v0, %v388_v28  ;;  %937 = vmatmul.mubr.bf16.gmra.mrb[8].mxu0 %v1222_v49  ;;  %v367_v29 = vpop.permute.xlu1 %366 }
  0xb0   : > { %v1225_v30 = vcombine.low %v475_v60, %v478_v50  ;;  %v460_v31 = vsel %vm412_vm0, %v1829_v4, %v367_v29 }
  0xb2   : > { %1002 = vmatmul.mubr.bf16.gmra.mrb[8].mxu1 %v1225_v30  ;;  %v365_v1 = vpop.permute.xlu0 %364 }
  0xb3   : > { %v457_v32 = vsel %vm412_vm0, %v1790_v57, %v365_v1  ;;  %v410_v35 = vpop.permute.xlu1 %409 }
  0xb4   : > { %v1228_v37 = vcombine.low %v457_v32, %v460_v31  ;;  %v490_v3 = vsel %vm412_vm0, %v1671_v56, %v410_v35 }
  0xb6   : > { %944 = vmatprep.mubr.bf16.mxu0 %v1228_v37  ;;  %v408_v0 = vpop.permute.xlu0 %407 }
  0xb7   : > { %v487_v9 = vsel %vm412_vm0, %v1660_v52, %v408_v0  ;;  %945 = vmatmul.mubr.bf16.gmra.mrb[12].mxu0 %v1226_v33  ;;  %v394_v22 = vpop.permute.xlu1 %393 }
  0xb8   : > { %v1230_v38 = vcombine.low %v487_v9, %v490_v3  ;;  %1394 = vmatprep.mubr.msk.bf16.mxu0 %vm412_vm0, %v1219_v45  ;;  %v484_v39 = vsel %vm412_vm0, %v1823_v24, %v394_v22 }
  0xba   : > { %1009 = vmatprep.mubr.bf16.mxu1 %v1230_v38  ;;  %v392_v10 = vpop.permute.xlu0 %391 }
  0xbb   : > { %v481_v56 = vsel %vm412_vm0, %v1755_v40, %v392_v10  ;;  %v1214_v40 = vld [vmem:[%s1927_s2] ss:$0 sm:$0xff] }
  0xbc   : > { %v1229_v52 = vcombine.low %v481_v56, %v484_v39 }
  0xbe   : > { %1010 = vmatmul.mubr.bf16.gmra.mrb[12].mxu1 %v1229_v52 }
  0xbf   : > { %1395 = vmatmul.mubr.msk.bf16.vlgmr.msra.gmra.mrb[16].mxu0 %vm412_vm0, %v1223_v36  ;;  %1398 = vmatprep.mubr.msk.bf16.mxu1 %vm412_vm0, %v1227_v34 }
  0xc6   : > { %1399 = vmatmul.mubr.msk.bf16.vlgmr.msra.gmra.mrb[16].mxu1 %vm412_vm0, %v1724_v25 }
 0x16a   : > { %v1354_v24 = vpop.f32.mrb[0].mxu1 }
 0x16b   : > { %v1355_v15 = vpop.f32.mrb[1].mxu1 }
 0x16c   : > { %v1356_v19 = vadd.f32 %v1355_v15, %v1354_v24  ;;  %v1357_v42 = vpop.f32.mrb[2].mxu1 }
 0x16d   : > { %v1314_v7 = vpop.f32.mrb[0].mxu0  ;;  %v1358_v2 = vpop.f32.mrb[3].mxu1 }
 0x16e   : > { %v1359_v43 = vadd.f32 %v1358_v2, %v1357_v42  ;;  %v1315_v57 = vpop.f32.mrb[1].mxu0 }
 0x16f   : > { %v1316_v4 = vadd.f32 %v1315_v57, %v1314_v7  ;;  %v1317_v41 = vpop.f32.mrb[2].mxu0 }
 0x170   : > { %v1318_v44 = vpop.f32.mrb[3].mxu0 }
 0x171   : > { %v923_v8 = vadd.f32 %v1316_v4, %v1214_v40  ;;  %v1319_v12 = vadd.f32 %v1318_v44, %v1317_v41 }
 0x173   : > { %v926_v55 = vadd.f32 %v1319_v12, %v1214_v40  ;;  %v988_v46 = vadd.f32 %v1356_v19, %v923_v8 }
 0x175   : > { %v991_v25 = vadd.f32 %v1359_v43, %v926_v55 }
 0x176   : > { %v1320_v6 = vpop.f32.mrb[4].mxu0 }
 0x177   : > { %v1321_v47 = vpop.f32.mrb[5].mxu0 }
 0x178   : > { %v1322_v16 = vadd.f32 %v1321_v47, %v1320_v6  ;;  %v1323_v49 = vpop.f32.mrb[6].mxu0 }
 0x179   : > { %v1324_v51 = vpop.f32.mrb[7].mxu0  ;;  %v1360_v18 = vpop.f32.mrb[4].mxu1 }
 0x17a   : > { %v931_v53 = vadd.f32 %v1322_v16, %v1214_v40  ;;  %v1325_v54 = vadd.f32 %v1324_v51, %v1323_v49  ;;  %v1361_v27 = vpop.f32.mrb[5].mxu1 }
 0x17b   : > { %v1362_v58 = vadd.f32 %v1361_v27, %v1360_v18  ;;  %v1363_v59 = vpop.f32.mrb[6].mxu1 }
 0x17c   : > { %v934_v61 = vadd.f32 %v1325_v54, %v1214_v40  ;;  %v1364_v62 = vpop.f32.mrb[7].mxu1 }
 0x17d   : > { %v1365_v63 = vadd.f32 %v1364_v62, %v1363_v59  ;;  %v996_v5 = vadd.f32 %v1362_v58, %v931_v53 }
 0x17f   : > { %v999_v11 = vadd.f32 %v1365_v63, %v934_v61 }
 0x182   : > { %v1326_v13 = vpop.f32.mrb[8].mxu0 }
 0x183   : > { %v1327_v14 = vpop.f32.mrb[9].mxu0 }
 0x184   : > { %v1328_v17 = vadd.f32 %v1327_v14, %v1326_v13  ;;  %v1329_v33 = vpop.f32.mrb[10].mxu0 }
 0x185   : > { %v1330_v48 = vpop.f32.mrb[11].mxu0  ;;  %v1366_v20 = vpop.f32.mrb[8].mxu1 }
 0x186   : > { %v939_v21 = vadd.f32 %v1328_v17, %v1214_v40  ;;  %v1331_v23 = vadd.f32 %v1330_v48, %v1329_v33  ;;  %v1367_v26 = vpop.f32.mrb[9].mxu1 }
 0x187   : > { %v1368_v50 = vadd.f32 %v1367_v26, %v1366_v20  ;;  %v1369_v28 = vpop.f32.mrb[10].mxu1 }
 0x188   : > { %v942_v60 = vadd.f32 %v1331_v23, %v1214_v40  ;;  %v1370_v29 = vpop.f32.mrb[11].mxu1 }
 0x189   : > { %v1371_v30 = vadd.f32 %v1370_v29, %v1369_v28  ;;  %v1004_v31 = vadd.f32 %v1368_v50, %v939_v21 }
 0x18a   : > { %v1332_v1 = vpop.f32.mrb[12].mxu0 }
 0x18b   : > { %v1333_v32 = vpop.f32.mrb[13].mxu0  ;;  %v1007_v35 = vadd.f32 %v1371_v30, %v942_v60 }
 0x18c   : > { %v1334_v37 = vadd.f32 %v1333_v32, %v1332_v1  ;;  %v1335_v45 = vpop.f32.mrb[14].mxu0 }
 0x18d   : > { %v1336_v3 = vpop.f32.mrb[15].mxu0 }
 0x18e   : > { %v1337_v0 = vadd.f32 %v1336_v3, %v1335_v45  ;;  %v947_v39 = vadd.f32 %v1334_v37, %v1214_v40 }
 0x190   : > { %v950_v19 = vadd.f32 %v1337_v0, %v1214_v40 }
 0x191   : > { %v1372_v9 = vpop.f32.mrb[12].mxu1 }
 0x192   : > { %v1373_v22 = vpop.f32.mrb[13].mxu1  ;;  %v1396_v38 = vpop.f32.mrb[16].mxu0 }
 0x193   : > { %v1374_v10 = vadd.f32 %v1373_v22, %v1372_v9  ;;  %v1061_v36 = vadd.f32 %v1396_v38, %v996_v5  ;;  %v1375_v56 = vpop.f32.mrb[14].mxu1  ;;  %v1052_v34 = vpop.f32.mrb[17].mxu0 }
 0x194   : > { %v1053_v52 = vadd.f32 %v1052_v34, %v988_v46  ;;  %v1376_v24 = vpop.f32.mrb[15].mxu1  ;;  %v1397_v15 = vpop.f32.mrb[18].mxu0 }
 0x195   : > { %v1377_v42 = vadd.f32 %v1376_v24, %v1375_v56  ;;  %v1064_v7 = vadd.f32 %v1397_v15, %v999_v11  ;;  %v1055_v2 = vpop.f32.mrb[19].mxu0  ;;  %v1012_v43 = vadd.f32 %v1374_v10, %v947_v39  ;;  %v1085_v4 = vmax.f32 %v1061_v36, 0.0 }
 0x196   : > { %v1056_v57 = vadd.f32 %v1055_v2, %v991_v25  ;;  %v1083_v8 = vmax.f32 %v1053_v52, 0.0 }
 0x197   : > { %v1086_v41 = vmax.f32 %v1064_v7, 0.0  ;;  %v1015_v44 = vadd.f32 %v1377_v42, %v950_v19 }
 0x198   : > { %v1084_v12 = vmax.f32 %v1056_v57, 0.0 }
 0x199   : > { %v1283_v55 = vpack.c.bf16 %v1086_v41, %v1085_v4  ;;  %v1400_v46 = vpop.f32.mrb[16].mxu1 }
 0x19a   : > { %v1278_v6 = vpack.c.bf16 %v1084_v12, %v1083_v8  ;;  %v1077_v47 = vadd.f32 %v1400_v46, %v1012_v43  ;;  %v1068_v40 = vpop.f32.mrb[17].mxu1 }
 0x19b   : > { %1295 = vst [vmem:[%s199_s30 + $0x8] sm:$0xff] %v1283_v55   ;;  %v1069_v16 = vadd.f32 %v1068_v40, %v1004_v31  ;;  %v1401_v49 = vpop.f32.mrb[18].mxu1 }
 0x19c   : > { %1279 = vst [vmem:[%s199_s30] sm:$0xff] %v1278_v6   ;;  %v1080_v51 = vadd.f32 %v1401_v49, %v1015_v44  ;;  %v1071_v25 = vpop.f32.mrb[19].mxu1  ;;  %v1089_v53 = vmax.f32 %v1077_v47, 0.0 }
 0x19d   : > { %v1072_v18 = vadd.f32 %v1071_v25, %v1007_v35  ;;  %v1087_v27 = vmax.f32 %v1069_v16, 0.0 }
 0x19e   : > { %v1090_v54 = vmax.f32 %v1080_v51, 0.0 }
 0x19f   : > { %v1088_v58 = vmax.f32 %v1072_v18, 0.0 }
 0x1a0   : > { %v1293_v59 = vpack.c.bf16 %v1090_v54, %v1089_v53 }
 0x1a1   : > { %v1288_v61 = vpack.c.bf16 %v1088_v58, %v1087_v27 }
 0x1a2   : > { %1297 = vst [vmem:[%s199_s30 + $0x18] sm:$0xff] %v1293_v59  }
 0x1a3   : > { %1296 = vst [vmem:[%s199_s30 + $0x10] sm:$0xff] %v1288_v61  }
 0x1a4 PF: > { %s13_s14 = sadd.s32 1, %s1512_s14   ;;  %s1929_s12 = smov %s1508_s13 }
 0x1a5   : > { %p10_p5 = scmp.ge.s32.totalorder %s13_s14, 6   ;;  %s1930_s13 = smov %s1932_s15 }
 0x1a7   :  { %12 = sbr.rel (!%p10_p5) target bundleno = 2 (0x2), region = 62 }

// kernel: _lambda_.17
= control target key start
LH: loop header
LB: loop body
LE: loop exit
PB: predicated region body
PF: predicated region fallthrough
CT: control target
= control target key end

     0   :  { %7 = vsyncpa [#allocation4], 0  ;;  %s499_s9 = smov 0   ;;  %s501_s10 = smov 0   ;;  %s602_s0 = inlined_call_operand.vmem [shape: f32[4,128,128], index: 0, kind: input, shape index: {}, may-alias: {0,1}]   ;;  %s603_s1 = inlined_call_operand.vmem [shape: f32[4,128,128], index: 1, kind: input, shape index: {}, may-alias: {0,1}]   ;;  %s604_s2 = inlined_call_operand.hbm [shape: f32[1,1], index: 2, kind: output, shape index: {}]  }
   0x1   :  { %s503_s11 = smov 0  }
   0x2 LB: > { %s388_s12 = sadd.s32 4294967295, %s480_s11   ;;  %s25_s13 = sadd.s32 1, %s476_s10  ;;  %s480_s11 = sphi %s503_s11, %s13_s11   ;;  %s476_s10 = sphi %s501_s10, %s607_s10   ;;  %s472_s9 = sphi %s499_s9, %s606_s9  }
   0x3   : > { %p27_p0 = scmp.ge.s32.totalorder %s25_s13, 2  ;;  %p391_p1 = scmp.ge.s32.totalorder %s480_s11, 1 }
   0x4   : > { %p148_p2 = scmp.lt.s32.totalorder %s480_s11, 3 }
   0x5   : > { %s609_s13 = smov (%p27_p0, %s25_s13), 0 }
   0x6   : > { %p149_p3 = pnand %p391_p1, %p148_p2 }
   0x7   : > { %p180_p4 = scmp.lt.s32.totalorder (!%p149_p3), %s472_s9, 3  ;;  %s189_s14 = sadd.s32 (!%p149_p3), 2, %s472_s9 }
   0x8   : > { %152 = sbr.rel (%p149_p3) target bundleno = 270 (0x10e), region = 28  ;;  %p191_p5 = scmp.lt.s32.totalorder (!%p149_p3), %s189_s14, 3 }
   0x9   : > { %p201_p6 = scmp.eq.s32.totalorder (!%p149_p3), %s472_s9, 0  ;;  %s482_s24 = smov (!%p149_p3), 0.0  }
   0xa   : > { %p205_p7 = scmp.eq.s32.totalorder (!%p149_p3), %s472_s9, 1  ;;  %p569_p8 = scmp.eq.s32.totalorder (!%p149_p3), %s388_s12, 1 }
   0xb   : > { %s442_s4 = scalar_lea.hbm (!%p149_p3), %s604_s2, 16 }
   0xc   : > { %p443_p9 = scmp.ne.s32.totalorder (!%p149_p3), %s604_s2, %s442_s4  ;;  %p448_p12 = scmp.lt.u32.totalorder (!%p149_p3), %s442_s4, %s604_s2 }
   0xe   : > { %p444_p10 = pnand (!%p149_p3), %p443_p9, %p569_p8 }
   0xf   : > { %s181_s15 = scalar_select %p180_p4, %s472_s9, 3 }
  0x10   : > { %s611_s14 = smov (!%p191_p5, %s189_s14), 3  ;;  %408 = sst [smem:[#allocation2]] (%p201_p6), %s482_s24 }
  0x11   : > { %s402_s16 = sshll.u32 %s181_s15, 7  ;;  %s403_s17 = sshll.u32 %s611_s14, 7 }
  0x12   : > { %s526_s20 = scalar_lea.vmem %s602_s0, %s402_s16  ;;  %s531_s23 = scalar_lea.vmem %s603_s1, %s403_s17 }
  0x13   : > { %v212_v0 = vld [vmem:[%s526_s20] sm:$0xff]  ;;  %v213_v1 = vld [vmem:[%s526_s20 + $0x8] sm:$0xff]  ;;  %v214_v2 = vld [vmem:[%s526_s20 + $0x10] sm:$0xff]  ;;  %s260_s25 = sld [smem:[#allocation2]]  ;;  %p445_p11 = pneg %p444_p10 }
  0x14   : > { %v228_v3 = vld [vmem:[%s531_s23] sm:$0xff]  ;;  %v229_v4 = vld [vmem:[%s531_s23 + $0x8] sm:$0xff]  ;;  %v230_v5 = vld [vmem:[%s531_s23 + $0x10] sm:$0xff] }
  0x15   : > { %v244_v6 = vsub.f32 %v212_v0, %v228_v3  ;;  %v245_v7 = vsub.f32 %v213_v1, %v229_v4  ;;  %v215_v8 = vld [vmem:[%s526_s20 + $0x18] sm:$0xff]  ;;  %v246_v10 = vsub.f32 %v214_v2, %v230_v5  ;;  %v216_v11 = vld [vmem:[%s526_s20 + $0x20] sm:$0xff]  ;;  %v217_v16 = vld [vmem:[%s526_s20 + $0x28] sm:$0xff]  ;;  %p450_p13 = pnand %p448_p12, %p445_p11 }
  0x16   : > { %v231_v9 = vld [vmem:[%s531_s23 + $0x18] sm:$0xff]  ;;  %v232_v12 = vld [vmem:[%s531_s23 + $0x20] sm:$0xff]  ;;  %v233_v17 = vld [vmem:[%s531_s23 + $0x28] sm:$0xff] }
  0x17   : > { %v247_v13 = vsub.f32 %v215_v8, %v231_v9  ;;  %v261_v14 = vmul.f32 %v244_v6, %v244_v6  ;;  %v262_v15 = vmul.f32 %v245_v7, %v245_v7  ;;  %v248_v18 = vsub.f32 %v216_v11, %v232_v12  ;;  %v218_v20 = vld [vmem:[%s526_s20 + $0x30] sm:$0xff]  ;;  %v219_v25 = vld [vmem:[%s526_s20 + $0x38] sm:$0xff]  ;;  %v220_v30 = vld [vmem:[%s526_s20 + $0x40] sm:$0xff] }
  0x18   : > { %v263_v19 = vmul.f32 %v246_v10, %v246_v10  ;;  %v234_v21 = vld [vmem:[%s531_s23 + $0x30] sm:$0xff]  ;;  %v249_v22 = vsub.f32 %v217_v16, %v233_v17  ;;  %v235_v26 = vld [vmem:[%s531_s23 + $0x38] sm:$0xff]  ;;  %v236_v31 = vld [vmem:[%s531_s23 + $0x40] sm:$0xff] }
  0x19   : > { %v264_v23 = vmul.f32 %v247_v13, %v247_v13  ;;  %v277_v24 = vadd.f32 %v262_v15, %v261_v14  ;;  %v250_v27 = vsub.f32 %v218_v20, %v234_v21  ;;  %v265_v28 = vmul.f32 %v248_v18, %v248_v18  ;;  %v221_v35 = vld [vmem:[%s526_s20 + $0x48] sm:$0xff]  ;;  %v222_v40 = vld [vmem:[%s526_s20 + $0x50] sm:$0xff]  ;;  %v223_v45 = vld [vmem:[%s526_s20 + $0x58] sm:$0xff] }
  0x1a   : > { %v251_v32 = vsub.f32 %v219_v25, %v235_v26  ;;  %v266_v33 = vmul.f32 %v249_v22, %v249_v22  ;;  %v237_v36 = vld [vmem:[%s531_s23 + $0x48] sm:$0xff]  ;;  %v252_v37 = vsub.f32 %v220_v30, %v236_v31  ;;  %v238_v41 = vld [vmem:[%s531_s23 + $0x50] sm:$0xff]  ;;  %v239_v46 = vld [vmem:[%s531_s23 + $0x58] sm:$0xff] }
  0x1b   : > { %v278_v29 = vadd.f32 %v277_v24, %v263_v19  ;;  %v267_v38 = vmul.f32 %v250_v27, %v250_v27  ;;  %v253_v42 = vsub.f32 %v221_v35, %v237_v36  ;;  %v254_v47 = vsub.f32 %v222_v40, %v238_v41  ;;  %v224_v50 = vld [vmem:[%s526_s20 + $0x60] sm:$0xff]  ;;  %v225_v55 = vld [vmem:[%s526_s20 + $0x68] sm:$0xff]  ;;  %v226_v60 = vld [vmem:[%s526_s20 + $0x70] sm:$0xff] }
  0x1c   : > { %v268_v43 = vmul.f32 %v251_v32, %v251_v32  ;;  %v269_v48 = vmul.f32 %v252_v37, %v252_v37  ;;  %v240_v51 = vld [vmem:[%s531_s23 + $0x60] sm:$0xff]  ;;  %v255_v52 = vsub.f32 %v223_v45, %v239_v46  ;;  %v241_v56 = vld [vmem:[%s531_s23 + $0x68] sm:$0xff]  ;;  %v242_v61 = vld [vmem:[%s531_s23 + $0x70] sm:$0xff] }
  0x1d   : > { %v279_v34 = vadd.f32 %v278_v29, %v264_v23  ;;  %v270_v53 = vmul.f32 %v253_v42, %v253_v42  ;;  %v256_v57 = vsub.f32 %v224_v50, %v240_v51  ;;  %v271_v58 = vmul.f32 %v254_v47, %v254_v47  ;;  %v227_v1 = vld [vmem:[%s526_s20 + $0x78] sm:$0xff] }
  0x1e   : > { %v257_v62 = vsub.f32 %v225_v55, %v241_v56  ;;  %v272_v63 = vmul.f32 %v255_v52, %v255_v52  ;;  %v243_v2 = vld [vmem:[%s531_s23 + $0x78] sm:$0xff]  ;;  %v258_v3 = vsub.f32 %v226_v60, %v242_v61 }
  0x1f   : > { %v280_v39 = vadd.f32 %v279_v34, %v265_v28  ;;  %v273_v4 = vmul.f32 %v256_v57, %v256_v57  ;;  %v259_v6 = vsub.f32 %v227_v1, %v243_v2 }
  0x20   : > { %v274_v7 = vmul.f32 %v257_v62, %v257_v62  ;;  %v275_v9 = vmul.f32 %v258_v3, %v258_v3 }
  0x21   : > { %v281_v44 = vadd.f32 %v280_v39, %v266_v33  ;;  %v276_v11 = vmul.f32 %v259_v6, %v259_v6 }
  0x23   : > { %v282_v49 = vadd.f32 %v281_v44, %v267_v38 }
  0x25   : > { %v283_v54 = vadd.f32 %v282_v49, %v268_v43 }
  0x27   : > { %v284_v59 = vadd.f32 %v283_v54, %v269_v48 }
  0x29   : > { %v285_v0 = vadd.f32 %v284_v59, %v270_v53 }
  0x2b   : > { %v286_v5 = vadd.f32 %v285_v0, %v271_v58 }
  0x2d   : > { %v287_v8 = vadd.f32 %v286_v5, %v272_v63 }
  0x2f   : > { %v288_v10 = vadd.f32 %v287_v8, %v273_v4 }
  0x31   : > { %v289_v12 = vadd.f32 %v288_v10, %v274_v7 }
  0x33   : > { %v290_v13 = vadd.f32 %v289_v12, %v275_v9 }
  0x35   : > { %v291_v14 = vadd.f32 %v290_v13, %v276_v11 }
  0x37   : > { %292 = vadd.xlane.f32.xlu0 %v291_v14 }
  0xc4   : > { %v293_v15 = vpop.xlane.xlu0 %292 }
  0xc5   : > { %v294_v16 = vrot.slane %v293_v15, 4 }
  0xc7   : > { %v295_v17 = vadd.f32 %v294_v16, %v293_v15 }
  0xc9   : > { %v296_v18 = vrot.slane %v295_v17, 2 }
  0xcb   : > { %v297_v19 = vadd.f32 %v296_v18, %v295_v17 }
  0xcd   : > { %v298_v20 = vrot.slane %v297_v19, 1 }
  0xcf   : > { %v299_v21 = vadd.f32 %v298_v20, %v297_v19 }
  0xd1   : > { %406 = vpush %v299_v21 }
 0x102   : > { %s407_s26 = spop %406 }
 0x103   : > { %s301_s27 = sadd.f32 %s407_s26, %s260_s25 }
 0x105   : > { %303 = sst [smem:[#allocation2]] %s301_s27  ;;  %s307_s29 = smul.f32 3.0517578e-05, %s301_s27 }
 0x107   : > { %409 = sst [smem:[#allocation3]] (%p205_p7), %s307_s29 }
 0x108   : > { %453 = shalt.err (!%p450_p13)
}
 0x109   : > { %s483_s9 = smov [#allocation3]  }
 0x10a   : > { %411 = dma.smem_to_hbm (%p569_p8), %s483_s9, 16, %s604_s2, [#allocation4]  }
 0x10b   : > { %467 = dma.done.wait (%p569_p8), [#allocation4], 16  }
 0x10c   : > { %469 = vsyncadd (%p569_p8), [#allocation4], 4294967280 }
 0x10d   : > { %323 = sfence }
 0x10e PF: > { %s13_s11 = sadd.s32 1, %s480_s11   ;;  %s606_s9 = smov %s476_s10 }
 0x10f   : > { %p10_p0 = scmp.ge.s32.totalorder %s13_s11, 4   ;;  %s607_s10 = smov %s609_s13 }
 0x111   :  { %12 = sbr.rel (!%p10_p0) target bundleno = 2 (0x2), region = 69 }
 0x118   :  { %329 = vsyncpa [#allocation4], 1 }
 0x119   :  { %331 = vsyncpa [#allocation4 + $0x1], 1 }

// kernel: _lambda_.12
= control target key start
LH: loop header
LB: loop body
LE: loop exit
PB: predicated region body
PF: predicated region fallthrough
CT: control target
= control target key end

     0   :  { %s1955_s12 = smov 0   ;;  %s1957_s13 = smov 0   ;;  %s2380_s0 = inlined_call_operand.vmem [shape: bf16[4,10,10,128], index: 0, kind: input, shape index: {}]   ;;  %s2381_s1 = inlined_call_operand.vmem [shape: bf16[1152,128], index: 1, kind: input, shape index: {}]   ;;  %s2382_s2 = inlined_call_operand.vmem [shape: f32[1,128], index: 2, kind: input, shape index: {}]   ;;  %s2383_s3 = inlined_call_operand.vmem [shape: bf16[4,8,8,128], index: 3, kind: output, shape index: {}]  }
   0x1   :  { %s1959_s14 = smov 0  }
   0x2 LB: > { %s25_s15 = sadd.s32 1, %s1929_s13  ;;  %p1443_p0 = scmp.ge.s32.totalorder %s1933_s14, 1  ;;  %s1933_s14 = sphi %s1959_s14, %s13_s14   ;;  %s1929_s13 = sphi %s1957_s13, %s2385_s13   ;;  %s1925_s12 = sphi %s1955_s12, %s2384_s12  }
   0x3   : > { %p27_p1 = scmp.ge.s32.totalorder %s25_s15, 4  ;;  %p155_p2 = scmp.lt.s32.totalorder %s1933_s14, 5 }
   0x5   : > { %s2387_s15 = smov (%p27_p1, %s25_s15), 0  ;;  %p156_p3 = pnand %p1443_p0, %p155_p2 }
   0x6   : > { %v1820_v0 = vld [vmem:[%s2381_s1 + $0x40] sm:$0xff] (!%p156_p3)   ;;  %v1824_v4 = vld [vmem:[%s2381_s1 + $0x48] sm:$0xff] (!%p156_p3)   ;;  %v1828_v8 = vld [vmem:[%s2381_s1 + $0x50] sm:$0xff] (!%p156_p3)   ;;  %p185_p4 = scmp.lt.s32.totalorder (!%p156_p3), %s1925_s12, 3 }
   0x7   : > { %159 = sbr.rel (%p156_p3) target bundleno = 327 (0x147), region = 32  ;;  %v1821_v1 = vld [vmem:[%s2381_s1 + $0xc0] sm:$0xff] (!%p156_p3)   ;;  %1583 = vmatprep.subr.bf16.mxu0 (!%p156_p3), %v1820_v0  ;;  %v1825_v5 = vld [vmem:[%s2381_s1 + $0xc8] sm:$0xff] (!%p156_p3)   ;;  %v1829_v9 = vld [vmem:[%s2381_s1 + $0xd0] sm:$0xff] (!%p156_p3)  }
   0x8   : > { %v1822_v2 = vld [vmem:[%s2381_s1] sm:$0xff] (!%p156_p3)   ;;  %1623 = vmatprep.subr.bf16.mxu1 (!%p156_p3), %v1821_v1  ;;  %v1826_v6 = vld [vmem:[%s2381_s1 + $0x8] sm:$0xff] (!%p156_p3)   ;;  %v1830_v10 = vld [vmem:[%s2381_s1 + $0x10] sm:$0xff] (!%p156_p3)  }
   0x9   : > { %v1823_v3 = vld [vmem:[%s2381_s1 + $0x80] sm:$0xff] (!%p156_p3)   ;;  %1584 = vmatpush3.bf16.msra.mxu0 (!%p156_p3), %v1822_v2  ;;  %v1827_v7 = vld [vmem:[%s2381_s1 + $0x88] sm:$0xff] (!%p156_p3)   ;;  %v1831_v11 = vld [vmem:[%s2381_s1 + $0x90] sm:$0xff] (!%p156_p3)  }
   0xa   : > { %1624 = vmatpush3.bf16.msra.mxu1 (!%p156_p3), %v1823_v3  ;;  %1585 = vmatprep.subr.bf16.mxu0 (!%p156_p3), %v1824_v4  ;;  %v1832_v12 = vld [vmem:[%s2381_s1 + $0x58] sm:$0xff] (!%p156_p3)   ;;  %v1836_v16 = vld [vmem:[%s2381_s1 + $0x60] sm:$0xff] (!%p156_p3)   ;;  %v1840_v20 = vld [vmem:[%s2381_s1 + $0x68] sm:$0xff] (!%p156_p3)  }
   0xb   : > { %1625 = vmatprep.subr.bf16.mxu1 (!%p156_p3), %v1825_v5  ;;  %v1833_v13 = vld [vmem:[%s2381_s1 + $0xd8] sm:$0xff] (!%p156_p3)   ;;  %v1837_v17 = vld [vmem:[%s2381_s1 + $0xe0] sm:$0xff] (!%p156_p3)   ;;  %v1841_v21 = vld [vmem:[%s2381_s1 + $0xe8] sm:$0xff] (!%p156_p3)  }
   0xc   : > { %v1834_v14 = vld [vmem:[%s2381_s1 + $0x18] sm:$0xff] (!%p156_p3)   ;;  %v1838_v18 = vld [vmem:[%s2381_s1 + $0x20] sm:$0xff] (!%p156_p3)   ;;  %v1842_v22 = vld [vmem:[%s2381_s1 + $0x28] sm:$0xff] (!%p156_p3)  }
   0xd   : > { %1586 = vmatpush3.bf16.msra.mxu0 (!%p156_p3), %v1826_v6  ;;  %v1835_v15 = vld [vmem:[%s2381_s1 + $0x98] sm:$0xff] (!%p156_p3)   ;;  %v1839_v19 = vld [vmem:[%s2381_s1 + $0xa0] sm:$0xff] (!%p156_p3)   ;;  %v1843_v23 = vld [vmem:[%s2381_s1 + $0xa8] sm:$0xff] (!%p156_p3)  }
   0xe   : > { %1626 = vmatpush3.bf16.msra.mxu1 %v1827_v7  ;;  %1587 = vmatprep.subr.bf16.mxu0 %v1828_v8  ;;  %s2389_s12 = smov (!%p185_p4, %s1925_s12), 3  ;;  %v1844_v24 = vld [vmem:[%s2381_s1 + $0x70] sm:$0xff]   ;;  %v1848_v28 = vld [vmem:[%s2381_s1 + $0x78] sm:$0xff]   ;;  %v1857_v41 = vld [vmem:[%s2381_s1 + $0x140] sm:$0xff]  }
   0xf   : > { %1627 = vmatprep.subr.bf16.mxu1 %v1829_v9  ;;  %v1845_v25 = vld [vmem:[%s2381_s1 + $0xf0] sm:$0xff]   ;;  %s1795_s22 = smul.u32 80, %s2389_s12  ;;  %v1849_v29 = vld [vmem:[%s2381_s1 + $0xf8] sm:$0xff]   ;;  %v1858_v45 = vld [vmem:[%s2381_s1 + $0x1c0] sm:$0xff]   ;;  %s1559_s30 = sshll.u32 %s2389_s12, 5 }
  0x10   : > { %v1846_v26 = vld [vmem:[%s2381_s1 + $0x30] sm:$0xff]   ;;  %v1850_v30 = vld [vmem:[%s2381_s1 + $0x38] sm:$0xff]   ;;  %v1860_v51 = vld [vmem:[%s2381_s1 + $0x180] sm:$0xff]   ;;  %s199_s7 = scalar_lea.vmem %s2383_s3, %s1559_s30 }
  0x11   : > { %1588 = vmatpush3.bf16.msra.mxu0 %v1830_v10  ;;  %v1847_v27 = vld [vmem:[%s2381_s1 + $0xb0] sm:$0xff]   ;;  %s2073_s6 = scalar_lea.vmem %s2380_s0, %s1795_s22  ;;  %v1851_v31 = vld [vmem:[%s2381_s1 + $0xb8] sm:$0xff]   ;;  %v1859_v56 = vld [vmem:[%s2381_s1 + $0x100] sm:$0xff]  }
  0x12   : > { %1628 = vmatpush3.bf16.msra.mxu1 %v1831_v11  ;;  %1589 = vmatprep.subr.bf16.mxu0 %v1832_v12  ;;  %v202_v32 = vld [vmem:[%s2073_s6] sm:$0xf]  ;;  %v203_v33 = vld [vmem:[%s2073_s6 + $0x4] sm:$0x1]  ;;  %v204_v34 = vld [vmem:[%s2073_s6 + $0x8] sm:$0xf] }
  0x13   : > { %1629 = vmatprep.subr.bf16.mxu1 %v1833_v13  ;;  %v205_v35 = vld [vmem:[%s2073_s6 + $0xc] sm:$0x1]  ;;  %v1447_v36 = vcombine.low %v202_v32, %v203_v33  ;;  %v2086_v37 = vld [vmem:[%s2073_s6 + $0x10] sm:$0xf]  ;;  %v207_v38 = vld [vmem:[%s2073_s6 + $0x14] sm:$0x1]  ;;  %v1458_v58 = vcombine.low %v202_v32, %v204_v34 }
  0x14   : > { %v2089_v39 = vcombine.low %v204_v34, %v205_v35  ;;  %v1461_v40 = vcombine.low %v204_v34, %v2086_v37  ;;  %v2102_v50 = vcombine.low %v2086_v37, %v207_v38  ;;  %v1862_v57 = vld [vmem:[%s2381_s1 + $0x1c8] sm:$0xff]   ;;  %v208_v63 = vld [vmem:[%s2073_s6 + $0x18] sm:$0xf]  ;;  %v209_v1 = vld [vmem:[%s2073_s6 + $0x1c] sm:$0x1] }
  0x15   : > { %1590 = vmatpush3.bf16.msra.mxu0 %v1834_v14  ;;  %v263_v42 = vshrl.u32 %v1447_v36, 16  ;;  %v265_v43 = vshll.u32 %v1447_v36, 16  ;;  %v318_v44 = vrot.slane %v1447_v36, 1  ;;  %v1861_v59 = vld [vmem:[%s2381_s1 + $0x148] sm:$0xff]   ;;  %v2129_v3 = vld [vmem:[%s2073_s6 + $0x20] sm:$0xf]  ;;  %v2135_v6 = vcombine.low %v208_v63, %v209_v1 }
  0x16   : > { %1630 = vmatpush3.bf16.msra.mxu1 %v1835_v15  ;;  %1591 = vmatprep.subr.bf16.mxu0 %v1836_v16  ;;  %v270_v46 = vshrl.u32 %v2089_v39, 16  ;;  %v272_v47 = vshll.u32 %v2089_v39, 16  ;;  %v319_v48 = vrot.slane %v2089_v39, 1  ;;  %v279_v60 = vshll.u32 %v2102_v50, 16  ;;  %v1864_v62 = vld [vmem:[%s2381_s1 + $0x188] sm:$0xff]   ;;  %v1870_v9 = vld [vmem:[%s2381_s1 + $0x1d0] sm:$0xff]  }
  0x17   : > { %1631 = vmatprep.subr.bf16.mxu1 %v1837_v17  ;;  %1106 = vmatprep.mubr.bf16.mxu1 %v1461_v40  ;;  %v267_v49 = vrot.slane %v265_v43, 1  ;;  %v277_v0 = vshrl.u32 %v2102_v50, 16  ;;  %v320_v4 = vrot.slane %v2102_v50, 1  ;;  %v1863_v5 = vld [vmem:[%s2381_s1 + $0x108] sm:$0xff]   ;;  %v211_v7 = vld [vmem:[%s2073_s6 + $0x24] sm:$0x1]  ;;  %v1467_v8 = vcombine.low %v208_v63, %v2129_v3 }
  0x18   : > { %v274_v52 = vrot.slane %v272_v47, 1  ;;  %v1460_v53 = vcombine.low %v318_v44, %v319_v48  ;;  %v281_v2 = vrot.slane %v279_v60, 1  ;;  %v284_v10 = vshrl.u32 %v2135_v6, 16  ;;  %v1869_v14 = vld [vmem:[%s2381_s1 + $0x150] sm:$0xff]   ;;  %v1882_v43 = vld [vmem:[%s2381_s1 + $0x1e0] sm:$0xff]   ;;  %v1902_v39 = vld [vmem:[%s2381_s1 + $0x208] sm:$0xff]  }
  0x19   : > { %1592 = vmatpush3.bf16.msra.mxu0 %v1838_v18  ;;  %v268_v54 = vor.u32 %v267_v49, %v263_v42  ;;  %v286_v11 = vshll.u32 %v2135_v6, 16  ;;  %v2145_v12 = vcombine.low %v2129_v3, %v211_v7  ;;  %v321_v13 = vrot.slane %v2135_v6, 1  ;;  %v1871_v18 = vld [vmem:[%s2381_s1 + $0x110] sm:$0xff]   ;;  %v1883_v44 = vld [vmem:[%s2381_s1 + $0x120] sm:$0xff]  }
  0x1a   : > { %1632 = vmatpush3.bf16.msra.mxu1 %v1839_v19  ;;  %1593 = vmatprep.subr.bf16.mxu0 %v1840_v20  ;;  %v2109_v55 = vor.u32 %v274_v52, %v270_v46  ;;  %v2151_v15 = vor.u32 %v281_v2, %v277_v0  ;;  %v1872_v19 = vld [vmem:[%s2381_s1 + $0x190] sm:$0xff]   ;;  %v1873_v20 = vld [vmem:[%s2381_s1 + $0x158] sm:$0xff]   ;;  %v1884_v49 = vld [vmem:[%s2381_s1 + $0x1a0] sm:$0xff]  }
  0x1b   : > { %1633 = vmatprep.subr.bf16.mxu1 %v1841_v21  ;;  %v288_v16 = vrot.slane %v286_v11, 1  ;;  %v2157_v17 = vcombine.low %v320_v4, %v321_v13  ;;  %v2195_v34 = vld [vmem:[%s2073_s6 + $0x30] sm:$0xf]  ;;  %v215_v35 = vld [vmem:[%s2073_s6 + $0x34] sm:$0x1] }
  0x1c   : > { %v1459_v61 = vcombine.low %v268_v54, %v2109_v55  ;;  %v1895_v11 = vld [vmem:[%s2381_s1 + $0x130] sm:$0xff]  }
  0x1d   : > { %1594 = vmatpush3.bf16.msra.mxu0 %v1842_v22  ;;  %v2168_v21 = vor.u32 %v288_v16, %v284_v10  ;;  %v1874_v22 = vld [vmem:[%s2381_s1 + $0x1d8] sm:$0xff]   ;;  %v1894_v10 = vld [vmem:[%s2381_s1 + $0x1f0] sm:$0xff]  }
  0x1e   : > { %1634 = vmatpush3.bf16.msra.mxu1 %v1843_v23  ;;  %1595 = vmatprep.subr.bf16.mxu0 %v1844_v24  ;;  %v293_v23 = vshll.u32 %v2145_v12, 16  ;;  %v2176_v24 = vcombine.low %v2086_v37, %v208_v63  ;;  %v1881_v37 = vld [vmem:[%s2381_s1 + $0x160] sm:$0xff]  }
  0x1f   : > { %1635 = vmatprep.subr.bf16.mxu1 %v1845_v25  ;;  %1041 = vmatprep.mubr.bf16.mxu0 %v1459_v61  ;;  %v291_v25 = vshrl.u32 %v2145_v12, 16  ;;  %v216_v61 = vld [vmem:[%s2073_s6 + $0x38] sm:$0xf]  ;;  %v2252_v63 = vld [vmem:[%s2073_s6 + $0x40] sm:$0xf] }
  0x20   : > { %v295_v32 = vrot.slane %v293_v23, 1  ;;  %v1479_v2 = vcombine.low %v216_v61, %v2252_v63 }
  0x21   : > { %1596 = vmatpush3.bf16.msra.mxu0 %v1846_v26  ;;  %v322_v26 = vrot.slane %v2145_v12, 1  ;;  %v1904_v12 = vld [vmem:[%s2381_s1 + $0x218] sm:$0xff]  }
  0x22   : > { %1636 = vmatpush3.bf16.msra.mxu1 %v1847_v27  ;;  %1597 = vmatprep.subr.bf16.mxu0 %v1848_v28  ;;  %v2182_v27 = vcombine.low %v2151_v15, %v2168_v21  ;;  %v1875_v28 = vld [vmem:[%s2381_s1 + $0x118] sm:$0xff]  }
  0x23   : > { %1637 = vmatprep.subr.bf16.mxu1 %v1849_v29  ;;  %v1876_v29 = vld [vmem:[%s2381_s1 + $0x198] sm:$0xff]  }
  0x25   : > { %1598 = vmatpush3.bf16.msra.mxu0 %v1850_v30  ;;  %v212_v30 = vld [vmem:[%s2073_s6 + $0x28] sm:$0xf] }
  0x26   : > { %1638 = vmatpush3.bf16.msra.mxu1 %v1851_v31  ;;  %1663 = vmatprep.subr.bf16.mxu0 %v1857_v41  ;;  %v213_v31 = vld [vmem:[%s2073_s6 + $0x2c] sm:$0x1]  ;;  %v1473_v36 = vcombine.low %v212_v30, %v2195_v34  ;;  %v2207_v41 = vcombine.low %v2195_v34, %v215_v35 }
  0x27   : > { %1703 = vmatprep.subr.bf16.mxu1 %v1858_v45  ;;  %v2192_v33 = vcombine.low %v212_v30, %v213_v31  ;;  %v2216_v45 = vor.u32 %v295_v32, %v291_v25  ;;  %v1898_v25 = vld [vmem:[%s2381_s1 + $0x1f8] sm:$0xff]   ;;  %v1463_v32 = vcombine.low %v319_v48, %v320_v4  ;;  %v220_v48 = vld [vmem:[%s2073_s6 + $0x48] sm:$0xf]  ;;  %v1462_v4 = vcombine.low %v2109_v55, %v2151_v15 }
  0x28   : > { %1042 = vmatmul.mubr.bf16.vlgmr.msra.gmra.mrb[0].mxu0 %v1458_v58  ;;  %v307_v54 = vshll.u32 %v2207_v41, 16  ;;  %v305_v60 = vshrl.u32 %v2207_v41, 16  ;;  %v1900_v31 = vld [vmem:[%s2381_s1 + $0x1b8] sm:$0xff]  }
  0x29   : > { %1107 = vmatmul.mubr.bf16.vlgmr.msra.gmra.mrb[0].mxu1 %v1460_v53  ;;  %1664 = vmatpush3.bf16.msra.mxu0 %v1859_v56  ;;  %v298_v38 = vshrl.u32 %v2192_v33, 16  ;;  %v300_v40 = vshll.u32 %v2192_v33, 16  ;;  %v323_v42 = vrot.slane %v2192_v33, 1  ;;  %v1886_v53 = vld [vmem:[%s2381_s1 + $0x1e8] sm:$0xff]   ;;  %v2238_v56 = vcombine.low %v2129_v3, %v212_v30 }
  0x2a   : > { %1704 = vmatpush3.bf16.msra.mxu1 %v1860_v51  ;;  %1114 = vmatprep.mubr.bf16.mxu1 %v1467_v8  ;;  %v1885_v51 = vld [vmem:[%s2381_s1 + $0x168] sm:$0xff]   ;;  %v309_v1 = vrot.slane %v307_v54, 1  ;;  %v324_v3 = vrot.slane %v2207_v41, 1 }
  0x2b   : > { %1705 = vmatprep.subr.bf16.mxu1 %v1862_v57  ;;  %1665 = vmatprep.subr.bf16.mxu0 %v1861_v59  ;;  %v302_v46 = vrot.slane %v300_v40, 1  ;;  %v2222_v47 = vcombine.low %v322_v26, %v323_v42  ;;  %v1887_v57 = vld [vmem:[%s2381_s1 + $0x128] sm:$0xff]  }
  0x2c   : > { %1049 = vmatprep.mubr.bf16.mxu0 %v2182_v27  ;;  %v1888_v59 = vld [vmem:[%s2381_s1 + $0x1a8] sm:$0xff]  }
  0x2d   : > { %1666 = vmatpush3.bf16.msra.mxu0 %v1863_v5  ;;  %v2230_v52 = vor.u32 %v302_v46, %v298_v38  ;;  %v1893_v5 = vld [vmem:[%s2381_s1 + $0x170] sm:$0xff]   ;;  %v1905_v46 = vld [vmem:[%s2381_s1 + $0x220] sm:$0xff]  }
  0x2e   : > { %1706 = vmatpush3.bf16.msra.mxu1 %v1864_v62  ;;  %1667 = vmatprep.subr.bf16.mxu0 %v1869_v14  ;;  %v217_v62 = vld [vmem:[%s2073_s6 + $0x3c] sm:$0x1]  ;;  %v2271_v14 = vor.u32 %v309_v1, %v305_v60 }
  0x2f   : > { %1707 = vmatprep.subr.bf16.mxu1 %v1870_v9  ;;  %v1471_v58 = vcombine.low %v2216_v45, %v2230_v52  ;;  %v2254_v0 = vcombine.low %v216_v61, %v217_v62 }
  0x30   : > { %1050 = vmatmul.mubr.bf16.gmra.mrb[4].mxu0 %v2176_v24  ;;  %v1474_v33 = vcombine.low %v2230_v52, %v2271_v14  ;;  %v1910_v52 = vld [vmem:[%s2381_s1 + $0x238] sm:$0xff]  }
  0x31   : > { %1115 = vmatmul.mubr.bf16.gmra.mrb[4].mxu1 %v2157_v17  ;;  %1668 = vmatpush3.bf16.msra.mxu0 %v1871_v18  ;;  %v312_v7 = vshrl.u32 %v2254_v0, 16  ;;  %v314_v8 = vshll.u32 %v2254_v0, 16  ;;  %v325_v9 = vrot.slane %v2254_v0, 1  ;;  %v1457_v0 = vld [vmem:[%s2382_s2] ss:$0 sm:$0xff] }
  0x32   : > { %1708 = vmatpush3.bf16.msra.mxu1 %v1872_v19  ;;  %1669 = vmatprep.subr.bf16.mxu0 %v1873_v20  ;;  %v1896_v19 = vld [vmem:[%s2381_s1 + $0x1b0] sm:$0xff]   ;;  %v219_v20 = vld [vmem:[%s2073_s6 + $0x44] sm:$0x1] }
  0x33   : > { %1709 = vmatprep.subr.bf16.mxu1 %v1874_v22  ;;  %1122 = vmatprep.mubr.bf16.mxu1 %v1473_v36  ;;  %v316_v16 = vrot.slane %v314_v8, 1  ;;  %v2277_v18 = vcombine.low %v324_v3, %v325_v9  ;;  %v1897_v22 = vld [vmem:[%s2381_s1 + $0x178] sm:$0xff]   ;;  %v2310_v35 = vcombine.low %v2252_v63, %v219_v20  ;;  %v1469_v36 = vcombine.low %v321_v13, %v322_v26 }
  0x34   : > { %1057 = vmatprep.mubr.bf16.mxu0 %v1471_v58  ;;  %v1468_v13 = vcombine.low %v2168_v21, %v2216_v45  ;;  %v1906_v21 = vld [vmem:[%s2381_s1 + $0x228] sm:$0xff]  }
  0x35   : > { %1670 = vmatpush3.bf16.msra.mxu0 %v1875_v28  ;;  %v2286_v23 = vor.u32 %v316_v16, %v312_v7  ;;  %v1476_v28 = vcombine.low %v2195_v34, %v216_v61  ;;  %v1901_v34 = vld [vmem:[%s2381_s1 + $0x200] sm:$0xff]   ;;  %v334_v50 = vshll.u32 %v2310_v35, 16  ;;  %v332_v40 = vshrl.u32 %v2310_v35, 16 }
  0x36   : > { %1710 = vmatpush3.bf16.msra.mxu1 %v1876_v29  ;;  %1671 = vmatprep.subr.bf16.mxu0 %v1881_v37  ;;  %v1899_v29 = vld [vmem:[%s2381_s1 + $0x138] sm:$0xff]   ;;  %v338_v45 = vrot.slane %v2310_v35, 1 }
  0x37   : > { %1711 = vmatprep.subr.bf16.mxu1 %v1882_v43  ;;  %v1477_v30 = vcombine.low %v2271_v14, %v2286_v23  ;;  %v336_v55 = vrot.slane %v334_v50, 1 }
  0x38   : > { %1058 = vmatmul.mubr.bf16.gmra.mrb[8].mxu0 %v2238_v56  ;;  %v1481_v41 = vcombine.low %v325_v9, %v338_v45 }
  0x39   : > { %1123 = vmatmul.mubr.bf16.gmra.mrb[8].mxu1 %v2222_v47  ;;  %1672 = vmatpush3.bf16.msra.mxu0 %v1883_v44  ;;  %v337_v26 = vor.u32 %v336_v55, %v332_v40  ;;  %v1475_v44 = vcombine.low %v323_v42, %v324_v3  ;;  %v1909_v42 = vld [vmem:[%s2381_s1 + $0x230] sm:$0xff]  }
  0x3a   : > { %1712 = vmatpush3.bf16.msra.mxu1 %v1884_v49  ;;  %1673 = vmatprep.subr.bf16.mxu0 %v1885_v51  ;;  %v1482_v51 = vcombine.low %v2252_v63, %v220_v48 }
  0x3b   : > { %1713 = vmatprep.subr.bf16.mxu1 %v1886_v53  ;;  %1130 = vmatprep.mubr.bf16.mxu1 %v1479_v2  ;;  %v1480_v54 = vcombine.low %v2286_v23, %v337_v26 }
  0x3c   : > { %1065 = vmatprep.mubr.bf16.mxu0 %v1477_v30 }
  0x3d   : > { %1674 = vmatpush3.bf16.msra.mxu0 %v1887_v57 }
  0x3e   : > { %1714 = vmatpush3.bf16.msra.mxu1 %v1888_v59  ;;  %1675 = vmatprep.subr.bf16.mxu0 %v1893_v5 }
  0x3f   : > { %1715 = vmatprep.subr.bf16.mxu1 %v1894_v10 }
  0x40   : > { %1066 = vmatmul.mubr.bf16.gmra.mrb[12].mxu0 %v1476_v28 }
  0x41   : > { %1131 = vmatmul.mubr.bf16.gmra.mrb[12].mxu1 %v2277_v18  ;;  %1676 = vmatpush3.bf16.msra.mxu0 %v1895_v11 }
  0x42   : > { %1716 = vmatpush3.bf16.msra.mxu1 %v1896_v19  ;;  %1677 = vmatprep.subr.bf16.mxu0 %v1897_v22 }
  0x43   : > { %1717 = vmatprep.subr.bf16.mxu1 %v1898_v25  ;;  %1236 = vmatprep.mubr.bf16.mxu1 %v2182_v27  ;;  %v221_v27 = vld [vmem:[%s2073_s6 + $0x4c] sm:$0x1] }
  0x44   : > { %1171 = vmatprep.mubr.bf16.mxu0 %v1463_v32  ;;  %v1456_v37 = vcombine.low %v220_v48, %v221_v27 }
  0x45   : > { %1678 = vmatpush3.bf16.msra.mxu0 %v1899_v29 }
  0x46   : > { %1718 = vmatpush3.bf16.msra.mxu1 %v1900_v31  ;;  %1755 = vmatprep.subr.bf16.mxu0 %v1901_v34  ;;  %v347_v38 = vshll.u32 %v1456_v37, 16  ;;  %v345_v15 = vshrl.u32 %v1456_v37, 16  ;;  %v351_v53 = vrot.slane %v1456_v37, 1 }
  0x47   : > { %1779 = vmatprep.subr.bf16.mxu1 %v1901_v34 }
  0x48   : > { %1172 = vmatmul.mubr.bf16.vlgmr.msra.gmra.mrb[16].mxu0 %v1462_v4  ;;  %v349_v6 = vrot.slane %v347_v38, 1 }
  0x49   : > { %1237 = vmatmul.mubr.bf16.vlgmr.msra.gmra.mrb[16].mxu1 %v2176_v24  ;;  %v1903_v24 = vld [vmem:[%s2381_s1 + $0x210] sm:$0xff]   ;;  %1756 = vmatpush3.bf16.msra.mxu0 %v1901_v34 }
  0x4a   : > { %1787 = vmatpush3.bf16.msra.mxu1 %v1901_v34  ;;  %1244 = vmatprep.mubr.bf16.mxu1 %v1471_v58  ;;  %v350_v43 = vor.u32 %v349_v6, %v345_v15 }
  0x4b   : > { %1780 = vmatprep.subr.bf16.mxu1 %v1902_v39  ;;  %1179 = vmatprep.mubr.bf16.mxu0 %v1469_v36 }
  0x4c   : > { %1757 = vmatprep.subr.bf16.mxu0 %v1902_v39  ;;  %v1483_v49 = vcombine.low %v337_v26, %v350_v43 }
  0x4d   : > { %1758 = vmatpush3.bf16.msra.mxu0 %v1902_v39 }
  0x4e   : > { %1788 = vmatpush3.bf16.msra.mxu1 %v1902_v39  ;;  %1759 = vmatprep.subr.bf16.mxu0 %v1903_v24 }
  0x4f   : > { %1781 = vmatprep.subr.bf16.mxu1 %v1903_v24 }
  0x50   : > { %1180 = vmatmul.mubr.bf16.gmra.mrb[20].mxu0 %v1468_v13 }
  0x51   : > { %1245 = vmatmul.mubr.bf16.gmra.mrb[20].mxu1 %v2238_v56  ;;  %1760 = vmatpush3.bf16.msra.mxu0 %v1903_v24  ;;  %v1484_v56 = vcombine.low %v338_v45, %v351_v53 }
  0x52   : > { %1789 = vmatpush3.bf16.msra.mxu1 %v1903_v24  ;;  %1252 = vmatprep.mubr.bf16.mxu1 %v1477_v30 }
  0x53   : > { %1782 = vmatprep.subr.bf16.mxu1 %v1904_v12  ;;  %1187 = vmatprep.mubr.bf16.mxu0 %v1475_v44 }
  0x54   : > { %1761 = vmatprep.subr.bf16.mxu0 %v1904_v12 }
  0x55   : > { %1762 = vmatpush3.bf16.msra.mxu0 %v1904_v12 }
  0x56   : > { %1790 = vmatpush3.bf16.msra.mxu1 %v1904_v12  ;;  %1763 = vmatprep.subr.bf16.mxu0 %v1905_v46 }
  0x57   : > { %1783 = vmatprep.subr.bf16.mxu1 %v1905_v46 }
  0x58   : > { %1188 = vmatmul.mubr.bf16.gmra.mrb[24].mxu0 %v1474_v33 }
  0x59   : > { %1253 = vmatmul.mubr.bf16.gmra.mrb[24].mxu1 %v1476_v28  ;;  %1764 = vmatpush3.bf16.msra.mxu0 %v1905_v46 }
  0x5a   : > { %1791 = vmatpush3.bf16.msra.mxu1 %v1905_v46  ;;  %1260 = vmatprep.mubr.bf16.mxu1 %v1483_v49 }
  0x5b   : > { %1784 = vmatprep.subr.bf16.mxu1 %v1906_v21  ;;  %1195 = vmatprep.mubr.bf16.mxu0 %v1481_v41 }
  0x5c   : > { %1765 = vmatprep.subr.bf16.mxu0 %v1906_v21 }
  0x5d   : > { %1766 = vmatpush3.bf16.msra.mxu0 %v1906_v21 }
  0x5e   : > { %1792 = vmatpush3.bf16.msra.mxu1 %v1906_v21  ;;  %1767 = vmatprep.subr.bf16.mxu0 %v1909_v42 }
  0x5f   : > { %1785 = vmatprep.subr.bf16.mxu1 %v1909_v42 }
  0x60   : > { %1196 = vmatmul.mubr.bf16.gmra.mrb[28].mxu0 %v1480_v54 }
  0x61   : > { %1261 = vmatmul.mubr.bf16.gmra.mrb[28].mxu1 %v1482_v51  ;;  %1768 = vmatpush3.bf16.msra.mxu0 %v1909_v42 }
  0x62   : > { %1793 = vmatpush3.bf16.msra.mxu1 %v1909_v42  ;;  %1775 = vmatprep.mubr.bf16.mxu1 %v2277_v18 }
  0x63   : > { %1786 = vmatprep.subr.bf16.mxu1 %v1910_v52  ;;  %1771 = vmatprep.mubr.bf16.mxu0 %v2157_v17 }
  0x64   : > { %1769 = vmatprep.subr.bf16.mxu0 %v1910_v52 }
  0x65   : > { %1770 = vmatpush3.bf16.msra.mxu0 %v1910_v52 }
  0x66   : > { %1794 = vmatpush3.bf16.msra.mxu1 %v1910_v52 }
  0x68   : > { %1772 = vmatmul.mubr.bf16.vlgmr.msra.gmra.mrb[32].mxu0 %v2222_v47 }
  0x69   : > { %1776 = vmatmul.mubr.bf16.vlgmr.msra.gmra.mrb[32].mxu1 %v1484_v56 }
  0xfb   : > { %v1599_v63 = vpop.f32.mrb[0].mxu0 }
  0xfc   : > { %v1639_v57 = vpop.f32.mrb[0].mxu1  ;;  %v1600_v1 = vpop.f32.mrb[1].mxu0 }
  0xfd   : > { %v1640_v58 = vpop.f32.mrb[1].mxu1  ;;  %v1601_v2 = vadd.f32 %v1600_v1, %v1599_v63  ;;  %v1602_v3 = vpop.f32.mrb[2].mxu0 }
  0xfe   : > { %v1641_v59 = vadd.f32 %v1640_v58, %v1639_v57  ;;  %v1642_v60 = vpop.f32.mrb[2].mxu1  ;;  %v1603_v17 = vpop.f32.mrb[3].mxu0 }
  0xff   : > { %v1643_v61 = vpop.f32.mrb[3].mxu1  ;;  %v1044_v5 = vadd.f32 %v1601_v2, %v1457_v0  ;;  %v1604_v7 = vadd.f32 %v1603_v17, %v1602_v3 }
 0x100   : > { %v1644_v62 = vadd.f32 %v1643_v61, %v1642_v60 }
 0x101   : > { %v1109_v9 = vadd.f32 %v1641_v59, %v1044_v5  ;;  %v1047_v47 = vadd.f32 %v1604_v7, %v1457_v0 }
 0x103   : > { %v1112_v16 = vadd.f32 %v1644_v62, %v1047_v47  ;;  %v1605_v20 = vpop.f32.mrb[4].mxu0 }
 0x104   : > { %v1645_v8 = vpop.f32.mrb[4].mxu1  ;;  %v1606_v22 = vpop.f32.mrb[5].mxu0 }
 0x105   : > { %v1646_v10 = vpop.f32.mrb[5].mxu1  ;;  %v1607_v23 = vadd.f32 %v1606_v22, %v1605_v20  ;;  %v1608_v25 = vpop.f32.mrb[6].mxu0 }
 0x106   : > { %v1647_v11 = vadd.f32 %v1646_v10, %v1645_v8  ;;  %v1648_v14 = vpop.f32.mrb[6].mxu1  ;;  %v1609_v28 = vpop.f32.mrb[7].mxu0 }
 0x107   : > { %v1649_v18 = vpop.f32.mrb[7].mxu1  ;;  %v1052_v29 = vadd.f32 %v1607_v23, %v1457_v0  ;;  %v1610_v30 = vadd.f32 %v1609_v28, %v1608_v25 }
 0x108   : > { %v1650_v19 = vadd.f32 %v1649_v18, %v1648_v14 }
 0x109   : > { %v1117_v34 = vadd.f32 %v1647_v11, %v1052_v29  ;;  %v1055_v35 = vadd.f32 %v1610_v30, %v1457_v0 }
 0x10b   : > { %v1120_v4 = vadd.f32 %v1650_v19, %v1055_v35  ;;  %v1611_v36 = vpop.f32.mrb[8].mxu0 }
 0x10c   : > { %v1651_v31 = vpop.f32.mrb[8].mxu1  ;;  %v1612_v37 = vpop.f32.mrb[9].mxu0 }
 0x10d   : > { %v1652_v32 = vpop.f32.mrb[9].mxu1  ;;  %v1613_v24 = vadd.f32 %v1612_v37, %v1611_v36  ;;  %v1614_v38 = vpop.f32.mrb[10].mxu0 }
 0x10e   : > { %v1653_v39 = vadd.f32 %v1652_v32, %v1651_v31  ;;  %v1654_v48 = vpop.f32.mrb[10].mxu1  ;;  %v1615_v40 = vpop.f32.mrb[11].mxu0 }
 0x10f   : > { %v1655_v50 = vpop.f32.mrb[11].mxu1  ;;  %v1060_v55 = vadd.f32 %v1613_v24, %v1457_v0  ;;  %v1616_v15 = vadd.f32 %v1615_v40, %v1614_v38 }
 0x110   : > { %v1656_v27 = vadd.f32 %v1655_v50, %v1654_v48 }
 0x111   : > { %v1125_v6 = vadd.f32 %v1653_v39, %v1060_v55  ;;  %v1063_v13 = vadd.f32 %v1616_v15, %v1457_v0 }
 0x113   : > { %v1128_v46 = vadd.f32 %v1656_v27, %v1063_v13  ;;  %v1617_v45 = vpop.f32.mrb[12].mxu0 }
 0x114   : > { %v1657_v12 = vpop.f32.mrb[12].mxu1  ;;  %v1618_v33 = vpop.f32.mrb[13].mxu0 }
 0x115   : > { %v1658_v26 = vpop.f32.mrb[13].mxu1  ;;  %v1619_v41 = vadd.f32 %v1618_v33, %v1617_v45  ;;  %v1620_v42 = vpop.f32.mrb[14].mxu0 }
 0x116   : > { %v1659_v43 = vadd.f32 %v1658_v26, %v1657_v12  ;;  %v1660_v44 = vpop.f32.mrb[14].mxu1  ;;  %v1621_v51 = vpop.f32.mrb[15].mxu0 }
 0x117   : > { %v1661_v49 = vpop.f32.mrb[15].mxu1  ;;  %v1068_v53 = vadd.f32 %v1619_v41, %v1457_v0  ;;  %v1622_v54 = vadd.f32 %v1621_v51, %v1620_v42 }
 0x118   : > { %v1662_v21 = vadd.f32 %v1661_v49, %v1660_v44 }
 0x119   : > { %v1133_v59 = vadd.f32 %v1659_v43, %v1068_v53  ;;  %v1071_v60 = vadd.f32 %v1622_v54, %v1457_v0 }
 0x11b   : > { %v1136_v63 = vadd.f32 %v1662_v21, %v1071_v60  ;;  %v1679_v1 = vpop.f32.mrb[16].mxu0 }
 0x11c   : > { %v1719_v52 = vpop.f32.mrb[16].mxu1  ;;  %v1680_v2 = vpop.f32.mrb[17].mxu0 }
 0x11d   : > { %v1720_v56 = vpop.f32.mrb[17].mxu1  ;;  %v1681_v3 = vadd.f32 %v1680_v2, %v1679_v1  ;;  %v1682_v17 = vpop.f32.mrb[18].mxu0 }
 0x11e   : > { %v1721_v57 = vadd.f32 %v1720_v56, %v1719_v52  ;;  %v1722_v58 = vpop.f32.mrb[18].mxu1  ;;  %v1683_v5 = vpop.f32.mrb[19].mxu0 }
 0x11f   : > { %v1723_v61 = vpop.f32.mrb[19].mxu1  ;;  %v1174_v8 = vadd.f32 %v1681_v3, %v1109_v9  ;;  %v1684_v47 = vadd.f32 %v1683_v5, %v1682_v17 }
 0x120   : > { %v1724_v62 = vadd.f32 %v1723_v61, %v1722_v58 }
 0x121   : > { %v1177_v18 = vadd.f32 %v1684_v47, %v1112_v16  ;;  %v1239_v20 = vadd.f32 %v1721_v57, %v1174_v8 }
 0x123   : > { %v1685_v23 = vpop.f32.mrb[20].mxu0  ;;  %v2364_v0 = vadd.f32 %v1724_v62, %v1177_v18 }
 0x124   : > { %v1725_v7 = vpop.f32.mrb[20].mxu1  ;;  %v1686_v25 = vpop.f32.mrb[21].mxu0 }
 0x125   : > { %v1726_v10 = vpop.f32.mrb[21].mxu1  ;;  %v1687_v28 = vadd.f32 %v1686_v25, %v1685_v23  ;;  %v1688_v29 = vpop.f32.mrb[22].mxu0 }
 0x126   : > { %v1727_v11 = vadd.f32 %v1726_v10, %v1725_v7  ;;  %v1728_v14 = vpop.f32.mrb[22].mxu1  ;;  %v1689_v30 = vpop.f32.mrb[23].mxu0 }
 0x127   : > { %v1729_v19 = vpop.f32.mrb[23].mxu1  ;;  %v1182_v32 = vadd.f32 %v1687_v28, %v1117_v34  ;;  %v1690_v35 = vadd.f32 %v1689_v30, %v1688_v29 }
 0x128   : > { %v1730_v22 = vadd.f32 %v1729_v19, %v1728_v14 }
 0x129   : > { %v1185_v50 = vadd.f32 %v1690_v35, %v1120_v4  ;;  %v1247_v36 = vadd.f32 %v1727_v11, %v1182_v32 }
 0x12b   : > { %v1691_v37 = vpop.f32.mrb[24].mxu0  ;;  %v1250_v24 = vadd.f32 %v1730_v22, %v1185_v50 }
 0x12c   : > { %v1731_v31 = vpop.f32.mrb[24].mxu1  ;;  %v1692_v38 = vpop.f32.mrb[25].mxu0 }
 0x12d   : > { %v1732_v39 = vpop.f32.mrb[25].mxu1  ;;  %v1693_v40 = vadd.f32 %v1692_v38, %v1691_v37  ;;  %v1694_v55 = vpop.f32.mrb[26].mxu0 }
 0x12e   : > { %v1733_v9 = vadd.f32 %v1732_v39, %v1731_v31  ;;  %v1734_v48 = vpop.f32.mrb[26].mxu1  ;;  %v1695_v15 = vpop.f32.mrb[27].mxu0 }
 0x12f   : > { %v1735_v27 = vpop.f32.mrb[27].mxu1  ;;  %v1190_v13 = vadd.f32 %v1693_v40, %v1125_v6  ;;  %v1696_v26 = vadd.f32 %v1695_v15, %v1694_v55 }
 0x130   : > { %v1736_v16 = vadd.f32 %v1735_v27, %v1734_v48 }
 0x131   : > { %v1193_v49 = vadd.f32 %v1696_v26, %v1128_v46  ;;  %v1255_v45 = vadd.f32 %v1733_v9, %v1190_v13 }
 0x133   : > { %v1697_v4 = vpop.f32.mrb[28].mxu0  ;;  %v1258_v41 = vadd.f32 %v1736_v16, %v1193_v49 }
 0x134   : > { %v1737_v12 = vpop.f32.mrb[28].mxu1  ;;  %v1698_v42 = vpop.f32.mrb[29].mxu0 }
 0x135   : > { %v1738_v43 = vpop.f32.mrb[29].mxu1  ;;  %v1699_v51 = vadd.f32 %v1698_v42, %v1697_v4  ;;  %v1700_v52 = vpop.f32.mrb[30].mxu0 }
 0x136   : > { %v1739_v44 = vadd.f32 %v1738_v43, %v1737_v12  ;;  %v1740_v34 = vpop.f32.mrb[30].mxu1  ;;  %v1701_v53 = vpop.f32.mrb[31].mxu0 }
 0x137   : > { %v1741_v21 = vpop.f32.mrb[31].mxu1  ;;  %v1198_v56 = vadd.f32 %v1699_v51, %v1133_v59  ;;  %v1702_v57 = vadd.f32 %v1701_v53, %v1700_v52 }
 0x138   : > { %v1742_v33 = vadd.f32 %v1741_v21, %v1740_v34 }
 0x139   : > { %v1201_v61 = vadd.f32 %v1702_v57, %v1136_v63  ;;  %v1263_v62 = vadd.f32 %v1739_v44, %v1198_v56 }
 0x13b   : > { %v1773_v2 = vpop.f32.mrb[32].mxu0  ;;  %v1266_v17 = vadd.f32 %v1742_v33, %v1201_v61 }
 0x13c   : > { %v1777_v54 = vpop.f32.mrb[32].mxu1  ;;  %v1312_v5 = vadd.f32 %v1773_v2, %v1247_v36  ;;  %v1303_v7 = vpop.f32.mrb[33].mxu0 }
 0x13d   : > { %v1319_v58 = vpop.f32.mrb[33].mxu1  ;;  %v1328_v3 = vadd.f32 %v1777_v54, %v1263_v62  ;;  %v1304_v10 = vadd.f32 %v1303_v7, %v1239_v20  ;;  %v1774_v59 = vpop.f32.mrb[34].mxu0 }
 0x13e   : > { %v1320_v6 = vadd.f32 %v1319_v58, %v1255_v45  ;;  %v1778_v60 = vpop.f32.mrb[34].mxu1  ;;  %v1315_v14 = vadd.f32 %v1774_v59, %v1250_v24  ;;  %v1306_v63 = vpop.f32.mrb[35].mxu0  ;;  %v1336_v25 = vmax.f32 %v1312_v5, 0.0 }
 0x13f   : > { %v1322_v1 = vpop.f32.mrb[35].mxu1  ;;  %v1331_v11 = vadd.f32 %v1778_v60, %v1266_v17  ;;  %v1340_v19 = vmax.f32 %v1328_v3, 0.0  ;;  %v1307_v23 = vadd.f32 %v1306_v63, %v2364_v0  ;;  %v1334_v29 = vmax.f32 %v1304_v10, 0.0 }
 0x140   : > { %v1323_v46 = vadd.f32 %v1322_v1, %v1258_v41  ;;  %v1338_v8 = vmax.f32 %v1320_v6, 0.0  ;;  %v1337_v28 = vmax.f32 %v1315_v14, 0.0 }
 0x141   : > { %v1341_v22 = vmax.f32 %v1331_v11, 0.0  ;;  %v1335_v31 = vmax.f32 %v1307_v23, 0.0 }
 0x142   : > { %v1339_v47 = vmax.f32 %v1323_v46, 0.0  ;;  %v1568_v20 = vpack.c.bf16 %v1337_v28, %v1336_v25 }
 0x143   : > { %v1578_v30 = vpack.c.bf16 %v1341_v22, %v1340_v19  ;;  %v1563_v32 = vpack.c.bf16 %v1335_v31, %v1334_v29 }
 0x144   : > { %v1573_v18 = vpack.c.bf16 %v1339_v47, %v1338_v8  ;;  %1580 = vst [vmem:[%s199_s7 + $0x8] sm:$0xff] %v1568_v20  }
 0x145   : > { %1582 = vst [vmem:[%s199_s7 + $0x18] sm:$0xff] %v1578_v30   ;;  %1564 = vst [vmem:[%s199_s7] sm:$0xff] %v1563_v32  }
 0x146   : > { %1581 = vst [vmem:[%s199_s7 + $0x10] sm:$0xff] %v1573_v18  }
 0x147 PF: > { %s13_s14 = sadd.s32 1, %s1933_s14   ;;  %s2384_s12 = smov %s1929_s13 }
 0x148   : > { %p10_p5 = scmp.ge.s32.totalorder %s13_s14, 6   ;;  %s2385_s13 = smov %s2387_s15 }
 0x14a   :  { %12 = sbr.rel (!%p10_p5) target bundleno = 2 (0x2), region = 62 }

</bundles_post_ra>
